<compile_context>
chip_gen: v7x
topology: tpu7x:2x2x1
jax: 0.10.0
libtpu: 0.0.40
codegen_flags: <defaults>
</compile_context>

<pallas_src>
import jax
import jax.numpy as jnp
import numpy as np
from jax import lax
from jax.experimental import pallas as pl
from jax.experimental.pallas import tpu as pltpu
from math import exp

WINDOW_SIZE = 11
SIGMA = 1.5
C1 = 0.01 ** 2
C2 = 0.03 ** 2


def _gaussian_weights(window_size, sigma):
    # Identical to the PyTorch `gaussian()` helper.
    g = [exp(-((x - window_size // 2) ** 2) / float(2 * sigma ** 2))
         for x in range(window_size)]
    s = sum(g)
    return [v / s for v in g]


def _band_matrix(n, window_size, weights):
    """(n, n) banded matrix B with B[i, j] = g[j - i + K//2] (0 outside the band).

    B @ X (resp. X @ B) applies the 1D Gaussian along that axis with the same
    zero-padding semantics as F.conv2d(padding=K//2): out-of-range taps simply
    vanish because the band is truncated at the borders.
    """
    p = window_size // 2
    m = np.zeros((n, n), dtype=np.float32)
    for i in range(n):
        for j in range(max(0, i - p), min(n, i + p + 1)):
            m[i, j] = weights[j - i + p]
    return jnp.asarray(m)


def _make_ssim_kernel(C, H, W):
    CH = C * H
    HIGHEST = lax.Precision.HIGHEST  # keep f32 accuracy on the MXU

    def kernel(x1_ref, x2_ref, gw_ref, gh_ref, o_ref):
        # One whole batch element (all channels) per grid step.
        x1 = x1_ref[...].astype(jnp.float32).reshape(CH, W)   # (C*H, W)
        x2 = x2_ref[...].astype(jnp.float32).reshape(CH, W)
        gw = gw_ref[...]                                       # (W, W)
        gh = gh_ref[...]                                       # (H, H)

        # Batch the five blur inputs along sublanes: (5*C*H, W).
        s = jnp.concatenate([x1, x2, x1 * x1, x2 * x2, x1 * x2], axis=0)

        # Separable Gaussian blur on the MXU: W pass then H pass.
        t = jnp.dot(s, gw, precision=HIGHEST,
                    preferred_element_type=jnp.float32)        # (5*C*H, W)
        t3 = t.reshape(5 * C, H, W)
        gh_b = jnp.broadcast_to(gh, (5 * C, H, H))
        u = jnp.einsum("nij,njw->niw", gh_b, t3, precision=HIGHEST,
                       preferred_element_type=jnp.float32)     # (5*C, H, W)

        mu1 = u[0 * C:1 * C]
        mu2 = u[1 * C:2 * C]
        e11 = u[2 * C:3 * C]
        e22 = u[3 * C:4 * C]
        e12 = u[4 * C:5 * C]

        mu1_sq = mu1 * mu1
        mu2_sq = mu2 * mu2
        mu1_mu2 = mu1 * mu2
        sigma1_sq = e11 - mu1_sq
        sigma2_sq = e22 - mu2_sq
        sigma12 = e12 - mu1_mu2

        num = (2.0 * mu1_mu2 + C1) * (2.0 * sigma12 + C2)
        den = (mu1_sq + mu2_sq + C1) * (sigma1_sq + sigma2_sq + C2)
        ssim_map = num * pl.reciprocal(den, approx=False)      # divide on EUP

        # Fused mean: only the per-batch-element sum leaves the kernel.
        m2 = ssim_map.reshape(CH, W)
        col = jnp.sum(m2, axis=1, keepdims=True)               # lane reduce  (CH, 1)
        o_ref[...] = jnp.sum(col, axis=0, keepdims=True)       # sublane red. (1, 1)

    return kernel


def ssim(img1, img2, window_size=WINDOW_SIZE, size_average=True):
    """JAX/Pallas equivalent of SSIM().forward(img1, img2) for NCHW inputs."""
    assert img1.shape == img2.shape
    B, C, H, W = img1.shape
    g = _gaussian_weights(window_size, SIGMA)
    gw = _band_matrix(W, window_size, g)   # (W, W) banded Gaussian, W pass
    gh = _band_matrix(H, window_size, g)   # (H, H) banded Gaussian, H pass

    kernel = _make_ssim_kernel(C, H, W)

    sums = pl.pallas_call(
        kernel,
        out_shape=jax.ShapeDtypeStruct((B, 1, 1), jnp.float32),
        grid_spec=pltpu.PrefetchScalarGridSpec(
            num_scalar_prefetch=0,
            grid=(B,),
            in_specs=[
                pl.BlockSpec((None, C, H, W), lambda b: (b, 0, 0, 0)),
                pl.BlockSpec((None, C, H, W), lambda b: (b, 0, 0, 0)),
                pl.BlockSpec((W, W), lambda b: (0, 0)),
                pl.BlockSpec((H, H), lambda b: (0, 0)),
            ],
            out_specs=pl.BlockSpec((None, 1, 1), lambda b: (b, 0, 0)),
        ),
        compiler_params=pltpu.CompilerParams(
            dimension_semantics=("parallel",)),
    )(img1, img2, gw, gh)

    per_image_mean = sums.reshape(B) / float(C * H * W)
    out = per_image_mean.mean() if size_average else per_image_mean
    return out.astype(img1.dtype)


if __name__ == "__main__":
    key = jax.random.PRNGKey(0)
    k1, k2 = jax.random.split(key)
    # Small NCHW shapes consistent with the module's forward.
    img1 = jax.random.uniform(k1, (2, 4, 16, 16), dtype=jnp.float32)
    img2 = jax.random.uniform(k2, (2, 4, 16, 16), dtype=jnp.float32)

    out = ssim(img1, img2, window_size=WINDOW_SIZE, size_average=True)
    jax.block_until_ready(out)
    print("KERNEL_OK")
</pallas_src>

<mosaic_0001>
module attributes {stable_mosaic.version = 11 : i64} {
  func.func @kernel(%arg0: i32, %arg1: memref<1x4x16x16xf32, #tpu.memory_space<vmem>>, %arg2: memref<1x4x16x16xf32, #tpu.memory_space<vmem>>, %arg3: memref<16x16xf32, #tpu.memory_space<vmem>>, %arg4: memref<16x16xf32, #tpu.memory_space<vmem>>, %arg5: memref<1x1x1xf32, #tpu.memory_space<vmem>>) attributes {dimension_semantics = [#tpu.dimension_semantics<parallel>], iteration_bounds = array<i64: 2>, scalar_prefetch = 0 : i64, scratch_operands = 0 : i64, tpu.core_type = #tpu.core_type<tc>, window_params = [{transform_indices = @transform_0, window_bounds = array<i64: 1, 4, 16, 16>}, {transform_indices = @transform_1, window_bounds = array<i64: 1, 4, 16, 16>}, {pipeline_mode = #tpu.pipeline_mode<synchronous>, transform_indices = @transform_2, window_bounds = array<i64: 16, 16>}, {pipeline_mode = #tpu.pipeline_mode<synchronous>, transform_indices = @transform_3, window_bounds = array<i64: 16, 16>}, {transform_indices = @transform_4, window_bounds = array<i64: 1, 1, 1>}]} {
    %c0 = arith.constant 0 : index
    %c0_0 = arith.constant 0 : index
    %c0_1 = arith.constant 0 : index
    %c0_2 = arith.constant 0 : index
    %0 = vector.load %arg1[%c0, %c0_0, %c0_1, %c0_2] : memref<1x4x16x16xf32, #tpu.memory_space<vmem>>, vector<1x4x16x16xf32>
    %1 = vector.shape_cast %0 : vector<1x4x16x16xf32> to vector<4x16x16xf32>
    %2 = vector.shape_cast %1 : vector<4x16x16xf32> to vector<64x16xf32>
    %c0_3 = arith.constant 0 : index
    %c0_4 = arith.constant 0 : index
    %c0_5 = arith.constant 0 : index
    %c0_6 = arith.constant 0 : index
    %3 = vector.load %arg2[%c0_3, %c0_4, %c0_5, %c0_6] : memref<1x4x16x16xf32, #tpu.memory_space<vmem>>, vector<1x4x16x16xf32>
    %4 = vector.shape_cast %3 : vector<1x4x16x16xf32> to vector<4x16x16xf32>
    %5 = vector.shape_cast %4 : vector<4x16x16xf32> to vector<64x16xf32>
    %c0_7 = arith.constant 0 : index
    %c0_8 = arith.constant 0 : index
    %6 = vector.load %arg3[%c0_7, %c0_8] : memref<16x16xf32, #tpu.memory_space<vmem>>, vector<16x16xf32>
    %c0_9 = arith.constant 0 : index
    %c0_10 = arith.constant 0 : index
    %7 = vector.load %arg4[%c0_9, %c0_10] : memref<16x16xf32, #tpu.memory_space<vmem>>, vector<16x16xf32>
    %8 = arith.mulf %2, %2 : vector<64x16xf32>
    %9 = arith.mulf %5, %5 : vector<64x16xf32>
    %10 = arith.mulf %2, %5 : vector<64x16xf32>
    %11 = tpu.concatenate %2, %5, %8, %9, %10 in 0 : vector<64x16xf32>, vector<64x16xf32>, vector<64x16xf32>, vector<64x16xf32>, vector<64x16xf32> -> vector<320x16xf32>
    %cst = arith.constant dense<0.000000e+00> : vector<320x16xf32>
    %12 = tpu.matmul %11, %6, %cst {dimension_numbers = #tpu.dot_dimension_numbers<[1], [0], [0], [1], [0, 0, 1, 1], [], []>, precision = #tpu.contract_precision<fp32>} : vector<320x16xf32>, vector<16x16xf32>, vector<320x16xf32> -> vector<320x16xf32>
    %13 = vector.shape_cast %12 : vector<320x16xf32> to vector<20x16x16xf32>
    %14 = vector.shape_cast %7 : vector<16x16xf32> to vector<1x16x16xf32>
    %15 = vector.broadcast %14 : vector<1x16x16xf32> to vector<20x16x16xf32>
    "tpu.trace_start"() <{level = 10 : i32, message = "nij,njw->niw"}> : () -> ()
    %cst_11 = arith.constant dense<0.000000e+00> : vector<20x16x16xf32>
    %16 = tpu.matmul %15, %13, %cst_11 {dimension_numbers = #tpu.dot_dimension_numbers<[2], [1], [1], [2], [0, 0, 0, 1, 1, 2], [0], [0]>, precision = #tpu.contract_precision<fp32>} : vector<20x16x16xf32>, vector<20x16x16xf32>, vector<20x16x16xf32> -> vector<20x16x16xf32>
    "tpu.trace_stop"() : () -> ()
    %17 = vector.extract_strided_slice %16 {offsets = [0, 0, 0], sizes = [4, 16, 16], strides = [1, 1, 1]} : vector<20x16x16xf32> to vector<4x16x16xf32>
    %18 = vector.extract_strided_slice %16 {offsets = [4, 0, 0], sizes = [4, 16, 16], strides = [1, 1, 1]} : vector<20x16x16xf32> to vector<4x16x16xf32>
    %19 = vector.extract_strided_slice %16 {offsets = [8, 0, 0], sizes = [4, 16, 16], strides = [1, 1, 1]} : vector<20x16x16xf32> to vector<4x16x16xf32>
    %20 = vector.extract_strided_slice %16 {offsets = [12, 0, 0], sizes = [4, 16, 16], strides = [1, 1, 1]} : vector<20x16x16xf32> to vector<4x16x16xf32>
    %21 = vector.extract_strided_slice %16 {offsets = [16, 0, 0], sizes = [4, 16, 16], strides = [1, 1, 1]} : vector<20x16x16xf32> to vector<4x16x16xf32>
    %22 = arith.mulf %17, %17 : vector<4x16x16xf32>
    %23 = arith.mulf %18, %18 : vector<4x16x16xf32>
    %24 = arith.mulf %17, %18 : vector<4x16x16xf32>
    %25 = arith.subf %19, %22 : vector<4x16x16xf32>
    %26 = arith.subf %20, %23 : vector<4x16x16xf32>
    %27 = arith.subf %21, %24 : vector<4x16x16xf32>
    %cst_12 = arith.constant 2.000000e+00 : f32
    %28 = vector.broadcast %cst_12 : f32 to vector<4x16x16xf32>
    %29 = arith.mulf %28, %24 : vector<4x16x16xf32>
    %cst_13 = arith.constant 9.99999974E-5 : f32
    %30 = vector.broadcast %cst_13 : f32 to vector<4x16x16xf32>
    %31 = arith.addf %29, %30 : vector<4x16x16xf32>
    %cst_14 = arith.constant 2.000000e+00 : f32
    %32 = vector.broadcast %cst_14 : f32 to vector<4x16x16xf32>
    %33 = arith.mulf %32, %27 : vector<4x16x16xf32>
    %cst_15 = arith.constant 8.99999984E-4 : f32
    %34 = vector.broadcast %cst_15 : f32 to vector<4x16x16xf32>
    %35 = arith.addf %33, %34 : vector<4x16x16xf32>
    %36 = arith.mulf %31, %35 : vector<4x16x16xf32>
    %37 = arith.addf %22, %23 : vector<4x16x16xf32>
    %cst_16 = arith.constant 9.99999974E-5 : f32
    %38 = vector.broadcast %cst_16 : f32 to vector<4x16x16xf32>
    %39 = arith.addf %37, %38 : vector<4x16x16xf32>
    %40 = arith.addf %25, %26 : vector<4x16x16xf32>
    %cst_17 = arith.constant 8.99999984E-4 : f32
    %41 = vector.broadcast %cst_17 : f32 to vector<4x16x16xf32>
    %42 = arith.addf %40, %41 : vector<4x16x16xf32>
    %43 = arith.mulf %39, %42 : vector<4x16x16xf32>
    %44 = tpu.reciprocal %43 : vector<4x16x16xf32> -> vector<4x16x16xf32>
    %45 = arith.mulf %36, %44 : vector<4x16x16xf32>
    %46 = vector.shape_cast %45 : vector<4x16x16xf32> to vector<64x16xf32>
    %cst_18 = arith.constant dense<0.000000e+00> : vector<64xf32>
    %47 = vector.multi_reduction <add>, %46, %cst_18 [1] : vector<64x16xf32> to vector<64xf32>
    %48 = vector.shape_cast %47 : vector<64xf32> to vector<64x1xf32>
    %cst_19 = arith.constant dense<0.000000e+00> : vector<1xf32>
    %49 = vector.multi_reduction <add>, %48, %cst_19 [0] : vector<64x1xf32> to vector<1xf32>
    %50 = vector.shape_cast %49 : vector<1xf32> to vector<1x1xf32>
    %c0_20 = arith.constant 0 : index
    %c0_21 = arith.constant 0 : index
    %c0_22 = arith.constant 0 : index
    %51 = vector.load %arg5[%c0_20, %c0_21, %c0_22] : memref<1x1x1xf32, #tpu.memory_space<vmem>>, vector<1x1x1xf32>
    %52 = vector.shape_cast %51 : vector<1x1x1xf32> to vector<1x1xf32>
    %53 = vector.shape_cast %50 : vector<1x1xf32> to vector<1x1x1xf32>
    tpu.vector_store %arg5[%c0_20, %c0_21, %c0_22], %53 {strides = array<i32>} : memref<1x1x1xf32, #tpu.memory_space<vmem>>, vector<1x1x1xf32>,
    return
  }
  func.func @transform_0(%arg0: i32) -> (i32, i32, i32, i32) {
    %c0_i32 = arith.constant 0 : i32
    %c0_i32_0 = arith.constant 0 : i32
    %c0_i32_1 = arith.constant 0 : i32
    %c0_i32_2 = arith.constant 0 : i32
    return %arg0, %c0_i32, %c0_i32_0, %c0_i32_1 : i32, i32, i32, i32
  }
  func.func @transform_1(%arg0: i32) -> (i32, i32, i32, i32) {
    %c0_i32 = arith.constant 0 : i32
    %c0_i32_0 = arith.constant 0 : i32
    %c0_i32_1 = arith.constant 0 : i32
    %c0_i32_2 = arith.constant 0 : i32
    return %arg0, %c0_i32, %c0_i32_0, %c0_i32_1 : i32, i32, i32, i32
  }
  func.func @transform_2(%arg0: i32) -> (i32, i32) {
    %c0_i32 = arith.constant 0 : i32
    %c0_i32_0 = arith.constant 0 : i32
    %c0_i32_1 = arith.constant 0 : i32
    return %c0_i32, %c0_i32_0 : i32, i32
  }
  func.func @transform_3(%arg0: i32) -> (i32, i32) {
    %c0_i32 = arith.constant 0 : i32
    %c0_i32_0 = arith.constant 0 : i32
    %c0_i32_1 = arith.constant 0 : i32
    return %c0_i32, %c0_i32_0 : i32, i32
  }
  func.func @transform_4(%arg0: i32) -> (i32, i32, i32) {
    %c0_i32 = arith.constant 0 : i32
    %c0_i32_0 = arith.constant 0 : i32
    %c0_i32_1 = arith.constant 0 : i32
    return %arg0, %c0_i32, %c0_i32_0 : i32, i32, i32
  }
}

</mosaic_0001>

<bundles_post_ra>
// kernel: tpu_custom_call.1
= control target key start
LH: loop header
LB: loop body
LE: loop exit
PB: predicated region body
PF: predicated region fallthrough
CT: control target
= control target key end

     0   :  { %9 = vsyncpa [#allocation3], 0  ;;  %s17983_s0 = inlined_call_operand.hbm [shape: f32[2,4,16,16], index: 0, kind: input, shape index: {}]   ;;  %s17984_s1 = inlined_call_operand.hbm [shape: f32[2,4,16,16], index: 1, kind: input, shape index: {}]   ;;  %s17985_s2 = inlined_call_operand.hbm [shape: f32[16,16], index: 2, kind: input, shape index: {}]   ;;  %s17986_s3 = inlined_call_operand.hbm [shape: f32[16,16], index: 3, kind: input, shape index: {}]   ;;  %s17987_s4 = inlined_call_operand.vmem [shape: f32[2,1,1], index: 4, kind: output, shape index: {}]  }
   0x1   :  { %11 = vsyncpa [#allocation3 + $0x1], 0 }
   0x2   :  { %12 = vsyncpa [#allocation5], 0 }
   0x3   :  { %14 = vsyncpa [#allocation5 + $0x1], 0 }
   0x4   :  { %15 = vsyncpa [#allocation8], 0  ;;  %s16072_s15 = smov 0   ;;  %s16074_s16 = smov 0  }
   0x5   :  { %s16076_s17 = smov 0   ;;  %s16078_s18 = smov 0  }
   0x6 LB: > { %s16091_s19 = sadd.s32 4294967295, %s16039_s18   ;;  %p41_p0 = scmp.ne.s32.totalorder %s16031_s16, %s16027_s15  ;;  %s16039_s18 = sphi %s16078_s18, %s18410_s18   ;;  %s16035_s17 = sphi %s16076_s17, %s18409_s17   ;;  %s16031_s16 = sphi %s16074_s16, %s18408_s16   ;;  %s16027_s15 = sphi %s16072_s15, %s18407_s15  }
   0x7   : > { %p17988_p1 = scmp.eq.s32.totalorder %s16091_s19, 0  ;;  %p12915_p2 = scmp.ge.s32.totalorder %s16039_s18, 1 }
   0x8   : > { %p146_p3 = scmp.lt.s32.totalorder %s16039_s18, 3  ;;  %s16041_s22 = smov [#allocation6]  }
   0x9   : > { %p16099_p4 = por %p17988_p1, %p41_p0  ;;  %s158_s23 = sshll.u32 %s16041_s22, 4  ;;  %s159_s23 = int_to_ptr.vmem [resolvable:$true] %s158_s23 }
   0xa   : > { %p16103_p5 = pnand %p12915_p2, %p146_p3  ;;  %s16042_s25 = smov [#allocation7]  }
   0xb   : > { %s18157_s20 = scalar_select %p16099_p4, 1, 0 }
   0xc   : > { %s18158_s21 = scalar_select %p16103_p5, 1, 0 }
   0xd   : > { %p15806_p6 = pneg %p16103_p5  ;;  %s171_s26 = sshll.u32 %s16042_s25, 4  ;;  %s16115_s26 = int_to_ptr.vmem [resolvable:$true] %s171_s26 }
   0xe   : > { %s15877_s29 = scalar_lea.hbm %s17985_s2, 256 }
   0xf   : > { %p16111_p7 = pnand %p15806_p6, %p17988_p1  ;;  %p15878_p8 = scmp.ne.s32.totalorder %s17985_s2, %s15877_s29 }
  0x10   : > { %p15884_p12 = scmp.lt.u32.totalorder %s15877_s29, %s17985_s2 }
  0x11   : > { %p15879_p9 = pneg %p16111_p7 }
  0x13   : > { %p15880_p10 = pnand %p15879_p9, %p15878_p8 }
  0x15   : > { %p15881_p11 = pneg %p15880_p10 }
  0x17   : > { %p15886_p13 = pnand %p15884_p12, %p15881_p11 }
  0x19   : > { %15889 = shalt.err (!%p15886_p13)
}
  0x1a   : > { %s15890_s8 = scalar_lea.vmem %s159_s23, 256  ;;  %p15898_p6 = scmp.lt.s32.totalorder %s159_s23, %s159_s23 }
  0x1b   : > { %p15891_p0 = scmp.ne.s32.totalorder %s159_s23, %s15890_s8  ;;  %p15899_p1 = scmp.lt.s32.totalorder %s15890_s8, %s15890_s8 }
  0x1d   : > { %p15893_p2 = pnand %p15891_p0, %p15879_p9  ;;  %p15900_p4 = por %p15899_p1, %p15898_p6 }
  0x1f   : > { %p15894_p3 = pneg %p15893_p2 }
  0x21   : > { %p15901_p5 = pnand %p15900_p4, %p15894_p3 }
  0x23   : > { %15904 = shalt.err (!%p15901_p5)
}
  0x24   : > { %s16043_s9 = smov 128   ;;  %s16044_s10 = smov 8  }
  0x25   : > { %15809 = dma.hbm_to_vmem [thread:$0]  (!%p16111_p7), %s17985_s2, 256, %s159_s23, [#allocation5], %s16043_s9, %s16043_s9, %s16044_s10  }
  0x26   : > { %s15905_s15 = scalar_lea.hbm %s17986_s3, 256 }
  0x27   : > { %p15906_p1 = scmp.ne.s32.totalorder %s17986_s3, %s15905_s15  ;;  %p15912_p8 = scmp.lt.u32.totalorder %s15905_s15, %s17986_s3 }
  0x29   : > { %p15908_p4 = pnand %p15906_p1, %p15879_p9 }
  0x2b   : > { %p15909_p5 = pneg %p15908_p4 }
  0x2d   : > { %p15914_p10 = pnand %p15912_p8, %p15909_p5 }
  0x2f   : > { %15917 = shalt.err (!%p15914_p10)
}
  0x30   : > { %s15918_s23 = scalar_lea.vmem %s16115_s26, 256  ;;  %p15926_p0 = scmp.lt.s32.totalorder %s16115_s26, %s16115_s26 }
  0x31   : > { %p15919_p11 = scmp.ne.s32.totalorder %s16115_s26, %s15918_s23  ;;  %p15927_p2 = scmp.lt.s32.totalorder %s15918_s23, %s15918_s23 }
  0x33   : > { %p15921_p12 = pnand %p15919_p11, %p15879_p9  ;;  %p15928_p3 = por %p15927_p2, %p15926_p0 }
  0x35   : > { %p15922_p13 = pneg %p15921_p12 }
  0x37   : > { %p15929_p6 = pnand %p15928_p3, %p15922_p13 }
  0x39   : > { %15932 = shalt.err (!%p15929_p6)
}
  0x3a   : > { %15812 = dma.hbm_to_vmem [thread:$0]  (!%p16111_p7), %s17986_s3, 256, %s16115_s26, [#allocation8], %s16043_s9, %s16043_s9, %s16044_s10  }
  0x3b   : > { %s16171_s5 = sadd.s32 1, %s16039_s18   ;;  %s28_s24 = sadd.s32 1, %s16035_s17 }
  0x3c   : > { %s25_s6 = ssub.s32 %s16039_s18, %s16171_s5  ;;  %p35_p9 = scmp.ne.s32.totalorder %s16035_s17, %s16031_s16 }
  0x3d   : > { %p26_p1 = scmp.eq.s32.totalorder %s25_s6, 0  ;;  %p36_p4 = scmp.eq.s32.totalorder %s16039_s18, 0 }
  0x3e   : > { %p15822_p5 = scmp.lt.s32.totalorder %s16039_s18, 2  ;;  %s185_s7 = sand.u32 1, %s16035_s17  }
  0x3f   : > { %s16182_s8 = scalar_select %p26_p1, %s16035_s17, %s28_s24  }
  0x40   : > { %p37_p8 = por %p36_p4, %p35_p9  ;;  %s16184_s11 = sshll.u32 %s185_s7, 6 }
  0x41   : > { %s12932_s12 = sshll.u32 %s16039_s18, 10  ;;  %s189_s15 = scalar_lea.vmem [#allocation2], %s16184_s11 }
  0x42   : > { %s16190_s26 = scalar_lea.hbm %s17983_s0, %s12932_s12  ;;  %s196_s22 = sshll.u32 %s189_s15, 4  ;;  %s16197_s22 = int_to_ptr.vmem [resolvable:$true] %s196_s22 }
  0x43   : > { %p16193_p7 = pnand %p15822_p5, %p37_p8  ;;  %s16202_s23 = scalar_lea.hbm %s17984_s1, %s12932_s12 }
  0x44   : > { %s16204_s29 = scalar_lea.sflag [#allocation3], %s185_s7  ;;  %s15933_s30 = scalar_lea.hbm %s16190_s26, 1024 }
  0x45   : > { %p15934_p10 = scmp.ne.s32.totalorder %s16190_s26, %s15933_s30  ;;  %p15935_p11 = pneg %p16193_p7 }
  0x46   : > { %s15938_s13 = scalar_lea.hbm %s17983_s0, 2048  ;;  %p15939_p0 = scmp.lt.u32.totalorder %s16190_s26, %s17983_s0 }
  0x47   : > { %p15936_p12 = pnand %p15935_p11, %p15934_p10  ;;  %p15940_p2 = scmp.lt.u32.totalorder %s15938_s13, %s15933_s30 }
  0x48   : > { %p15942_p6 = scmp.lt.u32.totalorder %s15933_s30, %s16190_s26 }
  0x49   : > { %p15937_p13 = pneg %p15936_p12  ;;  %p15941_p3 = por %p15940_p2, %p15939_p0 }
  0x4b   : > { %p15943_p9 = por %p15942_p6, %p15941_p3 }
  0x4d   : > { %p15944_p1 = pnand %p15943_p9, %p15937_p13 }
  0x4f   : > { %15947 = shalt.err (!%p15944_p1)
}
  0x50   : > { %s15948_s7 = scalar_lea.vmem %s16197_s22, 1024  ;;  %s16045_s12 = smov [#allocation2]  }
  0x51   : > { %p15949_p4 = scmp.ne.s32.totalorder %s16197_s22, %s15948_s7  ;;  %s15953_s27 = sshll.u32 %s16045_s12, 4  ;;  %s15954_s27 = int_to_ptr.vmem [resolvable:$false] %s15953_s27 }
  0x52   : > { %s15955_s28 = scalar_lea.vmem %s15954_s27, 2048  ;;  %p15956_p10 = scmp.lt.s32.totalorder %s16197_s22, %s15954_s27 }
  0x53   : > { %p15951_p5 = pnand %p15949_p4, %p15935_p11  ;;  %p15957_p12 = scmp.lt.s32.totalorder %s15955_s28, %s15948_s7 }
  0x55   : > { %p15952_p8 = pneg %p15951_p5  ;;  %p15958_p0 = por %p15957_p12, %p15956_p10 }
  0x57   : > { %p15959_p2 = pnand %p15958_p0, %p15952_p8 }
  0x59   : > { %15962 = shalt.err (!%p15959_p2)
}
  0x5a   : > { %15816 = dma.hbm_to_vmem [thread:$0]  (!%p16193_p7), %s16190_s26, 1024, %s16197_s22, %s16204_s29, %s16043_s9, %s16043_s9, %s16044_s10  }
  0x5b   : > { %s210_s30 = scalar_lea.vmem [#allocation4], %s16184_s11  ;;  %s206_s6 = sand.u32 1, %s16039_s18  }
  0x5c   : > { %s217_s24 = sshll.u32 %s210_s30, 4  ;;  %s16239_s13 = scalar_lea.sflag [#allocation5], %s206_s6  ;;  %s16237_s24 = int_to_ptr.vmem [resolvable:$true] %s217_s24 }
  0x5d   : > { %s15963_s14 = scalar_lea.hbm %s16202_s23, 1024  ;;  %s15968_s12 = scalar_lea.hbm %s17984_s1, 2048 }
  0x5e   : > { %p15964_p13 = scmp.ne.s32.totalorder %s16202_s23, %s15963_s14  ;;  %p15969_p9 = scmp.lt.u32.totalorder %s16202_s23, %s17984_s1 }
  0x5f   : > { %p15970_p1 = scmp.lt.u32.totalorder %s15968_s12, %s15963_s14  ;;  %p15972_p5 = scmp.lt.u32.totalorder %s15963_s14, %s16202_s23 }
  0x60   : > { %p15966_p3 = pnand %p15964_p13, %p15935_p11 }
  0x61   : > { %p15971_p4 = por %p15970_p1, %p15969_p9 }
  0x62   : > { %p15967_p6 = pneg %p15966_p3 }
  0x63   : > { %p15973_p8 = por %p15972_p5, %p15971_p4 }
  0x65   : > { %p15974_p10 = pnand %p15973_p8, %p15967_p6 }
  0x67   : > { %15977 = shalt.err (!%p15974_p10)
}
  0x68   : > { %s15978_s18 = scalar_lea.vmem %s16237_s24, 1024  ;;  %s16046_s11 = smov [#allocation4]  }
  0x69   : > { %p15979_p12 = scmp.ne.s32.totalorder %s16237_s24, %s15978_s18  ;;  %s15983_s26 = sshll.u32 %s16046_s11, 4  ;;  %s15984_s26 = int_to_ptr.vmem [resolvable:$false] %s15983_s26 }
  0x6a   : > { %s15985_s22 = scalar_lea.vmem %s15984_s26, 2048  ;;  %p15986_p13 = scmp.lt.s32.totalorder %s16237_s24, %s15984_s26 }
  0x6b   : > { %p15981_p0 = pnand %p15979_p12, %p15935_p11  ;;  %p15987_p3 = scmp.lt.s32.totalorder %s15985_s22, %s15978_s18 }
  0x6d   : > { %p15982_p2 = pneg %p15981_p0  ;;  %p15988_p9 = por %p15987_p3, %p15986_p13 }
  0x6f   : > { %p15989_p1 = pnand %p15988_p9, %p15982_p2 }
  0x71   : > { %15992 = shalt.err (!%p15989_p1)
}
  0x72   : > { %15819 = dma.hbm_to_vmem [thread:$0]  (!%p16193_p7), %s16202_s23, 1024, %s16237_s24, %s16239_s13, %s16043_s9, %s16043_s9, %s16044_s10  }
  0x73   : > { %p18161_p11 = scmp.ne.s32.totalorder %s18158_s21, 0 }
  0x75   : > { %229 = sbr.rel (%p18161_p11) target bundleno = 2032 (0x7f0), region = 36 }
  0x7c   : > { %s231_s29 = sand.u32 1, %s16031_s16   ;;  %p18162_p6 = scmp.ne.s32.totalorder %s18157_s20, 0 }
  0x7d   : > { %s12926_s30 = sshll.u32 %s231_s29, 6  ;;  %s232_s6 = scalar_lea.sflag [#allocation3], %s231_s29 }
  0x7e   : > { %s16271_s14 = scalar_lea.vmem [#allocation2], %s12926_s30 }
  0x7f   : > { %16010 = dma.done.wait (%p18162_p6), %s232_s6, 1024  }
  0x80   : > { %16012 = vsyncadd (%p18162_p6), %s232_s6, 4294966272  ;;  %s240_s25 = sand.u32 1, %s16091_s19   ;;  %s16278_s9 = scalar_lea.vmem [#allocation4], %s12926_s30 }
  0x81   : > { %s241_s15 = scalar_lea.sflag [#allocation5], %s240_s25 }
  0x82   : > { %16014 = dma.done.wait (%p18162_p6), %s241_s15, 1024  }
  0x83   : > { %16016 = vsyncadd (%p18162_p6), %s241_s15, 4294966272  ;;  %p18163_p7 = scmp.eq.s32.totalorder %s16091_s19, 0 }
  0x85   : > { %16018 = dma.done.wait (%p18163_p7), [#allocation5], 256   ;;  %p18164_p4 = pmov %p18163_p7 }
  0x87   : > { %16020 = vsyncadd (%p18164_p4), [#allocation5], 4294967040  ;;  %p18165_p5 = pmov %p18164_p4 }
  0x88   : > { %p18166_p8 = pmov %p18164_p4 }
  0x89   : > { %16022 = dma.done.wait (%p18165_p5), [#allocation8], 256  }
  0x8a   : > { %16024 = vsyncadd (%p18166_p8), [#allocation8], 4294967040  ;;  %vm327_vm0 = vcmask 130048   ;;  %v299_v0 = vld [vmem:[#allocation6] sm:$0xff]  ;;  %v300_v1 = vld [vmem:[#allocation6 + $0x8] sm:$0xff]  ;;  %p280_p10 = scmp.lt.s32.totalorder %s16091_s19, 1 }
  0x8b   : > { %v16293_v2 = vld [vmem:[%s16271_s14] sm:$0xff]  ;;  %v449_v3 = vand.u32 4294901760, %v299_v0  ;;  %v452_v4 = vand.u32 4294901760, %v300_v1  ;;  %v16298_v6 = vld [vmem:[%s16271_s14 + $0x8] sm:$0xff]  ;;  %v16301_v7 = vld [vmem:[%s16271_s14 + $0x10] sm:$0xff]  ;;  %vm12811_vm1 = vcmask 0  }
  0x8c   : > { %v329_v5 = vsel %vm327_vm0, %v16293_v2, 0  ;;  %v16305_v8 = vmul.f32 %v16293_v2, %v16293_v2  ;;  %v332_v10 = vsel %vm327_vm0, %v16298_v6, 0  ;;  %v335_v11 = vsel %vm327_vm0, %v16301_v7, 0  ;;  %v16314_v12 = vld [vmem:[%s16271_s14 + $0x18] sm:$0xff]  ;;  %v16317_v13 = vld [vmem:[%s16271_s14 + $0x20] sm:$0xff]  ;;  %v16320_v14 = vld [vmem:[%s16271_s14 + $0x28] sm:$0xff] }
  0x8d   : > { %v16307_v9 = vand.u32 4294901760, %v329_v5  ;;  %v16322_v15 = vpack.c.bf16 %v452_v4, %v449_v3  ;;  %v16324_v16 = vand.u32 4294901760, %v332_v10  ;;  %v16326_v17 = vand.u32 4294901760, %v335_v11  ;;  %v16386_v43 = vld [vmem:[%s16271_s14 + $0x30] sm:$0xff]  ;;  %v16389_v44 = vld [vmem:[%s16271_s14 + $0x38] sm:$0xff]  ;;  %v16392_v45 = vld [vmem:[%s16278_s9] sm:$0xff] }
  0x8e   : > { %v338_v18 = vsel %vm327_vm0, %v16314_v12, 0  ;;  %v16335_v21 = vsub.f32 %v299_v0, %v449_v3  ;;  %v16337_v22 = vsub.f32 %v300_v1, %v452_v4  ;;  %v341_v25 = vsel %vm327_vm0, %v16317_v13, 0  ;;  %v16398_v50 = vld [vmem:[%s16278_s9 + $0x8] sm:$0xff]  ;;  %v16403_v55 = vld [vmem:[%s16278_s9 + $0x10] sm:$0xff]  ;;  %v16406_v56 = vld [vmem:[%s16278_s9 + $0x18] sm:$0xff]  ;;  %s18412_s19 = smov (!%p280_p10, %s16091_s19), 1 }
  0x8f   : > { %v16331_v19 = vsub.f32 %v329_v5, %v16307_v9  ;;  %v16333_v20 = vand.u32 4294901760, %v338_v18  ;;  %14891 = vmatprep.subr.bf16.mxu0 %v16322_v15  ;;  %v16341_v23 = vsub.f32 %v332_v10, %v16324_v16  ;;  %v16344_v24 = vsub.f32 %v335_v11, %v16326_v17  ;;  %v16431_v10 = vld [vmem:[%s16278_s9 + $0x20] sm:$0xff]  ;;  %v16434_v11 = vld [vmem:[%s16278_s9 + $0x28] sm:$0xff]  ;;  %s282_s10 = scalar_lea.vmem %s17987_s4, %s18412_s19 }
  0x90   : > { %v344_v26 = vsel %vm327_vm0, %v16320_v14, 0  ;;  %14893 = vmatpush3.bf16.msra.mxu0 %v16322_v15  ;;  %v18004_v29 = vand.u32 4294901760, %v16335_v21  ;;  %v18001_v30 = vand.u32 4294901760, %v16337_v22  ;;  %v16359_v33 = vand.u32 4294901760, %v341_v25 }
  0x91   : > { %18167 = vst [vmem:[#allocation13_spill] sm:$0xff] %v16331_v19  ;;  %18168 = vst [vmem:[#allocation14_spill] sm:$0xff] %v16341_v23  ;;  %v18000_v27 = vand.u32 4294901760, %v16331_v19  ;;  %v16353_v28 = vsub.f32 %v338_v18, %v16333_v20  ;;  %v17997_v31 = vand.u32 4294901760, %v16341_v23  ;;  %v17996_v32 = vand.u32 4294901760, %v16344_v24 }
  0x92   : > { %18169 = vst [vmem:[#allocation15_spill] sm:$0xff] %v16344_v24  ;;  %v16361_v34 = vand.u32 4294901760, %v344_v26  ;;  %v919_v37 = vsub.f32 %v16335_v21, %v18004_v29  ;;  %v926_v38 = vsub.f32 %v16337_v22, %v18001_v30  ;;  %v16380_v41 = vsub.f32 %v341_v25, %v16359_v33 }
  0x93   : > { %18170 = vst [vmem:[#allocation16_spill] sm:$0xff] %v16353_v28  ;;  %v518_v35 = vsub.f32 %v16331_v19, %v18000_v27  ;;  %v17995_v36 = vand.u32 4294901760, %v16353_v28  ;;  %v528_v39 = vsub.f32 %v16341_v23, %v17997_v31  ;;  %v538_v40 = vsub.f32 %v16344_v24, %v17996_v32 }
  0x94   : > { %18171 = vst [vmem:[#allocation17_spill] sm:$0xff] %v16380_v41  ;;  %v16383_v42 = vsub.f32 %v344_v26, %v16361_v34  ;;  %v920_v48 = vand.u32 4294901760, %v919_v37  ;;  %v927_v49 = vand.u32 4294901760, %v926_v38  ;;  %v17993_v53 = vand.u32 4294901760, %v16380_v41 }
  0x95   : > { %v519_v46 = vand.u32 4294901760, %v518_v35  ;;  %v548_v47 = vsub.f32 %v16353_v28, %v17995_v36  ;;  %v529_v51 = vand.u32 4294901760, %v528_v39  ;;  %v539_v52 = vand.u32 4294901760, %v538_v40 }
  0x96   : > { %18172 = vst [vmem:[#allocation18_spill] sm:$0xff] %v16383_v42  ;;  %v17991_v54 = vand.u32 4294901760, %v16383_v42  ;;  %v14894_v58 = vpack.c.bf16 %v927_v49, %v920_v48  ;;  %v347_v59 = vsel %vm327_vm0, %v16386_v43, 0  ;;  %v350_v60 = vsel %vm327_vm0, %v16389_v44, 0 }
  0x97   : > { %13670 = vmatprep.mubr.f32.mxu0 %v519_v46  ;;  %v549_v57 = vand.u32 4294901760, %v548_v47  ;;  %v558_v61 = vsub.f32 %v16380_v41, %v17993_v53  ;;  %v16418_v63 = vand.u32 4294901760, %v347_v59  ;;  %v16420_v0 = vand.u32 4294901760, %v350_v60 }
  0x98   : > { %13671 = vmatmul.mubr.f32.vlgmr.msra.gmra.mrb[0].mxu0 %v529_v51  ;;  %v568_v62 = vsub.f32 %v16383_v42, %v17991_v54  ;;  %14895 = vmatprep.subr.bf16.mxu0 %v14894_v58  ;;  %v353_v1 = vsel %vm327_vm0, %v16392_v45, 0  ;;  %v356_v3 = vsel %vm327_vm0, %v16398_v50, 0  ;;  %v359_v4 = vsel %vm327_vm0, %v16403_v55, 0  ;;  %v16486_v54 = vld [vmem:[%s16278_s9 + $0x38] sm:$0xff] }
  0x99   : > { %13673 = vmatprep.mubr.f32.mxu0 %v539_v52  ;;  %v362_v5 = vsel %vm327_vm0, %v16406_v56, 0  ;;  %14897 = vmatpush3.bf16.msra.mxu0 %v14894_v58  ;;  %v559_v18 = vand.u32 4294901760, %v558_v61  ;;  %v16437_v26 = vsub.f32 %v347_v59, %v16418_v63  ;;  %v16440_v35 = vsub.f32 %v350_v60, %v16420_v0 }
  0x9a   : > { %v569_v25 = vand.u32 4294901760, %v568_v62  ;;  %v16442_v37 = vand.u32 4294901760, %v353_v1  ;;  %v16444_v38 = vand.u32 4294901760, %v356_v3  ;;  %v16446_v39 = vand.u32 4294901760, %v359_v4 }
  0x9b   : > { %18173 = vst [vmem:[#allocation19_spill] sm:$0xff] %v16437_v26  ;;  %18174 = vst [vmem:[#allocation20_spill] sm:$0xff] %v16440_v35  ;;  %v16448_v40 = vand.u32 4294901760, %v362_v5  ;;  %v17992_v46 = vand.u32 4294901760, %v16437_v26  ;;  %v17994_v47 = vand.u32 4294901760, %v16440_v35  ;;  %v365_v48 = vsel %vm327_vm0, %v16431_v10, 0 }
  0x9c   : > { %13674 = vmatmul.mubr.f32.gmra.mrb[2].mxu0 %v549_v57  ;;  %v368_v49 = vsel %vm327_vm0, %v16434_v11, 0  ;;  %v16457_v51 = vsub.f32 %v353_v1, %v16442_v37  ;;  %v16460_v52 = vsub.f32 %v356_v3, %v16444_v38  ;;  %v16463_v57 = vsub.f32 %v359_v4, %v16446_v39 }
  0x9d   : > { %13676 = vmatprep.mubr.f32.mxu0 %v559_v18  ;;  %v16466_v58 = vsub.f32 %v362_v5, %v16448_v40  ;;  %v578_v59 = vsub.f32 %v16437_v26, %v17992_v46  ;;  %v588_v60 = vsub.f32 %v16440_v35, %v17994_v47  ;;  %v16474_v61 = vand.u32 4294901760, %v365_v48  ;;  %v16483_v18 = vld [vmem:[%s16278_s9 + $0x30] sm:$0xff] }
  0x9e   : > { %18175 = vst [vmem:[#allocation21_spill] sm:$0xff] %v16457_v51  ;;  %18176 = vst [vmem:[#allocation22_spill] sm:$0xff] %v16460_v52  ;;  %v16476_v62 = vand.u32 4294901760, %v368_v49  ;;  %v17998_v1 = vand.u32 4294901760, %v16457_v51  ;;  %v17999_v3 = vand.u32 4294901760, %v16460_v52  ;;  %v18002_v4 = vand.u32 4294901760, %v16463_v57 }
  0x9f   : > { %18177 = vst [vmem:[#allocation23_spill] sm:$0xff] %v16463_v57  ;;  %18178 = vst [vmem:[#allocation24_spill] sm:$0xff] %v16466_v58  ;;  %v18003_v5 = vand.u32 4294901760, %v16466_v58  ;;  %v579_v46 = vand.u32 4294901760, %v578_v59  ;;  %v589_v53 = vand.u32 4294901760, %v588_v60  ;;  %v16489_v47 = vsub.f32 %v365_v48, %v16474_v61 }
  0xa0   : > { %13677 = vmatmul.mubr.f32.gmra.mrb[4].mxu0 %v569_v25  ;;  %v16492_v36 = vsub.f32 %v368_v49, %v16476_v62  ;;  %v598_v32 = vsub.f32 %v16457_v51, %v17998_v1  ;;  %v608_v31 = vsub.f32 %v16460_v52, %v17999_v3  ;;  %v618_v25 = vsub.f32 %v16463_v57, %v18002_v4 }
  0xa1   : > { %18179 = vst [vmem:[#allocation25_spill] sm:$0xff] %v16489_v47  ;;  %v628_v48 = vsub.f32 %v16466_v58, %v18003_v5  ;;  %13679 = vmatprep.mubr.f32.mxu0 %v579_v46  ;;  %v18007_v49 = vand.u32 4294901760, %v16489_v47  ;;  %v371_v60 = vsel %vm327_vm0, %v16483_v18, 0  ;;  %v374_v1 = vsel %vm327_vm0, %v16486_v54, 0 }
  0xa2   : > { %18180 = vst [vmem:[#allocation26_spill] sm:$0xff] %v16492_v36  ;;  %v599_v3 = vand.u32 4294901760, %v598_v32  ;;  %v609_v27 = vand.u32 4294901760, %v608_v31  ;;  %v619_v30 = vand.u32 4294901760, %v618_v25  ;;  %v16515_v46 = vand.u32 4294901760, %v371_v60 }
  0xa3   : > { %v629_v4 = vand.u32 4294901760, %v628_v48  ;;  %v638_v5 = vsub.f32 %v16489_v47, %v18007_v49  ;;  %v16517_v29 = vand.u32 4294901760, %v374_v1  ;;  %v377_v59 = vsel %vm327_vm0, %v16305_v8, 0 }
  0xa4   : > { %13680 = vmatmul.mubr.f32.gmra.mrb[6].mxu0 %v589_v53  ;;  %v304_v58 = vmul.f32 %v16298_v6, %v16298_v6  ;;  %v305_v31 = vmul.f32 %v16301_v7, %v16301_v7  ;;  %v306_v32 = vmul.f32 %v16314_v12, %v16314_v12  ;;  %v18181_v25 = vand.u32 4294901760, %v16492_v36 }
  0xa5   : > { %13682 = vmatprep.mubr.f32.mxu0 %v599_v3  ;;  %v639_v53 = vand.u32 4294901760, %v638_v5  ;;  %v16531_v49 = vsub.f32 %v371_v60, %v16515_v46  ;;  %v16534_v3 = vsub.f32 %v374_v1, %v16517_v29  ;;  %v16536_v8 = vand.u32 4294901760, %v377_v59 }
  0xa6   : > { %v648_v48 = vsub.f32 %v16492_v36, %v18181_v25  ;;  %v380_v47 = vsel %vm327_vm0, %v304_v58, 0  ;;  %v383_v57 = vsel %vm327_vm0, %v305_v31, 0  ;;  %v386_v52 = vsel %vm327_vm0, %v306_v32, 0 }
  0xa7   : > { %18182 = vst [vmem:[#allocation27_spill] sm:$0xff] %v16531_v49  ;;  %18183 = vst [vmem:[#allocation28_spill] sm:$0xff] %v16534_v3  ;;  %v18026_v5 = vand.u32 4294901760, %v16531_v49  ;;  %v16543_v25 = vand.u32 4294901760, %v380_v47  ;;  %v16545_v60 = vand.u32 4294901760, %v383_v57  ;;  %v16548_v1 = vsub.f32 %v377_v59, %v16536_v8 }
  0xa8   : > { %18184 = vst [vmem:[#allocation29_spill] sm:$0xff] %v16536_v8  ;;  %13683 = vmatmul.mubr.f32.gmra.mrb[8].mxu0 %v609_v27  ;;  %v16550_v36 = vand.u32 4294901760, %v386_v52  ;;  %v307_v58 = vmul.f32 %v16317_v13, %v16317_v13  ;;  %v308_v27 = vmul.f32 %v16320_v14, %v16320_v14  ;;  %v649_v31 = vand.u32 4294901760, %v648_v48 }
  0xa9   : > { %18185 = vst [vmem:[#allocation30_spill] sm:$0xff] %v16543_v25  ;;  %18186 = vst [vmem:[#allocation31_spill] sm:$0xff] %v16545_v60  ;;  %13685 = vmatprep.mubr.f32.mxu0 %v619_v30  ;;  %v658_v32 = vsub.f32 %v16531_v49, %v18026_v5  ;;  %v16560_v51 = vsub.f32 %v380_v47, %v16543_v25  ;;  %v16563_v30 = vsub.f32 %v383_v57, %v16545_v60 }
  0xaa   : > { %18187 = vst [vmem:[#allocation32_spill] sm:$0xff] %v16548_v1  ;;  %18188 = vst [vmem:[#allocation33_spill] sm:$0xff] %v16550_v36  ;;  %v18029_v59 = vand.u32 4294901760, %v16548_v1  ;;  %v16567_v35 = vsub.f32 %v386_v52, %v16550_v36  ;;  %v389_v26 = vsel %vm327_vm0, %v307_v58, 0  ;;  %v392_v42 = vsel %vm327_vm0, %v308_v27, 0 }
  0xab   : > { %18189 = vst [vmem:[#allocation34_spill] sm:$0xff] %v16560_v51  ;;  %18190 = vst [vmem:[#allocation35_spill] sm:$0xff] %v16563_v30  ;;  %v659_v48 = vand.u32 4294901760, %v658_v32  ;;  %v18192_v41 = vand.u32 4294901760, %v16534_v3  ;;  %v18038_v47 = vand.u32 4294901760, %v16560_v51  ;;  %v18041_v57 = vand.u32 4294901760, %v16563_v30 }
  0xac   : > { %18191 = vst [vmem:[#allocation36_spill] sm:$0xff] %v16567_v35  ;;  %13686 = vmatmul.mubr.f32.gmra.mrb[10].mxu0 %v629_v4  ;;  %v678_v52 = vsub.f32 %v16548_v1, %v18029_v59  ;;  %v16580_v58 = vand.u32 4294901760, %v389_v26  ;;  %v16582_v27 = vand.u32 4294901760, %v392_v42  ;;  %v309_v4 = vmul.f32 %v16386_v43, %v16386_v43 }
  0xad   : > { %v668_v5 = vsub.f32 %v16534_v3, %v18192_v41  ;;  %13688 = vmatprep.mubr.f32.mxu0 %v639_v53  ;;  %v310_v41 = vmul.f32 %v16389_v44, %v16389_v44  ;;  %v688_v53 = vsub.f32 %v16560_v51, %v18038_v47  ;;  %v698_v1 = vsub.f32 %v16563_v30, %v18041_v57 }
  0xae   : > { %18193 = vst [vmem:[#allocation37_spill] sm:$0xff] %v16580_v58  ;;  %18194 = vst [vmem:[#allocation38_spill] sm:$0xff] %v16582_v27  ;;  %v16592_v32 = vsub.f32 %v389_v26, %v16580_v58  ;;  %v16595_v59 = vsub.f32 %v392_v42, %v16582_v27  ;;  %v395_v3 = vsel %vm327_vm0, %v309_v4, 0  ;;  %v679_v24 = vand.u32 4294901760, %v678_v52 }
  0xaf   : > { %v669_v49 = vand.u32 4294901760, %v668_v5  ;;  %v398_v28 = vsel %vm327_vm0, %v310_v41, 0  ;;  %v18197_v47 = vand.u32 4294901760, %v16567_v35  ;;  %v16606_v42 = vand.u32 4294901760, %v395_v3 }
  0xb0   : > { %18195 = vst [vmem:[#allocation39_spill] sm:$0xff] %v16592_v32  ;;  %18196 = vst [vmem:[#allocation40_spill] sm:$0xff] %v16595_v59  ;;  %13689 = vmatmul.mubr.f32.gmra.mrb[12].mxu0 %v649_v31  ;;  %v16608_v31 = vand.u32 4294901760, %v398_v28  ;;  %v311_v5 = vmul.f32 %v16392_v45, %v16392_v45  ;;  %v312_v4 = vmul.f32 %v16398_v50, %v16398_v50  ;;  %v689_v52 = vand.u32 4294901760, %v688_v53 }
  0xb1   : > { %13691 = vmatprep.mubr.f32.mxu0 %v659_v48  ;;  %v708_v26 = vsub.f32 %v16567_v35, %v18197_v47  ;;  %18198 = vst [vmem:[#allocation41_spill] sm:$0xff] %v16606_v42  ;;  %v313_v48 = vmul.f32 %v16403_v55, %v16403_v55  ;;  %v16618_v47 = vsub.f32 %v395_v3, %v16606_v42  ;;  %v699_v53 = vand.u32 4294901760, %v698_v1 }
  0xb2   : > { %18199 = vst [vmem:[#allocation42_spill] sm:$0xff] %v16608_v31  ;;  %v314_v57 = vmul.f32 %v16406_v56, %v16406_v56  ;;  %v16623_v51 = vsub.f32 %v398_v28, %v16608_v31  ;;  %v401_v35 = vsel %vm327_vm0, %v311_v5, 0  ;;  %v404_v30 = vsel %vm327_vm0, %v312_v4, 0 }
  0xb3   : > { %18200 = vst [vmem:[#allocation43_spill] sm:$0xff] %v16618_v47  ;;  %v407_v23 = vsel %vm327_vm0, %v313_v48, 0  ;;  %v18202_v41 = vand.u32 4294901760, %v16592_v32  ;;  %v16632_v42 = vand.u32 4294901760, %v401_v35  ;;  %v16635_v28 = vand.u32 4294901760, %v404_v30 }
  0xb4   : > { %13692 = vmatmul.mubr.f32.gmra.mrb[14].mxu0 %v669_v49  ;;  %18201 = vst [vmem:[#allocation44_spill] sm:$0xff] %v16623_v51  ;;  %v16637_v31 = vand.u32 4294901760, %v407_v23  ;;  %v410_v5 = vsel %vm327_vm0, %v314_v57, 0  ;;  %v709_v4 = vand.u32 4294901760, %v708_v26  ;;  %v315_v48 = vmul.f32 %v16431_v10, %v16431_v10 }
  0xb5   : > { %13694 = vmatprep.mubr.f32.mxu0 %v679_v24  ;;  %v718_v3 = vsub.f32 %v16592_v32, %v18202_v41  ;;  %18203 = vst [vmem:[#allocation45_spill] sm:$0xff] %v16632_v42  ;;  %18204 = vst [vmem:[#allocation46_spill] sm:$0xff] %v16635_v28  ;;  %v16641_v24 = vsub.f32 %v401_v35, %v16632_v42  ;;  %v16643_v1 = vand.u32 4294901760, %v410_v5  ;;  %v18208_v41 = vand.u32 4294901760, %v16595_v59 }
  0xb6   : > { %18205 = vst [vmem:[#allocation47_spill] sm:$0xff] %v16637_v31  ;;  %v16651_v19 = vsub.f32 %v404_v30, %v16635_v28  ;;  %v16654_v32 = vsub.f32 %v407_v23, %v16637_v31  ;;  %v316_v35 = vmul.f32 %v16434_v11, %v16434_v11  ;;  %v18209_v26 = vand.u32 4294901760, %v16618_v47 }
  0xb7   : > { %18206 = vst [vmem:[#allocation48_spill] sm:$0xff] %v16641_v24  ;;  %18207 = vst [vmem:[#allocation49_spill] sm:$0xff] %v16643_v1  ;;  %v728_v49 = vsub.f32 %v16595_v59, %v18208_v41  ;;  %v719_v57 = vand.u32 4294901760, %v718_v3  ;;  %v413_v27 = vsel %vm327_vm0, %v315_v48, 0  ;;  %v18210_v41 = vand.u32 4294901760, %v16623_v51 }
  0xb8   : > { %13695 = vmatmul.mubr.f32.gmra.mrb[16].mxu0 %v689_v52  ;;  %v738_v42 = vsub.f32 %v16618_v47, %v18209_v26  ;;  %v16668_v59 = vsub.f32 %v410_v5, %v16643_v1  ;;  %v16670_v31 = vand.u32 4294901760, %v413_v27  ;;  %v416_v26 = vsel %vm327_vm0, %v316_v35, 0 }
  0xb9   : > { %13697 = vmatprep.mubr.f32.mxu0 %v699_v53  ;;  %v748_v30 = vsub.f32 %v16623_v51, %v18210_v41  ;;  %v319_v53 = vmul.f32 %v16392_v45, %v16293_v2  ;;  %v317_v48 = vmul.f32 %v16483_v18, %v16483_v18  ;;  %v729_v52 = vand.u32 4294901760, %v728_v49 }
  0xba   : > { %18211 = vst [vmem:[#allocation50_spill] sm:$0xff] %v16670_v31  ;;  %v18212_v41 = vand.u32 4294901760, %v16641_v24  ;;  %v16682_v5 = vsub.f32 %v413_v27, %v16670_v31  ;;  %v16684_v51 = vand.u32 4294901760, %v416_v26  ;;  %v739_v2 = vand.u32 4294901760, %v738_v42 }
  0xbb   : > { %v419_v45 = vsel %vm327_vm0, %v317_v48, 0  ;;  %v318_v35 = vmul.f32 %v16486_v54, %v16486_v54  ;;  %v749_v3 = vand.u32 4294901760, %v748_v30  ;;  %v18216_v27 = vand.u32 4294901760, %v16654_v32 }
  0xbc   : > { %13698 = vmatmul.mubr.f32.gmra.mrb[18].mxu0 %v709_v4  ;;  %v758_v23 = vsub.f32 %v16641_v24, %v18212_v41  ;;  %18213 = vst [vmem:[#allocation51_spill] sm:$0xff] %v16682_v5  ;;  %18214 = vst [vmem:[#allocation52_spill] sm:$0xff] %v16684_v51  ;;  %v18215_v4 = vand.u32 4294901760, %v16651_v19  ;;  %v16694_v41 = vsub.f32 %v416_v26, %v16684_v51  ;;  %v16699_v42 = vand.u32 4294901760, %v419_v45 }
  0xbd   : > { %13700 = vmatprep.mubr.f32.mxu0 %v719_v57  ;;  %v778_v57 = vsub.f32 %v16654_v32, %v18216_v27  ;;  %v422_v48 = vsel %vm327_vm0, %v318_v35, 0  ;;  %v425_v24 = vsel %vm327_vm0, %v319_v53, 0  ;;  %v320_v27 = vmul.f32 %v16398_v50, %v16298_v6 }
  0xbe   : > { %v768_v49 = vsub.f32 %v16651_v19, %v18215_v4  ;;  %18217 = vst [vmem:[#allocation53_spill] sm:$0xff] %v16699_v42  ;;  %v759_v30 = vand.u32 4294901760, %v758_v23  ;;  %v16704_v4 = vand.u32 4294901760, %v422_v48  ;;  %v16706_v47 = vand.u32 4294901760, %v425_v24 }
  0xbf   : > { %v16709_v26 = vsub.f32 %v419_v45, %v16699_v42  ;;  %v321_v35 = vmul.f32 %v16403_v55, %v16301_v7  ;;  %v18220_v23 = vand.u32 4294901760, %v16668_v59  ;;  %v428_v6 = vsel %vm327_vm0, %v320_v27, 0 }
  0xc0   : > { %13701 = vmatmul.mubr.f32.gmra.mrb[20].mxu0 %v729_v52  ;;  %18218 = vst [vmem:[#allocation54_spill] sm:$0xff] %v16704_v4  ;;  %18219 = vst [vmem:[#allocation55_spill] sm:$0xff] %v16706_v47  ;;  %v322_v52 = vmul.f32 %v16406_v56, %v16314_v12  ;;  %v16725_v45 = vsub.f32 %v425_v24, %v16706_v47  ;;  %v769_v7 = vand.u32 4294901760, %v768_v49  ;;  %v18221_v12 = vand.u32 4294901760, %v16682_v5 }
  0xc1   : > { %13703 = vmatprep.mubr.f32.mxu0 %v739_v2  ;;  %v788_v53 = vsub.f32 %v16668_v59, %v18220_v23  ;;  %v16722_v2 = vsub.f32 %v422_v48, %v16704_v4  ;;  %v431_v50 = vsel %vm327_vm0, %v321_v35, 0  ;;  %v16733_v23 = vand.u32 4294901760, %v428_v6 }
  0xc2   : > { %v798_v55 = vsub.f32 %v16682_v5, %v18221_v12  ;;  %v779_v48 = vand.u32 4294901760, %v778_v57  ;;  %v16735_v31 = vand.u32 4294901760, %v431_v50  ;;  %v434_v24 = vsel %vm327_vm0, %v322_v52, 0 }
  0xc3   : > { %18222 = vst [vmem:[#allocation56_spill] sm:$0xff] %v16733_v23  ;;  %v323_v27 = vmul.f32 %v16431_v10, %v16317_v13  ;;  %v324_v35 = vmul.f32 %v16434_v11, %v16320_v14  ;;  %v789_v12 = vand.u32 4294901760, %v788_v53  ;;  %v18075_v56 = vand.u32 4294901760, %v16722_v2 }
  0xc4   : > { %13704 = vmatmul.mubr.f32.gmra.mrb[22].mxu0 %v749_v3  ;;  %18223 = vst [vmem:[#allocation57_spill] sm:$0xff] %v16735_v31  ;;  %v18224_v3 = vand.u32 4294901760, %v16694_v41  ;;  %v799_v5 = vand.u32 4294901760, %v798_v55  ;;  %v18225_v52 = vand.u32 4294901760, %v16709_v26  ;;  %v16752_v10 = vsub.f32 %v428_v6, %v16733_v23 }
  0xc5   : > { %13706 = vmatprep.mubr.f32.mxu0 %v759_v30  ;;  %v18074_v30 = vand.u32 4294901760, %v16725_v45  ;;  %v437_v57 = vsel %vm327_vm0, %v323_v27, 0  ;;  %v16757_v14 = vsub.f32 %v431_v50, %v16735_v31  ;;  %v440_v53 = vsel %vm327_vm0, %v324_v35, 0 }
  0xc6   : > { %v808_v49 = vsub.f32 %v16694_v41, %v18224_v3  ;;  %v818_v13 = vsub.f32 %v16709_v26, %v18225_v52  ;;  %18226 = vst [vmem:[#allocation58_spill] sm:$0xff] %v16752_v10  ;;  %v16754_v3 = vand.u32 4294901760, %v434_v24  ;;  %v16759_v11 = vand.u32 4294901760, %v437_v57 }
  0xc7   : > { %v326_v27 = vmul.f32 %v16486_v54, %v16389_v44  ;;  %v828_v6 = vsub.f32 %v16722_v2, %v18075_v56  ;;  %v838_v50 = vsub.f32 %v16725_v45, %v18074_v30  ;;  %v14898_v35 = vpack.c.bf16 %v16337_v22, %v16335_v21 }
  0xc8   : > { %13707 = vmatmul.mubr.f32.gmra.mrb[24].mxu0 %v769_v7  ;;  %18227 = vst [vmem:[#allocation59_spill] sm:$0xff] %v16754_v3  ;;  %18228 = vst [vmem:[#allocation60_spill] sm:$0xff] %v16759_v11  ;;  %v325_v7 = vmul.f32 %v16483_v18, %v16386_v43  ;;  %v809_v55 = vand.u32 4294901760, %v808_v49  ;;  %v819_v52 = vand.u32 4294901760, %v818_v13  ;;  %v18076_v43 = vand.u32 4294901760, %v16752_v10 }
  0xc9   : > { %13709 = vmatprep.mubr.f32.mxu0 %v779_v48  ;;  %v16777_v18 = vsub.f32 %v434_v24, %v16754_v3  ;;  %v16779_v44 = vand.u32 4294901760, %v440_v53  ;;  %v18079_v54 = vand.u32 4294901760, %v16757_v14  ;;  %v16783_v49 = vsub.f32 %v437_v57, %v16759_v11  ;;  %14899 = vmatprep.subr.bf16.mxu0 %v14898_v35 }
  0xca   : > { %v443_v48 = vsel %vm327_vm0, %v325_v7, 0  ;;  %v446_v7 = vsel %vm327_vm0, %v326_v27, 0  ;;  %v848_v24 = vsub.f32 %v16752_v10, %v18076_v43  ;;  %v839_v57 = vand.u32 4294901760, %v838_v50 }
  0xcb   : > { %18229 = vst [vmem:[#allocation61_spill] sm:$0xff] %v16777_v18  ;;  %18230 = vst [vmem:[#allocation62_spill] sm:$0xff] %v16779_v44  ;;  %v16785_v30 = vand.u32 4294901760, %v443_v48  ;;  %v18080_v13 = vand.u32 4294901760, %v16777_v18  ;;  %v16795_v56 = vand.u32 4294901760, %v446_v7  ;;  %v858_v27 = vsub.f32 %v16757_v14, %v18079_v54 }
  0xcc   : > { %13710 = vmatmul.mubr.f32.gmra.mrb[26].mxu0 %v789_v12  ;;  %v829_v12 = vand.u32 4294901760, %v828_v6  ;;  %v18086_v6 = vand.u32 4294901760, %v16783_v49  ;;  %v849_v43 = vand.u32 4294901760, %v848_v24 }
  0xcd   : > { %13712 = vmatprep.mubr.f32.mxu0 %v799_v5  ;;  %18231 = vst [vmem:[#allocation63_spill] sm:$0xff] %v16785_v30  ;;  %v16793_v5 = vsub.f32 %v440_v53, %v16779_v44  ;;  %18232 = vst [vmem:[#allocation64_spill] sm:$0xff] %v16795_v56  ;;  %v868_v53 = vsub.f32 %v16777_v18, %v18080_v13  ;;  %v859_v50 = vand.u32 4294901760, %v858_v27 }
  0xce   : > { %v878_v54 = vsub.f32 %v16783_v49, %v18086_v6  ;;  %v18246_v6 = vld [vmem:[#allocation18_spill] sm:$0xff] }
  0xcf   : > { %v18085_v10 = vand.u32 4294901760, %v16793_v5 }
  0xd0   : > { %13713 = vmatmul.mubr.f32.gmra.mrb[28].mxu0 %v809_v55  ;;  %v16802_v55 = vsub.f32 %v443_v48, %v16785_v30  ;;  %v879_v18 = vand.u32 4294901760, %v878_v54  ;;  %v18235_v54 = vld [vmem:[#allocation42_spill] sm:$0xff] }
  0xd1   : > { %13715 = vmatprep.mubr.f32.mxu0 %v819_v52  ;;  %v16809_v52 = vsub.f32 %v446_v7, %v16795_v56  ;;  %v888_v24 = vsub.f32 %v16793_v5, %v18085_v10  ;;  %v18245_v10 = vld [vmem:[#allocation17_spill] sm:$0xff] }
  0xd2   : > { %v18084_v48 = vand.u32 4294901760, %v16802_v55 }
  0xd3   : > { %v18083_v13 = vand.u32 4294901760, %v16809_v52 }
  0xd4   : > { %13716 = vmatmul.mubr.f32.gmra.mrb[30].mxu0 %v829_v12  ;;  %v869_v12 = vand.u32 4294901760, %v868_v53  ;;  %v898_v7 = vsub.f32 %v16802_v55, %v18084_v48  ;;  %v18244_v48 = vld [vmem:[#allocation16_spill] sm:$0xff] }
  0xd5   : > { %13718 = vmatprep.mubr.f32.mxu0 %v839_v57  ;;  %v889_v57 = vand.u32 4294901760, %v888_v24  ;;  %v908_v27 = vsub.f32 %v16809_v52, %v18083_v13  ;;  %v18238_v24 = vld [vmem:[#allocation50_spill] sm:$0xff]  ;;  %v18243_v13 = vld [vmem:[#allocation15_spill] sm:$0xff] }
  0xd7   : > { %v909_v53 = vand.u32 4294901760, %v908_v27  ;;  %v18241_v27 = vand.u32 4294901760, %v16337_v22  ;;  %v18250_v22 = vld [vmem:[#allocation22_spill] sm:$0xff] }
  0xd8   : > { %13719 = vmatmul.mubr.f32.gmra.mrb[32].mxu0 %v849_v43  ;;  %v899_v43 = vand.u32 4294901760, %v898_v7  ;;  %v18239_v7 = vld [vmem:[#allocation13_spill] sm:$0xff] }
  0xd9   : > { %13721 = vmatprep.mubr.f32.mxu0 %v859_v50  ;;  %v18236_v50 = vld [vmem:[#allocation45_spill] sm:$0xff] }
  0xdc   : > { %13722 = vmatmul.mubr.f32.gmra.mrb[34].mxu0 %v869_v12  ;;  %v18237_v12 = vld [vmem:[#allocation47_spill] sm:$0xff] }
  0xdd   : > { %13724 = vmatprep.mubr.f32.mxu0 %v879_v18  ;;  %v18234_v18 = vld [vmem:[#allocation41_spill] sm:$0xff] }
  0xe0   : > { %13725 = vmatmul.mubr.f32.gmra.mrb[36].mxu0 %v889_v57  ;;  %v18240_v57 = vand.u32 4294901760, %v16335_v21  ;;  %v18249_v21 = vld [vmem:[#allocation21_spill] sm:$0xff] }
  0xe1   : > { %13727 = vmatprep.mubr.f32.mxu0 %v899_v43 }
  0xe2   : > { %v14906_v43 = vpack.c.bf16 %v18241_v27, %v18240_v57  ;;  %v18251_v57 = vld [vmem:[#allocation23_spill] sm:$0xff]  ;;  %v18252_v27 = vld [vmem:[#allocation24_spill] sm:$0xff] }
  0xe4   : > { %13728 = vmatmul.mubr.f32.gmra.mrb[38].mxu0 %v909_v53  ;;  %v18242_v53 = vld [vmem:[#allocation14_spill] sm:$0xff] }
  0xe5   : > { %13734 = vmatprep.mubr.f32.mxu0 %v16307_v9 }
  0xe8   : > { %13735 = vmatmul.mubr.f32.vlgmr.msra.gmra.mrb[0].mxu0 %v16324_v16 }
  0xe9   : > { %13737 = vmatprep.mubr.f32.mxu0 %v16326_v17  ;;  %14901 = vmatpush3.bf16.msra.mxu0 %v14898_v35  ;;  %v18233_v35 = vld [vmem:[#allocation38_spill] sm:$0xff] }
  0xea   : > { %14903 = vmatprep.subr.bf16.mxu0 %v16322_v15 }
  0xec   : > { %13738 = vmatmul.mubr.f32.gmra.mrb[2].mxu0 %v16333_v20 }
  0xed   : > { %13740 = vmatprep.mubr.f32.mxu0 %v16359_v33 }
  0xf0   : > { %13741 = vmatmul.mubr.f32.gmra.mrb[4].mxu0 %v16361_v34 }
  0xf1   : > { %13743 = vmatprep.mubr.f32.mxu0 %v16418_v63 }
  0xf4   : > { %13744 = vmatmul.mubr.f32.gmra.mrb[6].mxu0 %v16420_v0 }
  0xf5   : > { %13746 = vmatprep.mubr.f32.mxu0 %v16442_v37 }
  0xf8   : > { %13747 = vmatmul.mubr.f32.gmra.mrb[8].mxu0 %v16444_v38 }
  0xf9   : > { %13749 = vmatprep.mubr.f32.mxu0 %v16446_v39 }
  0xfc   : > { %13750 = vmatmul.mubr.f32.gmra.mrb[10].mxu0 %v16448_v40 }
  0xfd   : > { %13752 = vmatprep.mubr.f32.mxu0 %v16474_v61 }
 0x100   : > { %13753 = vmatmul.mubr.f32.gmra.mrb[12].mxu0 %v16476_v62 }
 0x101   : > { %13755 = vmatprep.mubr.f32.mxu0 %v16515_v46 }
 0x104   : > { %13756 = vmatmul.mubr.f32.gmra.mrb[14].mxu0 %v16517_v29 }
 0x105   : > { %13758 = vmatprep.mubr.f32.mxu0 %v16536_v8  ;;  %v18274_v8 = vand.u32 4294901760, %v18246_v6 }
 0x108   : > { %13759 = vmatmul.mubr.f32.gmra.mrb[16].mxu0 %v16543_v25  ;;  %v18273_v25 = vand.u32 4294901760, %v18245_v10 }
 0x109   : > { %13761 = vmatprep.mubr.f32.mxu0 %v16545_v60  ;;  %v18272_v60 = vand.u32 4294901760, %v18244_v48 }
 0x10c   : > { %13762 = vmatmul.mubr.f32.gmra.mrb[18].mxu0 %v16550_v36  ;;  %v18271_v36 = vand.u32 4294901760, %v18243_v13 }
 0x10d   : > { %13764 = vmatprep.mubr.f32.mxu0 %v16580_v58  ;;  %v18270_v58 = vand.u32 4294901760, %v18242_v53 }
 0x110   : > { %13765 = vmatmul.mubr.f32.gmra.mrb[20].mxu0 %v18233_v35  ;;  %v18269_v35 = vand.u32 4294901760, %v18239_v7 }
 0x111   : > { %13767 = vmatprep.mubr.f32.mxu0 %v18234_v18  ;;  %v18268_v18 = vld [vmem:[#allocation61_spill] sm:$0xff] }
 0x114   : > { %13768 = vmatmul.mubr.f32.gmra.mrb[22].mxu0 %v18235_v54  ;;  %v18267_v54 = vld [vmem:[#allocation58_spill] sm:$0xff] }
 0x115   : > { %13770 = vmatprep.mubr.f32.mxu0 %v18236_v50  ;;  %v18266_v50 = vld [vmem:[#allocation51_spill] sm:$0xff] }
 0x118   : > { %13771 = vmatmul.mubr.f32.gmra.mrb[24].mxu0 %v16635_v28  ;;  %v18265_v28 = vld [vmem:[#allocation48_spill] sm:$0xff] }
 0x119   : > { %13773 = vmatprep.mubr.f32.mxu0 %v18237_v12  ;;  %v18264_v12 = vld [vmem:[#allocation44_spill] sm:$0xff] }
 0x11c   : > { %13774 = vmatmul.mubr.f32.gmra.mrb[26].mxu0 %v16643_v1  ;;  %v18263_v1 = vld [vmem:[#allocation43_spill] sm:$0xff] }
 0x11d   : > { %13776 = vmatprep.mubr.f32.mxu0 %v18238_v24  ;;  %v18262_v24 = vld [vmem:[#allocation40_spill] sm:$0xff] }
 0x120   : > { %13777 = vmatmul.mubr.f32.gmra.mrb[28].mxu0 %v16684_v51  ;;  %v18261_v51 = vld [vmem:[#allocation39_spill] sm:$0xff] }
 0x121   : > { %13779 = vmatprep.mubr.f32.mxu0 %v16699_v42  ;;  %v18260_v42 = vld [vmem:[#allocation36_spill] sm:$0xff] }
 0x124   : > { %13780 = vmatmul.mubr.f32.gmra.mrb[30].mxu0 %v16704_v4  ;;  %v18259_v4 = vld [vmem:[#allocation35_spill] sm:$0xff] }
 0x125   : > { %13782 = vmatprep.mubr.f32.mxu0 %v16706_v47  ;;  %v18258_v47 = vld [vmem:[#allocation34_spill] sm:$0xff] }
 0x128   : > { %13783 = vmatmul.mubr.f32.gmra.mrb[32].mxu0 %v16733_v23  ;;  %v18257_v23 = vld [vmem:[#allocation32_spill] sm:$0xff] }
 0x129   : > { %13785 = vmatprep.mubr.f32.mxu0 %v16735_v31  ;;  %v18256_v31 = vld [vmem:[#allocation28_spill] sm:$0xff] }
 0x12c   : > { %13786 = vmatmul.mubr.f32.gmra.mrb[34].mxu0 %v16754_v3  ;;  %v18255_v3 = vld [vmem:[#allocation27_spill] sm:$0xff] }
 0x12d   : > { %13788 = vmatprep.mubr.f32.mxu0 %v16759_v11  ;;  %v18254_v11 = vld [vmem:[#allocation26_spill] sm:$0xff] }
 0x130   : > { %13789 = vmatmul.mubr.f32.gmra.mrb[36].mxu0 %v16779_v44  ;;  %v18253_v44 = vld [vmem:[#allocation25_spill] sm:$0xff] }
 0x131   : > { %13791 = vmatprep.mubr.f32.mxu0 %v16785_v30  ;;  %v18248_v30 = vld [vmem:[#allocation20_spill] sm:$0xff] }
 0x134   : > { %13792 = vmatmul.mubr.f32.gmra.mrb[38].mxu0 %v16795_v56  ;;  %v18247_v56 = vld [vmem:[#allocation19_spill] sm:$0xff] }
 0x135   : > { %13798 = vmatprep.mubr.f32.mxu0 %v18239_v7  ;;  %v18287_v7 = vand.u32 4294901760, %v18259_v4 }
 0x138   : > { %13799 = vmatmul.mubr.f32.vlgmr.msra.gmra.mrb[0].mxu0 %v18242_v53  ;;  %v18318_v53 = vld [vmem:[#allocation46_spill] sm:$0xff] }
 0x139   : > { %13801 = vmatprep.mubr.f32.mxu0 %v18243_v13  ;;  %14905 = vmatpush3.bf16.msra.mxu0 %v16322_v15  ;;  %v18278_v13 = vand.u32 4294901760, %v18250_v22 }
 0x13a   : > { %14907 = vmatprep.subr.bf16.mxu0 %v14906_v43 }
 0x13c   : > { %13802 = vmatmul.mubr.f32.gmra.mrb[2].mxu0 %v18244_v48  ;;  %v18286_v48 = vand.u32 4294901760, %v18258_v47 }
 0x13d   : > { %13804 = vmatprep.mubr.f32.mxu0 %v18245_v10  ;;  %v18284_v10 = vand.u32 4294901760, %v18256_v31 }
 0x140   : > { %13805 = vmatmul.mubr.f32.gmra.mrb[4].mxu0 %v18246_v6  ;;  %v18285_v6 = vand.u32 4294901760, %v18257_v23 }
 0x141   : > { %13807 = vmatprep.mubr.f32.mxu0 %v18247_v56 }
 0x144   : > { %13808 = vmatmul.mubr.f32.gmra.mrb[6].mxu0 %v18248_v30 }
 0x145   : > { %13810 = vmatprep.mubr.f32.mxu0 %v18249_v21 }
 0x148   : > { %13811 = vmatmul.mubr.f32.gmra.mrb[8].mxu0 %v18250_v22  ;;  %v18320_v22 = vld [vmem:[#allocation49_spill] sm:$0xff] }
 0x149   : > { %13813 = vmatprep.mubr.f32.mxu0 %v18251_v57 }
 0x14c   : > { %13814 = vmatmul.mubr.f32.gmra.mrb[10].mxu0 %v18252_v27 }
 0x14d   : > { %13816 = vmatprep.mubr.f32.mxu0 %v18253_v44 }
 0x150   : > { %13817 = vmatmul.mubr.f32.gmra.mrb[12].mxu0 %v18254_v11 }
 0x151   : > { %13819 = vmatprep.mubr.f32.mxu0 %v18255_v3 }
 0x154   : > { %13820 = vmatmul.mubr.f32.gmra.mrb[14].mxu0 %v18256_v31  ;;  %v18291_v31 = vand.u32 4294901760, %v18263_v1 }
 0x155   : > { %13822 = vmatprep.mubr.f32.mxu0 %v18257_v23  ;;  %v18292_v23 = vand.u32 4294901760, %v18264_v12 }
 0x158   : > { %13823 = vmatmul.mubr.f32.gmra.mrb[16].mxu0 %v18258_v47  ;;  %v18293_v47 = vand.u32 4294901760, %v18265_v28 }
 0x159   : > { %13825 = vmatprep.mubr.f32.mxu0 %v18259_v4  ;;  %v18294_v4 = vand.u32 4294901760, %v16651_v19 }
 0x15c   : > { %13826 = vmatmul.mubr.f32.gmra.mrb[18].mxu0 %v18260_v42 }
 0x15d   : > { %13828 = vmatprep.mubr.f32.mxu0 %v18261_v51 }
 0x160   : > { %13829 = vmatmul.mubr.f32.gmra.mrb[20].mxu0 %v18262_v24 }
 0x161   : > { %13831 = vmatprep.mubr.f32.mxu0 %v18263_v1  ;;  %v18298_v1 = vand.u32 4294901760, %v16694_v41 }
 0x164   : > { %13832 = vmatmul.mubr.f32.gmra.mrb[22].mxu0 %v18264_v12  ;;  %v18299_v12 = vand.u32 4294901760, %v16709_v26 }
 0x165   : > { %13834 = vmatprep.mubr.f32.mxu0 %v18265_v28  ;;  %v18300_v28 = vand.u32 4294901760, %v16722_v2 }
 0x168   : > { %13835 = vmatmul.mubr.f32.gmra.mrb[24].mxu0 %v16651_v19  ;;  %v18301_v19 = vand.u32 4294901760, %v16725_v45 }
 0x169   : > { %13837 = vmatprep.mubr.f32.mxu0 %v16654_v32 }
 0x16c   : > { %13838 = vmatmul.mubr.f32.gmra.mrb[26].mxu0 %v16668_v59 }
 0x16d   : > { %13840 = vmatprep.mubr.f32.mxu0 %v18266_v50 }
 0x170   : > { %13841 = vmatmul.mubr.f32.gmra.mrb[28].mxu0 %v16694_v41  ;;  %v18305_v41 = vand.u32 4294901760, %v16783_v49 }
 0x171   : > { %13843 = vmatprep.mubr.f32.mxu0 %v16709_v26  ;;  %v18306_v26 = vand.u32 4294901760, %v16793_v5 }
 0x174   : > { %13844 = vmatmul.mubr.f32.gmra.mrb[30].mxu0 %v16722_v2  ;;  %v18307_v2 = vand.u32 4294901760, %v16802_v55 }
 0x175   : > { %13846 = vmatprep.mubr.f32.mxu0 %v16725_v45  ;;  %v18308_v45 = vand.u32 4294901760, %v16809_v52 }
 0x178   : > { %13847 = vmatmul.mubr.f32.gmra.mrb[32].mxu0 %v18267_v54 }
 0x179   : > { %13849 = vmatprep.mubr.f32.mxu0 %v16757_v14 }
 0x17c   : > { %13850 = vmatmul.mubr.f32.gmra.mrb[34].mxu0 %v18268_v18 }
 0x17d   : > { %13852 = vmatprep.mubr.f32.mxu0 %v16783_v49  ;;  %v18311_v49 = vld [vmem:[#allocation31_spill] sm:$0xff] }
 0x180   : > { %13853 = vmatmul.mubr.f32.gmra.mrb[36].mxu0 %v16793_v5  ;;  %v18312_v5 = vld [vmem:[#allocation33_spill] sm:$0xff] }
 0x181   : > { %13855 = vmatprep.mubr.f32.mxu0 %v16802_v55  ;;  %v18313_v55 = vld [vmem:[#allocation37_spill] sm:$0xff] }
 0x184   : > { %13856 = vmatmul.mubr.f32.gmra.mrb[38].mxu0 %v16809_v52  ;;  %v18314_v52 = vld [vmem:[#allocation38_spill] sm:$0xff] }
 0x185   : > { %13862 = vmatprep.mubr.f32.mxu0 %v18269_v35  ;;  %v18275_v35 = vand.u32 4294901760, %v18247_v56  ;;  %v18282_v56 = vand.u32 4294901760, %v18254_v11  ;;  %v18289_v11 = vand.u32 4294901760, %v18261_v51  ;;  %v18296_v51 = vand.u32 4294901760, %v16668_v59 }
 0x186   : > { %v18303_v59 = vand.u32 4294901760, %v16757_v14  ;;  %v18310_v14 = vld [vmem:[#allocation30_spill] sm:$0xff] }
 0x188   : > { %13863 = vmatmul.mubr.f32.vlgmr.msra.gmra.mrb[0].mxu0 %v18270_v58  ;;  %v18276_v58 = vand.u32 4294901760, %v18248_v30  ;;  %v18283_v30 = vand.u32 4294901760, %v18255_v3  ;;  %v18290_v3 = vand.u32 4294901760, %v18262_v24  ;;  %v18297_v24 = vand.u32 4294901760, %v18266_v50 }
 0x189   : > { %13865 = vmatprep.mubr.f32.mxu0 %v18271_v36  ;;  %14909 = vmatpush3.bf16.msra.mxu0 %v14906_v43  ;;  %v18277_v36 = vand.u32 4294901760, %v18249_v21  ;;  %v18304_v50 = vand.u32 4294901760, %v18268_v18  ;;  %v18315_v18 = vld [vmem:[#allocation41_spill] sm:$0xff]  ;;  %v18319_v21 = vld [vmem:[#allocation47_spill] sm:$0xff] }
 0x18a   : > { %14911 = vmatprep.subr.bf16.mxu0 %v16322_v15  ;;  %v18317_v43 = vld [vmem:[#allocation45_spill] sm:$0xff] }
 0x18c   : > { %13866 = vmatmul.mubr.f32.gmra.mrb[2].mxu0 %v18272_v60  ;;  %v18279_v60 = vand.u32 4294901760, %v18251_v57  ;;  %v18321_v57 = vld [vmem:[#allocation50_spill] sm:$0xff] }
 0x18d   : > { %13868 = vmatprep.mubr.f32.mxu0 %v18273_v25  ;;  %v18280_v25 = vand.u32 4294901760, %v18252_v27  ;;  %v18322_v27 = vld [vmem:[#allocation52_spill] sm:$0xff] }
 0x190   : > { %13869 = vmatmul.mubr.f32.gmra.mrb[4].mxu0 %v18274_v8  ;;  %v18281_v8 = vand.u32 4294901760, %v18253_v44  ;;  %v18288_v44 = vand.u32 4294901760, %v18260_v42  ;;  %v18295_v42 = vand.u32 4294901760, %v16654_v32  ;;  %v18302_v32 = vand.u32 4294901760, %v18267_v54  ;;  %v18316_v54 = vld [vmem:[#allocation42_spill] sm:$0xff] }
 0x191   : > { %13871 = vmatprep.mubr.f32.mxu0 %v18275_v35  ;;  %v18323_v35 = vld [vmem:[#allocation53_spill] sm:$0xff] }
 0x194   : > { %13872 = vmatmul.mubr.f32.gmra.mrb[6].mxu0 %v18276_v58  ;;  %v18324_v58 = vld [vmem:[#allocation54_spill] sm:$0xff] }
 0x195   : > { %13874 = vmatprep.mubr.f32.mxu0 %v18277_v36  ;;  %v18325_v36 = vld [vmem:[#allocation55_spill] sm:$0xff] }
 0x198   : > { %13875 = vmatmul.mubr.f32.gmra.mrb[8].mxu0 %v18278_v13  ;;  %v18326_v13 = vld [vmem:[#allocation56_spill] sm:$0xff] }
 0x199   : > { %13877 = vmatprep.mubr.f32.mxu0 %v18279_v60  ;;  %v18327_v60 = vld [vmem:[#allocation57_spill] sm:$0xff] }
 0x19c   : > { %13878 = vmatmul.mubr.f32.gmra.mrb[10].mxu0 %v18280_v25  ;;  %v18328_v25 = vld [vmem:[#allocation59_spill] sm:$0xff] }
 0x19d   : > { %13880 = vmatprep.mubr.f32.mxu0 %v18281_v8  ;;  %v18329_v8 = vld [vmem:[#allocation60_spill] sm:$0xff] }
 0x1a0   : > { %13881 = vmatmul.mubr.f32.gmra.mrb[12].mxu0 %v18282_v56  ;;  %v18330_v56 = vld [vmem:[#allocation62_spill] sm:$0xff] }
 0x1a1   : > { %13883 = vmatprep.mubr.f32.mxu0 %v18283_v30  ;;  %v18331_v30 = vld [vmem:[#allocation63_spill] sm:$0xff] }
 0x1a4   : > { %13884 = vmatmul.mubr.f32.gmra.mrb[14].mxu0 %v18284_v10  ;;  %v18332_v10 = vld [vmem:[#allocation64_spill] sm:$0xff] }
 0x1a5   : > { %13886 = vmatprep.mubr.f32.mxu0 %v18285_v6 }
 0x1a8   : > { %13887 = vmatmul.mubr.f32.gmra.mrb[16].mxu0 %v18286_v48 }
 0x1a9   : > { %13889 = vmatprep.mubr.f32.mxu0 %v18287_v7 }
 0x1ac   : > { %13890 = vmatmul.mubr.f32.gmra.mrb[18].mxu0 %v18288_v44 }
 0x1ad   : > { %13892 = vmatprep.mubr.f32.mxu0 %v18289_v11 }
 0x1b0   : > { %13893 = vmatmul.mubr.f32.gmra.mrb[20].mxu0 %v18290_v3 }
 0x1b1   : > { %13895 = vmatprep.mubr.f32.mxu0 %v18291_v31 }
 0x1b4   : > { %13896 = vmatmul.mubr.f32.gmra.mrb[22].mxu0 %v18292_v23 }
 0x1b5   : > { %13898 = vmatprep.mubr.f32.mxu0 %v18293_v47 }
 0x1b8   : > { %13899 = vmatmul.mubr.f32.gmra.mrb[24].mxu0 %v18294_v4 }
 0x1b9   : > { %13901 = vmatprep.mubr.f32.mxu0 %v18295_v42 }
 0x1bc   : > { %13902 = vmatmul.mubr.f32.gmra.mrb[26].mxu0 %v18296_v51 }
 0x1bd   : > { %13904 = vmatprep.mubr.f32.mxu0 %v18297_v24 }
 0x1c0   : > { %13905 = vmatmul.mubr.f32.gmra.mrb[28].mxu0 %v18298_v1 }
 0x1c1   : > { %13907 = vmatprep.mubr.f32.mxu0 %v18299_v12 }
 0x1c4   : > { %13908 = vmatmul.mubr.f32.gmra.mrb[30].mxu0 %v18300_v28 }
 0x1c5   : > { %13910 = vmatprep.mubr.f32.mxu0 %v18301_v19 }
 0x1c8   : > { %13911 = vmatmul.mubr.f32.gmra.mrb[32].mxu0 %v18302_v32 }
 0x1c9   : > { %13913 = vmatprep.mubr.f32.mxu0 %v18303_v59 }
 0x1cc   : > { %13914 = vmatmul.mubr.f32.gmra.mrb[34].mxu0 %v18304_v50 }
 0x1cd   : > { %13916 = vmatprep.mubr.f32.mxu0 %v18305_v41 }
 0x1d0   : > { %13917 = vmatmul.mubr.f32.gmra.mrb[36].mxu0 %v18306_v26 }
 0x1d1   : > { %13919 = vmatprep.mubr.f32.mxu0 %v18307_v2 }
 0x1d4   : > { %13920 = vmatmul.mubr.f32.gmra.mrb[38].mxu0 %v18308_v45 }
 0x1d5   : > { %13926 = vmatprep.mubr.f32.mxu0 %v16307_v9 }
 0x1d8   : > { %13927 = vmatmul.mubr.f32.vlgmr.msra.gmra.mrb[0].mxu0 %v16324_v16 }
 0x1d9   : > { %13929 = vmatprep.mubr.f32.mxu0 %v16326_v17  ;;  %14913 = vmatpush3.bf16.msra.mxu0 %v16322_v15  ;;  %v18309_v15 = vld [vmem:[#allocation29_spill] sm:$0xff] }
 0x1dc   : > { %13930 = vmatmul.mubr.f32.gmra.mrb[2].mxu0 %v16333_v20 }
 0x1dd   : > { %13932 = vmatprep.mubr.f32.mxu0 %v16359_v33 }
 0x1e0   : > { %13933 = vmatmul.mubr.f32.gmra.mrb[4].mxu0 %v16361_v34 }
 0x1e1   : > { %13935 = vmatprep.mubr.f32.mxu0 %v16418_v63 }
 0x1e4   : > { %13936 = vmatmul.mubr.f32.gmra.mrb[6].mxu0 %v16420_v0 }
 0x1e5   : > { %13938 = vmatprep.mubr.f32.mxu0 %v16442_v37 }
 0x1e8   : > { %13939 = vmatmul.mubr.f32.gmra.mrb[8].mxu0 %v16444_v38 }
 0x1e9   : > { %13941 = vmatprep.mubr.f32.mxu0 %v16446_v39 }
 0x1ec   : > { %13942 = vmatmul.mubr.f32.gmra.mrb[10].mxu0 %v16448_v40 }
 0x1ed   : > { %13944 = vmatprep.mubr.f32.mxu0 %v16474_v61 }
 0x1f0   : > { %13945 = vmatmul.mubr.f32.gmra.mrb[12].mxu0 %v16476_v62 }
 0x1f1   : > { %13947 = vmatprep.mubr.f32.mxu0 %v16515_v46 }
 0x1f4   : > { %13948 = vmatmul.mubr.f32.gmra.mrb[14].mxu0 %v16517_v29 }
 0x1f5   : > { %13950 = vmatprep.mubr.f32.mxu0 %v18309_v15 }
 0x1f8   : > { %13951 = vmatmul.mubr.f32.gmra.mrb[16].mxu0 %v18310_v14 }
 0x1f9   : > { %13953 = vmatprep.mubr.f32.mxu0 %v18311_v49 }
 0x1fc   : > { %13954 = vmatmul.mubr.f32.gmra.mrb[18].mxu0 %v18312_v5 }
 0x1fd   : > { %13956 = vmatprep.mubr.f32.mxu0 %v18313_v55 }
 0x200   : > { %13957 = vmatmul.mubr.f32.gmra.mrb[20].mxu0 %v18314_v52 }
 0x201   : > { %13959 = vmatprep.mubr.f32.mxu0 %v18315_v18 }
 0x204   : > { %13960 = vmatmul.mubr.f32.gmra.mrb[22].mxu0 %v18316_v54 }
 0x205   : > { %13962 = vmatprep.mubr.f32.mxu0 %v18317_v43 }
 0x208   : > { %13963 = vmatmul.mubr.f32.gmra.mrb[24].mxu0 %v18318_v53 }
 0x209   : > { %13965 = vmatprep.mubr.f32.mxu0 %v18319_v21 }
 0x20c   : > { %13966 = vmatmul.mubr.f32.gmra.mrb[26].mxu0 %v18320_v22 }
 0x20d   : > { %13968 = vmatprep.mubr.f32.mxu0 %v18321_v57 }
 0x210   : > { %13969 = vmatmul.mubr.f32.gmra.mrb[28].mxu0 %v18322_v27 }
 0x211   : > { %13971 = vmatprep.mubr.f32.mxu0 %v18323_v35 }
 0x214   : > { %13972 = vmatmul.mubr.f32.gmra.mrb[30].mxu0 %v18324_v58 }
 0x215   : > { %13974 = vmatprep.mubr.f32.mxu0 %v18325_v36 }
 0x218   : > { %13975 = vmatmul.mubr.f32.gmra.mrb[32].mxu0 %v18326_v13 }
 0x219   : > { %13977 = vmatprep.mubr.f32.mxu0 %v18327_v60 }
 0x21c   : > { %13978 = vmatmul.mubr.f32.gmra.mrb[34].mxu0 %v18328_v25 }
 0x21d   : > { %13980 = vmatprep.mubr.f32.mxu0 %v18329_v8 }
 0x220   : > { %13981 = vmatmul.mubr.f32.gmra.mrb[36].mxu0 %v18330_v56 }
 0x221   : > { %13983 = vmatprep.mubr.f32.mxu0 %v18331_v30 }
 0x224   : > { %13984 = vmatmul.mubr.f32.gmra.mrb[38].mxu0 %v18332_v10 }
 0x225   : > { %13990 = vmatprep.mubr.f32.mxu0 %v16307_v9  ;;  %v301_v9 = vld [vmem:[#allocation7] sm:$0xff] }
 0x228   : > { %13991 = vmatmul.mubr.f32.vlgmr.msra.gmra.mrb[0].mxu0 %v16324_v16  ;;  %v2585_v16 = vsel %vm327_vm0, %v301_v9, 0 }
 0x229   : > { %13993 = vmatprep.mubr.f32.mxu0 %v16326_v17  ;;  %v17074_v17 = vand.u32 4294901760, %v2585_v16 }
 0x22c   : > { %13994 = vmatmul.mubr.f32.gmra.mrb[2].mxu0 %v16333_v20  ;;  %v17077_v20 = vsub.f32 %v2585_v16, %v17074_v17 }
 0x22d   : > { %13996 = vmatprep.mubr.f32.mxu0 %v16359_v33 }
 0x230   : > { %13997 = vmatmul.mubr.f32.gmra.mrb[4].mxu0 %v16361_v34 }
 0x231   : > { %13999 = vmatprep.mubr.f32.mxu0 %v16418_v63  ;;  %v302_v63 = vld [vmem:[#allocation7 + $0x8] sm:$0xff] }
 0x234   : > { %14000 = vmatmul.mubr.f32.gmra.mrb[6].mxu0 %v16420_v0  ;;  %v2588_v0 = vsel %vm327_vm0, %v302_v63, 0 }
 0x235   : > { %14002 = vmatprep.mubr.f32.mxu0 %v16442_v37  ;;  %v17088_v37 = vand.u32 4294901760, %v2588_v0 }
 0x238   : > { %14003 = vmatmul.mubr.f32.gmra.mrb[8].mxu0 %v16444_v38  ;;  %v17091_v38 = vsub.f32 %v2588_v0, %v17088_v37 }
 0x239   : > { %14005 = vmatprep.mubr.f32.mxu0 %v16446_v39 }
 0x23a   : > { %v17094_v39 = vand.u32 4294901760, %v17091_v38 }
 0x23c   : > { %14006 = vmatmul.mubr.f32.gmra.mrb[10].mxu0 %v16448_v40  ;;  %v2670_v6 = vsub.f32 %v17091_v38, %v17094_v39 }
 0x23d   : > { %14008 = vmatprep.mubr.f32.mxu0 %v16474_v61 }
 0x23e   : > { %v17101_v42 = vand.u32 4294901760, %v2670_v6 }
 0x240   : > { %14009 = vmatmul.mubr.f32.gmra.mrb[12].mxu0 %v16476_v62 }
 0x241   : > { %14011 = vmatprep.mubr.f32.mxu0 %v16515_v46 }
 0x244   : > { %14012 = vmatmul.mubr.f32.gmra.mrb[14].mxu0 %v16517_v29  ;;  %v17080_v29 = vand.u32 4294901760, %v17077_v20 }
 0x245   : > { %14014 = vmatprep.mubr.f32.mxu0 %v18309_v15 }
 0x246   : > { %v2660_v33 = vsub.f32 %v17077_v20, %v17080_v29 }
 0x248   : > { %14015 = vmatmul.mubr.f32.gmra.mrb[16].mxu0 %v18310_v14  ;;  %v17084_v34 = vand.u32 4294901760, %v2660_v33 }
 0x249   : > { %14017 = vmatprep.mubr.f32.mxu0 %v18311_v49 }
 0x24a   : > { %14054 = vmatprep.mubr.f32.mxu1 %v17084_v34 }
 0x24c   : > { %14018 = vmatmul.mubr.f32.gmra.mrb[18].mxu0 %v18312_v5 }
 0x24d   : > { %14020 = vmatprep.mubr.f32.mxu0 %v18313_v55 }
 0x250   : > { %14021 = vmatmul.mubr.f32.gmra.mrb[20].mxu0 %v18314_v52 }
 0x251   : > { %14023 = vmatprep.mubr.f32.mxu0 %v18315_v18 }
 0x254   : > { %14024 = vmatmul.mubr.f32.gmra.mrb[22].mxu0 %v18316_v54 }
 0x255   : > { %14026 = vmatprep.mubr.f32.mxu0 %v18317_v43 }
 0x258   : > { %14027 = vmatmul.mubr.f32.gmra.mrb[24].mxu0 %v18318_v53 }
 0x259   : > { %14029 = vmatprep.mubr.f32.mxu0 %v18319_v21 }
 0x25c   : > { %14030 = vmatmul.mubr.f32.gmra.mrb[26].mxu0 %v18320_v22 }
 0x25d   : > { %14032 = vmatprep.mubr.f32.mxu0 %v18321_v57 }
 0x260   : > { %14033 = vmatmul.mubr.f32.gmra.mrb[28].mxu0 %v18322_v27 }
 0x261   : > { %14035 = vmatprep.mubr.f32.mxu0 %v18323_v35 }
 0x264   : > { %14036 = vmatmul.mubr.f32.gmra.mrb[30].mxu0 %v18324_v58 }
 0x265   : > { %14038 = vmatprep.mubr.f32.mxu0 %v18325_v36 }
 0x268   : > { %14039 = vmatmul.mubr.f32.gmra.mrb[32].mxu0 %v18326_v13 }
 0x269   : > { %14041 = vmatprep.mubr.f32.mxu0 %v18327_v60 }
 0x26c   : > { %14042 = vmatmul.mubr.f32.gmra.mrb[34].mxu0 %v18328_v25 }
 0x26d   : > { %14044 = vmatprep.mubr.f32.mxu0 %v18329_v8 }
 0x270   : > { %14045 = vmatmul.mubr.f32.gmra.mrb[36].mxu0 %v18330_v56 }
 0x271   : > { %14047 = vmatprep.mubr.f32.mxu0 %v18331_v30 }
 0x274   : > { %14048 = vmatmul.mubr.f32.gmra.mrb[38].mxu0 %v18332_v10 }
 0x2fb   : > { %v13992_v40 = vpop.f32.mrb[0].mxu0 }
 0x2fc   : > { %v2594_v61 = vand.u32 4294901760, %v13992_v40  ;;  %v2346_v62 = vpop.f32.mrb[1].mxu0 }
 0x2fd   : > { %v2591_v46 = vand.u32 4294901760, %v2346_v62 }
 0x2fe   : > { %v2686_v48 = vsub.f32 %v13992_v40, %v2594_v61 }
 0x2ff   : > { %v17098_v7 = vpack.c.bf16 %v2594_v61, %v2591_v46  ;;  %v2679_v44 = vsub.f32 %v2346_v62, %v2591_v46  ;;  %v13995_v11 = vpop.f32.mrb[2].mxu0 }
 0x300   : > { %v2687_v3 = vand.u32 4294901760, %v2686_v48  ;;  %v3096_v31 = vand.u32 4294901760, %v13995_v11  ;;  %v2358_v23 = vpop.f32.mrb[3].mxu0 }
 0x301   : > { %v2680_v47 = vand.u32 4294901760, %v2679_v44  ;;  %v3093_v4 = vand.u32 4294901760, %v2358_v23  ;;  %14915 = vmatprep.subr.bf16.mxu1 %v17098_v7  ;;  %v14922_v51 = vpack.c.bf16 %v2686_v48, %v2679_v44 }
 0x302   : > { %v2688_v24 = vsub.f32 %v2686_v48, %v2687_v3  ;;  %v3188_v1 = vsub.f32 %v13995_v11, %v3096_v31  ;;  %14917 = vmatpush3.bf16.msra.mxu1 %v17098_v7 }
 0x303   : > { %v2681_v12 = vsub.f32 %v2679_v44, %v2680_v47  ;;  %v17104_v28 = vpack.c.bf16 %v3096_v31, %v3093_v4  ;;  %v3181_v19 = vsub.f32 %v2358_v23, %v3093_v4  ;;  %v13998_v32 = vpop.f32.mrb[4].mxu0  ;;  %v17106_v59 = vpack.c.bf16 %v2687_v3, %v2680_v47 }
 0x304   : > { %v3189_v50 = vand.u32 4294901760, %v3188_v1  ;;  %v3598_v41 = vand.u32 4294901760, %v13998_v32  ;;  %v2370_v26 = vpop.f32.mrb[5].mxu0  ;;  %v2689_v2 = vand.u32 4294901760, %v2688_v24 }
 0x305   : > { %v3182_v45 = vand.u32 4294901760, %v3181_v19  ;;  %v3595_v15 = vand.u32 4294901760, %v2370_v26  ;;  %14055 = vmatmul.mubr.f32.vlgmr.msra.gmra.mrb[0].mxu1 %v17101_v42  ;;  %v2682_v14 = vand.u32 4294901760, %v2681_v12  ;;  %v17109_v49 = vpack.c.bf16 %v3188_v1, %v3181_v19 }
 0x306   : > { %v3190_v5 = vsub.f32 %v3188_v1, %v3189_v50  ;;  %v3690_v55 = vsub.f32 %v13998_v32, %v3598_v41  ;;  %14061 = vmatprep.mubr.f32.mxu1 %v17074_v17 }
 0x307   : > { %v3183_v52 = vsub.f32 %v3181_v19, %v3182_v45  ;;  %v17112_v18 = vpack.c.bf16 %v3598_v41, %v3595_v15  ;;  %v3683_v54 = vsub.f32 %v2370_v26, %v3595_v15  ;;  %v14001_v43 = vpop.f32.mrb[6].mxu0  ;;  %v14918_v53 = vpack.c.bf16 %v2689_v2, %v2682_v14 }
 0x308   : > { %v3691_v21 = vand.u32 4294901760, %v3690_v55  ;;  %v4100_v22 = vand.u32 4294901760, %v14001_v43  ;;  %v2382_v57 = vpop.f32.mrb[7].mxu0  ;;  %v3191_v27 = vand.u32 4294901760, %v3190_v5  ;;  %v17114_v35 = vpack.c.bf16 %v3189_v50, %v3182_v45 }
 0x309   : > { %v3684_v58 = vand.u32 4294901760, %v3683_v54  ;;  %v4097_v36 = vand.u32 4294901760, %v2382_v57  ;;  %14919 = vmatprep.subr.bf16.mxu1 %v14918_v53  ;;  %v3184_v13 = vand.u32 4294901760, %v3183_v52  ;;  %v17116_v60 = vpack.c.bf16 %v3690_v55, %v3683_v54 }
 0x30a   : > { %v3692_v25 = vsub.f32 %v3690_v55, %v3691_v21  ;;  %v4192_v8 = vsub.f32 %v14001_v43, %v4100_v22  ;;  %14921 = vmatpush3.bf16.msra.mxu1 %v14918_v53 }
 0x30b   : > { %v3685_v56 = vsub.f32 %v3683_v54, %v3684_v58  ;;  %v17118_v30 = vpack.c.bf16 %v4100_v22, %v4097_v36  ;;  %v4185_v10 = vsub.f32 %v2382_v57, %v4097_v36  ;;  %v14004_v9 = vpop.f32.mrb[8].mxu0  ;;  %14923 = vmatprep.subr.bf16.mxu1 %v14922_v51  ;;  %v17120_v16 = vpack.c.bf16 %v3191_v27, %v3184_v13 }
 0x30c   : > { %v4193_v33 = vand.u32 4294901760, %v4192_v8  ;;  %v4602_v63 = vand.u32 4294901760, %v14004_v9  ;;  %v2394_v0 = vpop.f32.mrb[9].mxu0  ;;  %v3693_v40 = vand.u32 4294901760, %v3692_v25  ;;  %v17122_v61 = vpack.c.bf16 %v3691_v21, %v3684_v58 }
 0x30d   : > { %v4186_v62 = vand.u32 4294901760, %v4185_v10  ;;  %v4599_v46 = vand.u32 4294901760, %v2394_v0  ;;  %14062 = vmatmul.mubr.f32.vlgmr.msra.gmra.mrb[0].mxu1 %v17088_v37  ;;  %v3686_v6 = vand.u32 4294901760, %v3685_v56  ;;  %v17125_v48 = vpack.c.bf16 %v4192_v8, %v4185_v10 }
 0x30e   : > { %v4194_v44 = vsub.f32 %v4192_v8, %v4193_v33  ;;  %v4694_v11 = vsub.f32 %v14004_v9, %v4602_v63  ;;  %14925 = vmatpush3.bf16.msra.mxu1 %v14922_v51  ;;  %14068 = vmatprep.mubr.f32.mxu1 %v17077_v20 }
 0x30f   : > { %v4187_v3 = vsub.f32 %v4185_v10, %v4186_v62  ;;  %v17128_v31 = vpack.c.bf16 %v4602_v63, %v4599_v46  ;;  %v4687_v23 = vsub.f32 %v2394_v0, %v4599_v46  ;;  %v14007_v47 = vpop.f32.mrb[10].mxu0  ;;  %14927 = vmatprep.subr.bf16.mxu1 %v17098_v7  ;;  %v17131_v4 = vpack.c.bf16 %v3693_v40, %v3686_v6 }
 0x310   : > { %v4695_v24 = vand.u32 4294901760, %v4694_v11  ;;  %v5104_v1 = vand.u32 4294901760, %v14007_v47  ;;  %v2406_v12 = vpop.f32.mrb[11].mxu0  ;;  %v4195_v19 = vand.u32 4294901760, %v4194_v44  ;;  %v17133_v32 = vpack.c.bf16 %v4193_v33, %v4186_v62 }
 0x311   : > { %v4688_v50 = vand.u32 4294901760, %v4687_v23  ;;  %v5101_v41 = vand.u32 4294901760, %v2406_v12  ;;  %v4188_v51 = vand.u32 4294901760, %v4187_v3  ;;  %v17135_v26 = vpack.c.bf16 %v4694_v11, %v4687_v23 }
 0x312   : > { %v4696_v2 = vsub.f32 %v4694_v11, %v4695_v24  ;;  %v5196_v45 = vsub.f32 %v14007_v47, %v5104_v1 }
 0x313   : > { %v4689_v15 = vsub.f32 %v4687_v23, %v4688_v50  ;;  %v17137_v14 = vpack.c.bf16 %v5104_v1, %v5101_v41  ;;  %v5189_v5 = vsub.f32 %v2406_v12, %v5101_v41  ;;  %v14010_v55 = vpop.f32.mrb[12].mxu0  ;;  %v17139_v52 = vpack.c.bf16 %v4195_v19, %v4188_v51 }
 0x314   : > { %v5197_v54 = vand.u32 4294901760, %v5196_v45  ;;  %v5606_v43 = vand.u32 4294901760, %v14010_v55  ;;  %v2418_v53 = vpop.f32.mrb[13].mxu0  ;;  %v4697_v21 = vand.u32 4294901760, %v4696_v2  ;;  %v17141_v22 = vpack.c.bf16 %v4695_v24, %v4688_v50 }
 0x315   : > { %v5190_v57 = vand.u32 4294901760, %v5189_v5  ;;  %v5603_v27 = vand.u32 4294901760, %v2418_v53  ;;  %14069 = vmatmul.mubr.f32.vlgmr.msra.gmra.mrb[0].mxu1 %v17091_v38  ;;  %v4690_v58 = vand.u32 4294901760, %v4689_v15  ;;  %v17144_v36 = vpack.c.bf16 %v5196_v45, %v5189_v5 }
 0x316   : > { %v5198_v13 = vsub.f32 %v5196_v45, %v5197_v54  ;;  %v5698_v25 = vsub.f32 %v14010_v55, %v5606_v43  ;;  %14929 = vmatpush3.bf16.msra.mxu1 %v17098_v7  ;;  %14075 = vmatprep.mubr.f32.mxu1 %v17080_v29 }
 0x317   : > { %v5191_v8 = vsub.f32 %v5189_v5, %v5190_v57  ;;  %v17148_v56 = vpack.c.bf16 %v5606_v43, %v5603_v27  ;;  %v5691_v10 = vsub.f32 %v2418_v53, %v5603_v27  ;;  %14931 = vmatprep.subr.bf16.mxu1 %v17106_v59  ;;  %v14013_v9 = vpop.f32.mrb[14].mxu0  ;;  %v17151_v33 = vpack.c.bf16 %v4697_v21, %v4690_v58 }
 0x318   : > { %v5699_v63 = vand.u32 4294901760, %v5698_v25  ;;  %v6108_v0 = vand.u32 4294901760, %v14013_v9  ;;  %v2430_v40 = vpop.f32.mrb[15].mxu0  ;;  %v5199_v62 = vand.u32 4294901760, %v5198_v13  ;;  %v17153_v46 = vpack.c.bf16 %v5197_v54, %v5190_v57 }
 0x319   : > { %v5692_v6 = vand.u32 4294901760, %v5691_v10  ;;  %v6105_v44 = vand.u32 4294901760, %v2430_v40  ;;  %v5192_v11 = vand.u32 4294901760, %v5191_v8  ;;  %v17155_v3 = vpack.c.bf16 %v5698_v25, %v5691_v10 }
 0x31a   : > { %v5700_v23 = vsub.f32 %v5698_v25, %v5699_v63  ;;  %v6200_v47 = vsub.f32 %v14013_v9, %v6108_v0 }
 0x31b   : > { %v5693_v24 = vsub.f32 %v5691_v10, %v5692_v6  ;;  %v17157_v1 = vpack.c.bf16 %v6108_v0, %v6105_v44  ;;  %v6193_v12 = vsub.f32 %v2430_v40, %v6105_v44  ;;  %v14016_v19 = vpop.f32.mrb[16].mxu0  ;;  %v17159_v50 = vpack.c.bf16 %v5199_v62, %v5192_v11 }
 0x31c   : > { %v6201_v41 = vand.u32 4294901760, %v6200_v47  ;;  %v6610_v51 = vand.u32 4294901760, %v14016_v19  ;;  %v2442_v2 = vpop.f32.mrb[17].mxu0  ;;  %v5701_v45 = vand.u32 4294901760, %v5700_v23  ;;  %v17161_v15 = vpack.c.bf16 %v5699_v63, %v5692_v6 }
 0x31d   : > { %v6194_v5 = vand.u32 4294901760, %v6193_v12  ;;  %v6607_v55 = vand.u32 4294901760, %v2442_v2  ;;  %14076 = vmatmul.mubr.f32.vlgmr.msra.gmra.mrb[0].mxu1 %v17094_v39  ;;  %v5694_v54 = vand.u32 4294901760, %v5693_v24  ;;  %v17164_v43 = vpack.c.bf16 %v6200_v47, %v6193_v12 }
 0x31e   : > { %v6202_v53 = vsub.f32 %v6200_v47, %v6201_v41  ;;  %v6702_v21 = vsub.f32 %v14016_v19, %v6610_v51  ;;  %14933 = vmatpush3.bf16.msra.mxu1 %v17106_v59  ;;  %14082 = vmatprep.mubr.f32.mxu1 %v17074_v17 }
 0x31f   : > { %v6195_v57 = vsub.f32 %v6193_v12, %v6194_v5  ;;  %v17168_v27 = vpack.c.bf16 %v6610_v51, %v6607_v55  ;;  %v6695_v58 = vsub.f32 %v2442_v2, %v6607_v55  ;;  %14935 = vmatprep.subr.bf16.mxu1 %v17098_v7  ;;  %v14019_v13 = vpop.f32.mrb[18].mxu0  ;;  %v17171_v25 = vpack.c.bf16 %v5701_v45, %v5694_v54 }
 0x320   : > { %v6703_v8 = vand.u32 4294901760, %v6702_v21  ;;  %v7112_v10 = vand.u32 4294901760, %v14019_v13  ;;  %v2454_v9 = vpop.f32.mrb[19].mxu0  ;;  %v6203_v63 = vand.u32 4294901760, %v6202_v53  ;;  %v17173_v0 = vpack.c.bf16 %v6201_v41, %v6194_v5 }
 0x321   : > { %v6696_v40 = vand.u32 4294901760, %v6695_v58  ;;  %v7109_v62 = vand.u32 4294901760, %v2454_v9  ;;  %v6196_v59 = vand.u32 4294901760, %v6195_v57  ;;  %v17175_v6 = vpack.c.bf16 %v6702_v21, %v6695_v58 }
 0x322   : > { %v6704_v44 = vsub.f32 %v6702_v21, %v6703_v8  ;;  %v7204_v11 = vsub.f32 %v14019_v13, %v7112_v10 }
 0x323   : > { %18333 = vst [vmem:[#allocation13_spill] sm:$0xff] %v17175_v6  ;;  %v6697_v23 = vsub.f32 %v6695_v58, %v6696_v40  ;;  %v17177_v47 = vpack.c.bf16 %v7112_v10, %v7109_v62  ;;  %v7197_v24 = vsub.f32 %v2454_v9, %v7109_v62  ;;  %v14022_v12 = vpop.f32.mrb[20].mxu0  ;;  %v17179_v19 = vpack.c.bf16 %v6203_v63, %v6196_v59 }
 0x324   : > { %v7205_v51 = vand.u32 4294901760, %v7204_v11  ;;  %v7614_v2 = vand.u32 4294901760, %v14022_v12  ;;  %v2466_v45 = vpop.f32.mrb[21].mxu0  ;;  %v6705_v55 = vand.u32 4294901760, %v6704_v44  ;;  %v17181_v41 = vpack.c.bf16 %v6703_v8, %v6696_v40 }
 0x325   : > { %18334 = vst [vmem:[#allocation14_spill] sm:$0xff] %v17177_v47  ;;  %v7198_v5 = vand.u32 4294901760, %v7197_v24  ;;  %v7611_v54 = vand.u32 4294901760, %v2466_v45  ;;  %14083 = vmatmul.mubr.f32.vlgmr.msra.gmra.mrb[0].mxu1 %v17088_v37  ;;  %v6698_v53 = vand.u32 4294901760, %v6697_v23  ;;  %v17184_v21 = vpack.c.bf16 %v7204_v11, %v7197_v24 }
 0x326   : > { %18335 = vst [vmem:[#allocation15_spill] sm:$0xff] %v17181_v41  ;;  %v7206_v57 = vsub.f32 %v7204_v11, %v7205_v51  ;;  %v7706_v58 = vsub.f32 %v14022_v12, %v7614_v2  ;;  %14937 = vmatpush3.bf16.msra.mxu1 %v17098_v7  ;;  %14089 = vmatprep.mubr.f32.mxu1 %v17074_v17 }
 0x327   : > { %18336 = vst [vmem:[#allocation16_spill] sm:$0xff] %v17184_v21  ;;  %v7199_v13 = vsub.f32 %v7197_v24, %v7198_v5  ;;  %v17188_v10 = vpack.c.bf16 %v7614_v2, %v7611_v54  ;;  %v7699_v9 = vsub.f32 %v2466_v45, %v7611_v54  ;;  %14939 = vmatprep.subr.bf16.mxu1 %v17104_v28  ;;  %v14025_v8 = vpop.f32.mrb[22].mxu0 }
 0x328   : > { %v17191_v63 = vpack.c.bf16 %v6705_v55, %v6698_v53  ;;  %v7707_v40 = vand.u32 4294901760, %v7706_v58  ;;  %v8116_v62 = vand.u32 4294901760, %v14025_v8  ;;  %v2478_v59 = vpop.f32.mrb[23].mxu0  ;;  %v7207_v44 = vand.u32 4294901760, %v7206_v57 }
 0x329   : > { %18337 = vst [vmem:[#allocation17_spill] sm:$0xff] %v17188_v10  ;;  %v17193_v23 = vpack.c.bf16 %v7205_v51, %v7198_v5  ;;  %v7700_v11 = vand.u32 4294901760, %v7699_v9  ;;  %v8113_v12 = vand.u32 4294901760, %v2478_v59  ;;  %v7200_v7 = vand.u32 4294901760, %v7199_v13 }
 0x32a   : > { %v17195_v21 = vpack.c.bf16 %v7706_v58, %v7699_v9  ;;  %v7708_v24 = vsub.f32 %v7706_v58, %v7707_v40  ;;  %v8208_v2 = vsub.f32 %v14025_v8, %v8116_v62 }
 0x32b   : > { %18338 = vst [vmem:[#allocation18_spill] sm:$0xff] %v17193_v23  ;;  %v7701_v10 = vsub.f32 %v7699_v9, %v7700_v11  ;;  %v17197_v45 = vpack.c.bf16 %v8116_v62, %v8113_v12  ;;  %v8201_v54 = vsub.f32 %v2478_v59, %v8113_v12  ;;  %v14028_v47 = vpop.f32.mrb[24].mxu0  ;;  %v17199_v55 = vpack.c.bf16 %v7207_v44, %v7200_v7 }
 0x32c   : > { %18339 = vst [vmem:[#allocation19_spill] sm:$0xff] %v17195_v21  ;;  %v8209_v53 = vand.u32 4294901760, %v8208_v2  ;;  %v8618_v41 = vand.u32 4294901760, %v14028_v47  ;;  %v2490_v6 = vpop.f32.mrb[25].mxu0  ;;  %v7709_v57 = vand.u32 4294901760, %v7708_v24  ;;  %v17201_v51 = vpack.c.bf16 %v7707_v40, %v7700_v11 }
 0x32d   : > { %18340 = vst [vmem:[#allocation20_spill] sm:$0xff] %v17197_v45  ;;  %v8202_v5 = vand.u32 4294901760, %v8201_v54  ;;  %v8615_v23 = vand.u32 4294901760, %v2490_v6  ;;  %14090 = vmatmul.mubr.f32.vlgmr.msra.gmra.mrb[0].mxu1 %v17088_v37  ;;  %v7702_v13 = vand.u32 4294901760, %v7701_v10  ;;  %v17204_v58 = vpack.c.bf16 %v8208_v2, %v8201_v54 }
 0x32e   : > { %18341 = vst [vmem:[#allocation21_spill] sm:$0xff] %v17201_v51  ;;  %v8210_v9 = vsub.f32 %v8208_v2, %v8209_v53  ;;  %v8710_v8 = vsub.f32 %v14028_v47, %v8618_v41  ;;  %14941 = vmatpush3.bf16.msra.mxu1 %v17104_v28  ;;  %14096 = vmatprep.mubr.f32.mxu1 %v17084_v34 }
 0x32f   : > { %18342 = vst [vmem:[#allocation22_spill] sm:$0xff] %v17204_v58  ;;  %v8203_v62 = vsub.f32 %v8201_v54, %v8202_v5  ;;  %v17208_v59 = vpack.c.bf16 %v8618_v41, %v8615_v23  ;;  %v8703_v44 = vsub.f32 %v2490_v6, %v8615_v23  ;;  %14943 = vmatprep.subr.bf16.mxu1 %v17120_v16  ;;  %v14031_v40 = vpop.f32.mrb[26].mxu0 }
 0x330   : > { %v17211_v11 = vpack.c.bf16 %v7709_v57, %v7702_v13  ;;  %v8711_v12 = vand.u32 4294901760, %v8710_v8  ;;  %v9120_v7 = vand.u32 4294901760, %v14031_v40  ;;  %v2502_v10 = vpop.f32.mrb[27].mxu0  ;;  %v8211_v24 = vand.u32 4294901760, %v8210_v9 }
 0x331   : > { %18343 = vst [vmem:[#allocation23_spill] sm:$0xff] %v17208_v59  ;;  %v17213_v58 = vpack.c.bf16 %v8209_v53, %v8202_v5  ;;  %v8704_v47 = vand.u32 4294901760, %v8703_v44  ;;  %v9117_v2 = vand.u32 4294901760, %v2502_v10  ;;  %14097 = vmatmul.mubr.f32.vlgmr.msra.gmra.mrb[2].mxu1 %v17101_v42  ;;  %v8204_v45 = vand.u32 4294901760, %v8203_v62 }
 0x332   : > { %18344 = vst [vmem:[#allocation24_spill] sm:$0xff] %v17211_v11  ;;  %v17216_v54 = vpack.c.bf16 %v8710_v8, %v8703_v44  ;;  %v8712_v41 = vsub.f32 %v8710_v8, %v8711_v12  ;;  %v9212_v6 = vsub.f32 %v14031_v40, %v9120_v7  ;;  %14945 = vmatpush3.bf16.msra.mxu1 %v17120_v16 }
 0x333   : > { %18345 = vst [vmem:[#allocation25_spill] sm:$0xff] %v17213_v58  ;;  %14103 = vmatprep.mubr.f32.mxu1 %v17074_v17  ;;  %v8705_v23 = vsub.f32 %v8703_v44, %v8704_v47  ;;  %v17220_v57 = vpack.c.bf16 %v9120_v7, %v9117_v2  ;;  %v9205_v13 = vsub.f32 %v2502_v10, %v9117_v2  ;;  %v14034_v53 = vpop.f32.mrb[28].mxu0 }
 0x334   : > { %18346 = vst [vmem:[#allocation26_spill] sm:$0xff] %v17216_v54  ;;  %14947 = vmatprep.subr.bf16.mxu1 %v17109_v49  ;;  %v17223_v5 = vpack.c.bf16 %v8211_v24, %v8204_v45  ;;  %v9213_v9 = vand.u32 4294901760, %v9212_v6  ;;  %v9622_v59 = vand.u32 4294901760, %v14034_v53  ;;  %v2514_v62 = vpop.f32.mrb[29].mxu0  ;;  %v8713_v58 = vand.u32 4294901760, %v8712_v41 }
 0x335   : > { %18347 = vst [vmem:[#allocation27_spill] sm:$0xff] %v17220_v57  ;;  %v17225_v54 = vpack.c.bf16 %v8711_v12, %v8704_v47  ;;  %v9206_v8 = vand.u32 4294901760, %v9205_v13  ;;  %v9619_v40 = vand.u32 4294901760, %v2514_v62  ;;  %v8706_v16 = vand.u32 4294901760, %v8705_v23 }
 0x336   : > { %18348 = vst [vmem:[#allocation28_spill] sm:$0xff] %v17223_v5  ;;  %v17227_v51 = vpack.c.bf16 %v9212_v6, %v9205_v13  ;;  %v9214_v44 = vsub.f32 %v9212_v6, %v9213_v9  ;;  %v9714_v7 = vsub.f32 %v14034_v53, %v9622_v59 }
 0x337   : > { %18349 = vst [vmem:[#allocation32_spill] sm:$0xff] %v17225_v54  ;;  %v9207_v57 = vsub.f32 %v9205_v13, %v9206_v8  ;;  %v17229_v10 = vpack.c.bf16 %v9622_v59, %v9619_v40  ;;  %v9707_v2 = vsub.f32 %v2514_v62, %v9619_v40  ;;  %v14037_v21 = vpop.f32.mrb[30].mxu0  ;;  %v17231_v45 = vpack.c.bf16 %v8713_v58, %v8706_v16 }
 0x338   : > { %18350 = vst [vmem:[#allocation34_spill] sm:$0xff] %v17227_v51  ;;  %v9715_v24 = vand.u32 4294901760, %v9714_v7  ;;  %v10124_v5 = vand.u32 4294901760, %v14037_v21  ;;  %v2526_v11 = vpop.f32.mrb[31].mxu0  ;;  %v9215_v41 = vand.u32 4294901760, %v9214_v44  ;;  %v17233_v12 = vpack.c.bf16 %v9213_v9, %v9206_v8 }
 0x339   : > { %18351 = vst [vmem:[#allocation35_spill] sm:$0xff] %v17229_v10  ;;  %v9708_v47 = vand.u32 4294901760, %v9707_v2  ;;  %v10121_v54 = vand.u32 4294901760, %v2526_v11  ;;  %14104 = vmatmul.mubr.f32.vlgmr.msra.gmra.mrb[2].mxu1 %v17088_v37  ;;  %v9208_v23 = vand.u32 4294901760, %v9207_v57  ;;  %v17236_v6 = vpack.c.bf16 %v9714_v7, %v9707_v2 }
 0x33a   : > { %18352 = vst [vmem:[#allocation36_spill] sm:$0xff] %v17233_v12  ;;  %v9716_v13 = vsub.f32 %v9714_v7, %v9715_v24  ;;  %v10216_v59 = vsub.f32 %v14037_v21, %v10124_v5  ;;  %14949 = vmatpush3.bf16.msra.mxu1 %v17109_v49  ;;  %14110 = vmatprep.mubr.f32.mxu1 %v17077_v20 }
 0x33b   : > { %18353 = vst [vmem:[#allocation39_spill] sm:$0xff] %v17236_v6  ;;  %v9709_v58 = vsub.f32 %v9707_v2, %v9708_v47  ;;  %v17240_v53 = vpack.c.bf16 %v10124_v5, %v10121_v54  ;;  %v10209_v62 = vsub.f32 %v2526_v11, %v10121_v54  ;;  %14951 = vmatprep.subr.bf16.mxu1 %v17104_v28  ;;  %v14040_v9 = vpop.f32.mrb[32].mxu0 }
 0x33c   : > { %v17243_v8 = vpack.c.bf16 %v9215_v41, %v9208_v23  ;;  %v10217_v40 = vand.u32 4294901760, %v10216_v59  ;;  %v10626_v16 = vand.u32 4294901760, %v14040_v9  ;;  %v2538_v57 = vpop.f32.mrb[33].mxu0  ;;  %v9717_v44 = vand.u32 4294901760, %v9716_v13 }
 0x33d   : > { %18354 = vst [vmem:[#allocation40_spill] sm:$0xff] %v17240_v53  ;;  %v17245_v6 = vpack.c.bf16 %v9715_v24, %v9708_v47  ;;  %v10210_v21 = vand.u32 4294901760, %v10209_v62  ;;  %v10623_v7 = vand.u32 4294901760, %v2538_v57  ;;  %v9710_v49 = vand.u32 4294901760, %v9709_v58 }
 0x33e   : > { %18355 = vst [vmem:[#allocation43_spill] sm:$0xff] %v17243_v8  ;;  %v17247_v10 = vpack.c.bf16 %v10216_v59, %v10209_v62  ;;  %v10218_v2 = vsub.f32 %v10216_v59, %v10217_v40  ;;  %v10718_v5 = vsub.f32 %v14040_v9, %v10626_v16 }
 0x33f   : > { %18356 = vst [vmem:[#allocation44_spill] sm:$0xff] %v17245_v6  ;;  %v10211_v53 = vsub.f32 %v10209_v62, %v10210_v21  ;;  %v17249_v11 = vpack.c.bf16 %v10626_v16, %v10623_v7  ;;  %v10711_v54 = vsub.f32 %v2538_v57, %v10623_v7  ;;  %v14043_v12 = vpop.f32.mrb[34].mxu0  ;;  %v17251_v41 = vpack.c.bf16 %v9717_v44, %v9710_v49 }
 0x340   : > { %18357 = vst [vmem:[#allocation48_spill] sm:$0xff] %v17247_v10  ;;  %v10719_v23 = vand.u32 4294901760, %v10718_v5  ;;  %v11128_v51 = vand.u32 4294901760, %v14043_v12  ;;  %v2550_v8 = vpop.f32.mrb[35].mxu0  ;;  %v10219_v13 = vand.u32 4294901760, %v10218_v2  ;;  %v17253_v24 = vpack.c.bf16 %v10217_v40, %v10210_v21 }
 0x341   : > { %18358 = vst [vmem:[#allocation51_spill] sm:$0xff] %v17249_v11  ;;  %18359 = vst [vmem:[#allocation58_spill] sm:$0xff] %v17251_v41  ;;  %v10712_v47 = vand.u32 4294901760, %v10711_v54  ;;  %v11125_v6 = vand.u32 4294901760, %v2550_v8  ;;  %14111 = vmatmul.mubr.f32.vlgmr.msra.gmra.mrb[2].mxu1 %v17091_v38  ;;  %v10212_v58 = vand.u32 4294901760, %v10211_v53  ;;  %v17256_v59 = vpack.c.bf16 %v10718_v5, %v10711_v54 }
 0x342   : > { %18360 = vst [vmem:[#allocation61_spill] sm:$0xff] %v17253_v24  ;;  %v10720_v62 = vsub.f32 %v10718_v5, %v10719_v23  ;;  %v11220_v9 = vsub.f32 %v14043_v12, %v11128_v51  ;;  %14953 = vmatpush3.bf16.msra.mxu1 %v17104_v28  ;;  %14117 = vmatprep.mubr.f32.mxu1 %v17080_v29 }
 0x343   : > { %18361 = vst [vmem:[#allocation29_spill] sm:$0xff] %v17256_v59  ;;  %v10713_v16 = vsub.f32 %v10711_v54, %v10712_v47  ;;  %v17260_v57 = vpack.c.bf16 %v11128_v51, %v11125_v6  ;;  %v11213_v44 = vsub.f32 %v2550_v8, %v11125_v6  ;;  %14955 = vmatprep.subr.bf16.mxu1 %v17114_v35  ;;  %v14046_v40 = vpop.f32.mrb[36].mxu0 }
 0x344   : > { %v17263_v21 = vpack.c.bf16 %v10219_v13, %v10212_v58  ;;  %v11221_v7 = vand.u32 4294901760, %v11220_v9  ;;  %v11630_v49 = vand.u32 4294901760, %v14046_v40  ;;  %v2562_v53 = vpop.f32.mrb[37].mxu0  ;;  %v10721_v2 = vand.u32 4294901760, %v10720_v62 }
 0x345   : > { %18362 = vst [vmem:[#allocation30_spill] sm:$0xff] %v17260_v57  ;;  %v17265_v59 = vpack.c.bf16 %v10719_v23, %v10712_v47  ;;  %v11214_v12 = vand.u32 4294901760, %v11213_v44  ;;  %v11627_v5 = vand.u32 4294901760, %v2562_v53  ;;  %v10714_v11 = vand.u32 4294901760, %v10713_v16 }
 0x346   : > { %18363 = vst [vmem:[#allocation31_spill] sm:$0xff] %v17263_v21  ;;  %v17267_v24 = vpack.c.bf16 %v11220_v9, %v11213_v44  ;;  %v11222_v54 = vsub.f32 %v11220_v9, %v11221_v7  ;;  %v11722_v51 = vsub.f32 %v14046_v40, %v11630_v49 }
 0x347   : > { %18364 = vst [vmem:[#allocation33_spill] sm:$0xff] %v17265_v59  ;;  %v11215_v57 = vsub.f32 %v11213_v44, %v11214_v12  ;;  %v17269_v6 = vpack.c.bf16 %v11630_v49, %v11627_v5  ;;  %v11715_v8 = vsub.f32 %v2562_v53, %v11627_v5  ;;  %v14049_v10 = vpop.f32.mrb[38].mxu0  ;;  %v17271_v13 = vpack.c.bf16 %v10721_v2, %v10714_v11 }
 0x348   : > { %v11723_v58 = vand.u32 4294901760, %v11722_v51  ;;  %v12132_v21 = vand.u32 4294901760, %v14049_v10  ;;  %v2574_v41 = vpop.f32.mrb[39].mxu0  ;;  %v11223_v62 = vand.u32 4294901760, %v11222_v54  ;;  %v17273_v23 = vpack.c.bf16 %v11221_v7, %v11214_v12 }
 0x349   : > { %v11716_v47 = vand.u32 4294901760, %v11715_v8  ;;  %v12129_v59 = vand.u32 4294901760, %v2574_v41  ;;  %14118 = vmatmul.mubr.f32.vlgmr.msra.gmra.mrb[2].mxu1 %v17094_v39  ;;  %v11216_v16 = vand.u32 4294901760, %v11215_v57  ;;  %v17276_v9 = vpack.c.bf16 %v11722_v51, %v11715_v8 }
 0x34a   : > { %v11724_v44 = vsub.f32 %v11722_v51, %v11723_v58  ;;  %v12224_v40 = vsub.f32 %v14049_v10, %v12132_v21  ;;  %14957 = vmatpush3.bf16.msra.mxu1 %v17114_v35  ;;  %14124 = vmatprep.mubr.f32.mxu1 %v17074_v17 }
 0x34b   : > { %18365 = vst [vmem:[#allocation37_spill] sm:$0xff] %v17276_v9  ;;  %v11717_v11 = vsub.f32 %v11715_v8, %v11716_v47  ;;  %v17280_v49 = vpack.c.bf16 %v12132_v21, %v12129_v59  ;;  %v12217_v53 = vsub.f32 %v2574_v41, %v12129_v59  ;;  %14959 = vmatprep.subr.bf16.mxu1 %v17104_v28 }
 0x34c   : > { %v17283_v7 = vpack.c.bf16 %v11223_v62, %v11216_v16  ;;  %v12225_v2 = vand.u32 4294901760, %v12224_v40  ;;  %v11725_v12 = vand.u32 4294901760, %v11724_v44  ;;  %v17285_v5 = vpack.c.bf16 %v11723_v58, %v11716_v47 }
 0x34d   : > { %v12218_v57 = vand.u32 4294901760, %v12217_v53  ;;  %v11718_v54 = vand.u32 4294901760, %v11717_v11  ;;  %v17287_v51 = vpack.c.bf16 %v12224_v40, %v12217_v53 }
 0x34e   : > { %v12226_v10 = vsub.f32 %v12224_v40, %v12225_v2 }
 0x34f   : > { %v12219_v35 = vsub.f32 %v12217_v53, %v12218_v57  ;;  %v17289_v9 = vpack.c.bf16 %v11725_v12, %v11718_v54  ;;  %v17291_v8 = vpack.c.bf16 %v12225_v2, %v12218_v57  ;;  %v18375_v2 = vld [vmem:[#allocation20_spill] sm:$0xff]  ;;  %v18377_v54 = vld [vmem:[#allocation22_spill] sm:$0xff] }
 0x350   : > { %v12227_v21 = vand.u32 4294901760, %v12226_v10  ;;  %v18376_v57 = vld [vmem:[#allocation28_spill] sm:$0xff]  ;;  %v18378_v10 = vld [vmem:[#allocation25_spill] sm:$0xff] }
 0x351   : > { %v12220_v41 = vand.u32 4294901760, %v12219_v35  ;;  %14125 = vmatmul.mubr.f32.vlgmr.msra.gmra.mrb[2].mxu1 %v17088_v37 }
 0x352   : > { %14961 = vmatpush3.bf16.msra.mxu1 %v17104_v28  ;;  %14131 = vmatprep.mubr.f32.mxu1 %v17074_v17 }
 0x353   : > { %14963 = vmatprep.subr.bf16.mxu1 %v17112_v18  ;;  %v17297_v59 = vpack.c.bf16 %v12227_v21, %v12220_v41 }
 0x359   : > { %14132 = vmatmul.mubr.f32.vlgmr.msra.gmra.mrb[2].mxu1 %v17088_v37 }
 0x35a   : > { %14965 = vmatpush3.bf16.msra.mxu1 %v17112_v18  ;;  %14138 = vmatprep.mubr.f32.mxu1 %v17084_v34 }
 0x35b   : > { %14967 = vmatprep.subr.bf16.mxu1 %v17131_v4 }
 0x35d   : > { %14139 = vmatmul.mubr.f32.vlgmr.msra.gmra.mrb[4].mxu1 %v17101_v42 }
 0x35e   : > { %14969 = vmatpush3.bf16.msra.mxu1 %v17131_v4  ;;  %14145 = vmatprep.mubr.f32.mxu1 %v17074_v17  ;;  %v18367_v4 = vld [vmem:[#allocation15_spill] sm:$0xff] }
 0x35f   : > { %14971 = vmatprep.subr.bf16.mxu1 %v17116_v60 }
 0x365   : > { %14146 = vmatmul.mubr.f32.vlgmr.msra.gmra.mrb[4].mxu1 %v17088_v37 }
 0x366   : > { %14973 = vmatpush3.bf16.msra.mxu1 %v17116_v60  ;;  %14152 = vmatprep.mubr.f32.mxu1 %v17077_v20 }
 0x367   : > { %14975 = vmatprep.subr.bf16.mxu1 %v17112_v18 }
 0x36d   : > { %14153 = vmatmul.mubr.f32.vlgmr.msra.gmra.mrb[4].mxu1 %v17091_v38 }
 0x36e   : > { %14977 = vmatpush3.bf16.msra.mxu1 %v17112_v18  ;;  %14159 = vmatprep.mubr.f32.mxu1 %v17080_v29 }
 0x36f   : > { %14979 = vmatprep.subr.bf16.mxu1 %v17122_v61 }
 0x375   : > { %14160 = vmatmul.mubr.f32.vlgmr.msra.gmra.mrb[4].mxu1 %v17094_v39 }
 0x376   : > { %14981 = vmatpush3.bf16.msra.mxu1 %v17122_v61  ;;  %14166 = vmatprep.mubr.f32.mxu1 %v17074_v17 }
 0x377   : > { %14983 = vmatprep.subr.bf16.mxu1 %v17112_v18 }
 0x37d   : > { %14167 = vmatmul.mubr.f32.vlgmr.msra.gmra.mrb[4].mxu1 %v17088_v37 }
 0x37e   : > { %14985 = vmatpush3.bf16.msra.mxu1 %v17112_v18  ;;  %14173 = vmatprep.mubr.f32.mxu1 %v17074_v17 }
 0x37f   : > { %14987 = vmatprep.subr.bf16.mxu1 %v17118_v30 }
 0x385   : > { %14174 = vmatmul.mubr.f32.vlgmr.msra.gmra.mrb[4].mxu1 %v17088_v37 }
 0x386   : > { %14989 = vmatpush3.bf16.msra.mxu1 %v17118_v30  ;;  %14180 = vmatprep.mubr.f32.mxu1 %v17084_v34 }
 0x387   : > { %14991 = vmatprep.subr.bf16.mxu1 %v17139_v52 }
 0x389   : > { %14181 = vmatmul.mubr.f32.vlgmr.msra.gmra.mrb[6].mxu1 %v17101_v42 }
 0x38a   : > { %14993 = vmatpush3.bf16.msra.mxu1 %v17139_v52  ;;  %14187 = vmatprep.mubr.f32.mxu1 %v17074_v17  ;;  %v18369_v52 = vld [vmem:[#allocation16_spill] sm:$0xff] }
 0x38b   : > { %14995 = vmatprep.subr.bf16.mxu1 %v17125_v48 }
 0x391   : > { %14188 = vmatmul.mubr.f32.vlgmr.msra.gmra.mrb[6].mxu1 %v17088_v37 }
 0x392   : > { %14997 = vmatpush3.bf16.msra.mxu1 %v17125_v48  ;;  %14194 = vmatprep.mubr.f32.mxu1 %v17077_v20 }
 0x393   : > { %14999 = vmatprep.subr.bf16.mxu1 %v17118_v30 }
 0x399   : > { %14195 = vmatmul.mubr.f32.vlgmr.msra.gmra.mrb[6].mxu1 %v17091_v38 }
 0x39a   : > { %15001 = vmatpush3.bf16.msra.mxu1 %v17118_v30  ;;  %14201 = vmatprep.mubr.f32.mxu1 %v17080_v29 }
 0x39b   : > { %15003 = vmatprep.subr.bf16.mxu1 %v17133_v32 }
 0x3a1   : > { %14202 = vmatmul.mubr.f32.vlgmr.msra.gmra.mrb[6].mxu1 %v17094_v39 }
 0x3a2   : > { %15005 = vmatpush3.bf16.msra.mxu1 %v17133_v32  ;;  %14208 = vmatprep.mubr.f32.mxu1 %v17074_v17 }
 0x3a3   : > { %15007 = vmatprep.subr.bf16.mxu1 %v17118_v30 }
 0x3a9   : > { %14209 = vmatmul.mubr.f32.vlgmr.msra.gmra.mrb[6].mxu1 %v17088_v37 }
 0x3aa   : > { %15009 = vmatpush3.bf16.msra.mxu1 %v17118_v30  ;;  %14215 = vmatprep.mubr.f32.mxu1 %v17074_v17 }
 0x3ab   : > { %15011 = vmatprep.subr.bf16.mxu1 %v17128_v31 }
 0x3b1   : > { %14216 = vmatmul.mubr.f32.vlgmr.msra.gmra.mrb[6].mxu1 %v17088_v37 }
 0x3b2   : > { %15013 = vmatpush3.bf16.msra.mxu1 %v17128_v31  ;;  %14222 = vmatprep.mubr.f32.mxu1 %v17084_v34 }
 0x3b3   : > { %15015 = vmatprep.subr.bf16.mxu1 %v17151_v33 }
 0x3b5   : > { %14223 = vmatmul.mubr.f32.vlgmr.msra.gmra.mrb[8].mxu1 %v17101_v42 }
 0x3b6   : > { %15017 = vmatpush3.bf16.msra.mxu1 %v17151_v33  ;;  %14229 = vmatprep.mubr.f32.mxu1 %v17074_v17 }
 0x3b7   : > { %15019 = vmatprep.subr.bf16.mxu1 %v17135_v26 }
 0x3bd   : > { %14230 = vmatmul.mubr.f32.vlgmr.msra.gmra.mrb[8].mxu1 %v17088_v37 }
 0x3be   : > { %15021 = vmatpush3.bf16.msra.mxu1 %v17135_v26  ;;  %14236 = vmatprep.mubr.f32.mxu1 %v17077_v20 }
 0x3bf   : > { %15023 = vmatprep.subr.bf16.mxu1 %v17128_v31 }
 0x3c5   : > { %14237 = vmatmul.mubr.f32.vlgmr.msra.gmra.mrb[8].mxu1 %v17091_v38 }
 0x3c6   : > { %15025 = vmatpush3.bf16.msra.mxu1 %v17128_v31  ;;  %14243 = vmatprep.mubr.f32.mxu1 %v17080_v29 }
 0x3c7   : > { %15027 = vmatprep.subr.bf16.mxu1 %v17141_v22 }
 0x3cd   : > { %14244 = vmatmul.mubr.f32.vlgmr.msra.gmra.mrb[8].mxu1 %v17094_v39 }
 0x3ce   : > { %15029 = vmatpush3.bf16.msra.mxu1 %v17141_v22  ;;  %14250 = vmatprep.mubr.f32.mxu1 %v17074_v17  ;;  %v18370_v22 = vld [vmem:[#allocation18_spill] sm:$0xff] }
 0x3cf   : > { %15031 = vmatprep.subr.bf16.mxu1 %v17128_v31 }
 0x3d5   : > { %14251 = vmatmul.mubr.f32.vlgmr.msra.gmra.mrb[8].mxu1 %v17088_v37 }
 0x3d6   : > { %15033 = vmatpush3.bf16.msra.mxu1 %v17128_v31  ;;  %14257 = vmatprep.mubr.f32.mxu1 %v17074_v17  ;;  %v18366_v31 = vld [vmem:[#allocation13_spill] sm:$0xff] }
 0x3d7   : > { %15035 = vmatprep.subr.bf16.mxu1 %v17137_v14 }
 0x3dd   : > { %14258 = vmatmul.mubr.f32.vlgmr.msra.gmra.mrb[8].mxu1 %v17088_v37 }
 0x3de   : > { %15037 = vmatpush3.bf16.msra.mxu1 %v17137_v14  ;;  %14264 = vmatprep.mubr.f32.mxu1 %v17084_v34 }
 0x3df   : > { %15039 = vmatprep.subr.bf16.mxu1 %v17159_v50 }
 0x3e1   : > { %14265 = vmatmul.mubr.f32.vlgmr.msra.gmra.mrb[10].mxu1 %v17101_v42 }
 0x3e2   : > { %15041 = vmatpush3.bf16.msra.mxu1 %v17159_v50  ;;  %14271 = vmatprep.mubr.f32.mxu1 %v17074_v17 }
 0x3e3   : > { %15043 = vmatprep.subr.bf16.mxu1 %v17144_v36 }
 0x3e9   : > { %14272 = vmatmul.mubr.f32.vlgmr.msra.gmra.mrb[10].mxu1 %v17088_v37 }
 0x3ea   : > { %15045 = vmatpush3.bf16.msra.mxu1 %v17144_v36  ;;  %14278 = vmatprep.mubr.f32.mxu1 %v17077_v20 }
 0x3eb   : > { %15047 = vmatprep.subr.bf16.mxu1 %v17137_v14 }
 0x3f1   : > { %14279 = vmatmul.mubr.f32.vlgmr.msra.gmra.mrb[10].mxu1 %v17091_v38 }
 0x3f2   : > { %15049 = vmatpush3.bf16.msra.mxu1 %v17137_v14  ;;  %14285 = vmatprep.mubr.f32.mxu1 %v17080_v29 }
 0x3f3   : > { %15051 = vmatprep.subr.bf16.mxu1 %v17153_v46 }
 0x3f9   : > { %14286 = vmatmul.mubr.f32.vlgmr.msra.gmra.mrb[10].mxu1 %v17094_v39 }
 0x3fa   : > { %15053 = vmatpush3.bf16.msra.mxu1 %v17153_v46  ;;  %14292 = vmatprep.mubr.f32.mxu1 %v17074_v17 }
 0x3fb   : > { %15055 = vmatprep.subr.bf16.mxu1 %v17137_v14 }
 0x400   : > { %v17391_v28 = vpop.f32.mrb[0].mxu1 }
 0x401   : > { %v17393_v18 = vpop.f32.mrb[1].mxu1  ;;  %14293 = vmatmul.mubr.f32.vlgmr.msra.gmra.mrb[10].mxu1 %v17088_v37 }
 0x402   : > { %15057 = vmatpush3.bf16.msra.mxu1 %v17137_v14  ;;  %14299 = vmatprep.mubr.f32.mxu1 %v17074_v17  ;;  %v18368_v14 = vld [vmem:[#allocation14_spill] sm:$0xff] }
 0x403   : > { %15059 = vmatprep.subr.bf16.mxu1 %v17148_v56 }
 0x409   : > { %14300 = vmatmul.mubr.f32.vlgmr.msra.gmra.mrb[10].mxu1 %v17088_v37 }
 0x40a   : > { %15061 = vmatpush3.bf16.msra.mxu1 %v17148_v56  ;;  %14306 = vmatprep.mubr.f32.mxu1 %v17084_v34 }
 0x40b   : > { %15063 = vmatprep.subr.bf16.mxu1 %v17171_v25 }
 0x40d   : > { %14307 = vmatmul.mubr.f32.vlgmr.msra.gmra.mrb[12].mxu1 %v17101_v42 }
 0x40e   : > { %15065 = vmatpush3.bf16.msra.mxu1 %v17171_v25  ;;  %14313 = vmatprep.mubr.f32.mxu1 %v17074_v17 }
 0x40f   : > { %15067 = vmatprep.subr.bf16.mxu1 %v17155_v3 }
 0x415   : > { %14314 = vmatmul.mubr.f32.vlgmr.msra.gmra.mrb[12].mxu1 %v17088_v37 }
 0x416   : > { %15069 = vmatpush3.bf16.msra.mxu1 %v17155_v3  ;;  %14320 = vmatprep.mubr.f32.mxu1 %v17077_v20 }
 0x417   : > { %15071 = vmatprep.subr.bf16.mxu1 %v17148_v56 }
 0x41d   : > { %14321 = vmatmul.mubr.f32.vlgmr.msra.gmra.mrb[12].mxu1 %v17091_v38 }
 0x41e   : > { %15073 = vmatpush3.bf16.msra.mxu1 %v17148_v56  ;;  %14327 = vmatprep.mubr.f32.mxu1 %v17080_v29 }
 0x41f   : > { %15075 = vmatprep.subr.bf16.mxu1 %v17161_v15 }
 0x425   : > { %14328 = vmatmul.mubr.f32.vlgmr.msra.gmra.mrb[12].mxu1 %v17094_v39 }
 0x426   : > { %15077 = vmatpush3.bf16.msra.mxu1 %v17161_v15  ;;  %14334 = vmatprep.mubr.f32.mxu1 %v17074_v17 }
 0x427   : > { %15079 = vmatprep.subr.bf16.mxu1 %v17148_v56 }
 0x42c   : > { %v17419_v60 = vpop.f32.mrb[2].mxu1 }
 0x42d   : > { %v17421_v30 = vpop.f32.mrb[3].mxu1  ;;  %14335 = vmatmul.mubr.f32.vlgmr.msra.gmra.mrb[12].mxu1 %v17088_v37  ;;  %v17555_v58 = vmul.f32 %v17419_v60, %v17419_v60 }
 0x42e   : > { %15081 = vmatpush3.bf16.msra.mxu1 %v17148_v56  ;;  %14341 = vmatprep.mubr.f32.mxu1 %v17074_v17  ;;  %v17505_v56 = vmul.f32 %v17391_v28, %v17391_v28  ;;  %v17565_v44 = vmul.f32 %v17421_v30, %v17421_v30 }
 0x42f   : > { %15083 = vmatprep.subr.bf16.mxu1 %v17157_v1 }
 0x435   : > { %14342 = vmatmul.mubr.f32.vlgmr.msra.gmra.mrb[12].mxu1 %v17088_v37 }
 0x436   : > { %15085 = vmatpush3.bf16.msra.mxu1 %v17157_v1  ;;  %14348 = vmatprep.mubr.f32.mxu1 %v17084_v34 }
 0x437   : > { %15087 = vmatprep.subr.bf16.mxu1 %v17179_v19 }
 0x439   : > { %14349 = vmatmul.mubr.f32.vlgmr.msra.gmra.mrb[14].mxu1 %v17101_v42 }
 0x43a   : > { %15089 = vmatpush3.bf16.msra.mxu1 %v17179_v19  ;;  %14355 = vmatprep.mubr.f32.mxu1 %v17074_v17  ;;  %v18373_v19 = vld [vmem:[#allocation19_spill] sm:$0xff] }
 0x43b   : > { %15091 = vmatprep.subr.bf16.mxu1 %v17164_v43 }
 0x441   : > { %14356 = vmatmul.mubr.f32.vlgmr.msra.gmra.mrb[14].mxu1 %v17088_v37 }
 0x442   : > { %15093 = vmatpush3.bf16.msra.mxu1 %v17164_v43  ;;  %14362 = vmatprep.mubr.f32.mxu1 %v17077_v20 }
 0x443   : > { %15095 = vmatprep.subr.bf16.mxu1 %v17157_v1 }
 0x449   : > { %14363 = vmatmul.mubr.f32.vlgmr.msra.gmra.mrb[14].mxu1 %v17091_v38 }
 0x44a   : > { %15097 = vmatpush3.bf16.msra.mxu1 %v17157_v1  ;;  %14369 = vmatprep.mubr.f32.mxu1 %v17080_v29 }
 0x44b   : > { %15099 = vmatprep.subr.bf16.mxu1 %v17173_v0 }
 0x451   : > { %14370 = vmatmul.mubr.f32.vlgmr.msra.gmra.mrb[14].mxu1 %v17094_v39 }
 0x452   : > { %15101 = vmatpush3.bf16.msra.mxu1 %v17173_v0  ;;  %14376 = vmatprep.mubr.f32.mxu1 %v17074_v17  ;;  %v18372_v0 = vld [vmem:[#allocation24_spill] sm:$0xff] }
 0x453   : > { %15103 = vmatprep.subr.bf16.mxu1 %v17157_v1 }
 0x458   : > { %v17447_v61 = vpop.f32.mrb[4].mxu1 }
 0x459   : > { %v17449_v48 = vpop.f32.mrb[5].mxu1  ;;  %14377 = vmatmul.mubr.f32.vlgmr.msra.gmra.mrb[14].mxu1 %v17088_v37  ;;  %v17605_v21 = vmul.f32 %v17447_v61, %v17447_v61 }
 0x45a   : > { %15105 = vmatpush3.bf16.msra.mxu1 %v17157_v1  ;;  %14383 = vmatprep.mubr.f32.mxu1 %v17074_v17  ;;  %v17515_v1 = vmul.f32 %v17393_v18, %v17393_v18 }
 0x45b   : > { %15107 = vmatprep.subr.bf16.mxu1 %v17168_v27 }
 0x461   : > { %14384 = vmatmul.mubr.f32.vlgmr.msra.gmra.mrb[14].mxu1 %v17088_v37 }
 0x462   : > { %15109 = vmatpush3.bf16.msra.mxu1 %v17168_v27  ;;  %14390 = vmatprep.mubr.f32.mxu1 %v17084_v34 }
 0x463   : > { %15111 = vmatprep.subr.bf16.mxu1 %v17191_v63 }
 0x465   : > { %14391 = vmatmul.mubr.f32.vlgmr.msra.gmra.mrb[16].mxu1 %v17101_v42 }
 0x466   : > { %15113 = vmatpush3.bf16.msra.mxu1 %v17191_v63  ;;  %14397 = vmatprep.mubr.f32.mxu1 %v17074_v17  ;;  %v18374_v63 = vld [vmem:[#allocation21_spill] sm:$0xff] }
 0x467   : > { %15115 = vmatprep.subr.bf16.mxu1 %v18366_v31 }
 0x46d   : > { %14398 = vmatmul.mubr.f32.vlgmr.msra.gmra.mrb[16].mxu1 %v17088_v37 }
 0x46e   : > { %15117 = vmatpush3.bf16.msra.mxu1 %v18366_v31  ;;  %14404 = vmatprep.mubr.f32.mxu1 %v17077_v20 }
 0x46f   : > { %15119 = vmatprep.subr.bf16.mxu1 %v17168_v27 }
 0x475   : > { %14405 = vmatmul.mubr.f32.vlgmr.msra.gmra.mrb[16].mxu1 %v17091_v38 }
 0x476   : > { %15121 = vmatpush3.bf16.msra.mxu1 %v17168_v27  ;;  %14411 = vmatprep.mubr.f32.mxu1 %v17080_v29 }
 0x477   : > { %15123 = vmatprep.subr.bf16.mxu1 %v18367_v4 }
 0x47d   : > { %14412 = vmatmul.mubr.f32.vlgmr.msra.gmra.mrb[16].mxu1 %v17094_v39 }
 0x47e   : > { %15125 = vmatpush3.bf16.msra.mxu1 %v18367_v4  ;;  %14418 = vmatprep.mubr.f32.mxu1 %v17074_v17  ;;  %v18379_v4 = vld [vmem:[#allocation23_spill] sm:$0xff] }
 0x47f   : > { %15127 = vmatprep.subr.bf16.mxu1 %v17168_v27 }
 0x484   : > { %v17475_v32 = vpop.f32.mrb[6].mxu1 }
 0x485   : > { %v17477_v26 = vpop.f32.mrb[7].mxu1  ;;  %14419 = vmatmul.mubr.f32.vlgmr.msra.gmra.mrb[16].mxu1 %v17088_v37 }
 0x486   : > { %15129 = vmatpush3.bf16.msra.mxu1 %v17168_v27  ;;  %14425 = vmatprep.mubr.f32.mxu1 %v17074_v17  ;;  %v18371_v27 = vld [vmem:[#allocation17_spill] sm:$0xff] }
 0x487   : > { %15131 = vmatprep.subr.bf16.mxu1 %v18368_v14 }
 0x48d   : > { %14426 = vmatmul.mubr.f32.vlgmr.msra.gmra.mrb[16].mxu1 %v17088_v37 }
 0x48e   : > { %15133 = vmatpush3.bf16.msra.mxu1 %v18368_v14  ;;  %14432 = vmatprep.mubr.f32.mxu1 %v17084_v34 }
 0x48f   : > { %15135 = vmatprep.subr.bf16.mxu1 %v17199_v55 }
 0x491   : > { %14433 = vmatmul.mubr.f32.vlgmr.msra.gmra.mrb[18].mxu1 %v17101_v42 }
 0x492   : > { %15137 = vmatpush3.bf16.msra.mxu1 %v17199_v55  ;;  %14439 = vmatprep.mubr.f32.mxu1 %v17074_v17 }
 0x493   : > { %15139 = vmatprep.subr.bf16.mxu1 %v18369_v52 }
 0x499   : > { %14440 = vmatmul.mubr.f32.vlgmr.msra.gmra.mrb[18].mxu1 %v17088_v37 }
 0x49a   : > { %15141 = vmatpush3.bf16.msra.mxu1 %v18369_v52  ;;  %14446 = vmatprep.mubr.f32.mxu1 %v17077_v20  ;;  %v18381_v52 = vld [vmem:[#allocation32_spill] sm:$0xff] }
 0x49b   : > { %15143 = vmatprep.subr.bf16.mxu1 %v18368_v14 }
 0x4a1   : > { %14447 = vmatmul.mubr.f32.vlgmr.msra.gmra.mrb[18].mxu1 %v17091_v38 }
 0x4a2   : > { %15145 = vmatpush3.bf16.msra.mxu1 %v18368_v14  ;;  %14453 = vmatprep.mubr.f32.mxu1 %v17080_v29 }
 0x4a3   : > { %15147 = vmatprep.subr.bf16.mxu1 %v18370_v22 }
 0x4a9   : > { %14454 = vmatmul.mubr.f32.vlgmr.msra.gmra.mrb[18].mxu1 %v17094_v39 }
 0x4aa   : > { %15149 = vmatpush3.bf16.msra.mxu1 %v18370_v22  ;;  %14460 = vmatprep.mubr.f32.mxu1 %v17074_v17  ;;  %v17655_v22 = vmul.f32 %v17475_v32, %v17475_v32 }
 0x4ab   : > { %15151 = vmatprep.subr.bf16.mxu1 %v18368_v14 }
 0x4b0   : > { %v14259_v36 = vpop.f32.mrb[8].mxu1 }
 0x4b1   : > { %v17507_v33 = vmul.f32 %v14259_v36, %v14259_v36  ;;  %v17510_v46 = vmul.f32 %v14259_v36, %v17391_v28  ;;  %v5090_v3 = vpop.f32.mrb[9].mxu1  ;;  %14461 = vmatmul.mubr.f32.vlgmr.msra.gmra.mrb[18].mxu1 %v17088_v37 }
 0x4b2   : > { %v17517_v50 = vmul.f32 %v5090_v3, %v5090_v3  ;;  %v17520_v15 = vmul.f32 %v5090_v3, %v17393_v18  ;;  %15153 = vmatpush3.bf16.msra.mxu1 %v18368_v14  ;;  %14467 = vmatprep.mubr.f32.mxu1 %v17074_v17 }
 0x4b3   : > { %v17526_v43 = vadd.f32 %v17507_v33, %v17505_v56  ;;  %15155 = vmatprep.subr.bf16.mxu1 %v18371_v27 }
 0x4b4   : > { %v17531_v25 = vadd.f32 %v17517_v50, %v17515_v1 }
 0x4b9   : > { %14468 = vmatmul.mubr.f32.vlgmr.msra.gmra.mrb[18].mxu1 %v17088_v37 }
 0x4ba   : > { %15157 = vmatpush3.bf16.msra.mxu1 %v18371_v27  ;;  %14474 = vmatprep.mubr.f32.mxu1 %v17084_v34 }
 0x4bb   : > { %15159 = vmatprep.subr.bf16.mxu1 %v18372_v0 }
 0x4bd   : > { %14475 = vmatmul.mubr.f32.vlgmr.msra.gmra.mrb[20].mxu1 %v17101_v42 }
 0x4be   : > { %15161 = vmatpush3.bf16.msra.mxu1 %v18372_v0  ;;  %14481 = vmatprep.mubr.f32.mxu1 %v17074_v17  ;;  %v17665_v0 = vmul.f32 %v17477_v26, %v17477_v26 }
 0x4bf   : > { %15163 = vmatprep.subr.bf16.mxu1 %v18373_v19 }
 0x4c5   : > { %14482 = vmatmul.mubr.f32.vlgmr.msra.gmra.mrb[20].mxu1 %v17088_v37 }
 0x4c6   : > { %15165 = vmatpush3.bf16.msra.mxu1 %v18373_v19  ;;  %14488 = vmatprep.mubr.f32.mxu1 %v17077_v20 }
 0x4c7   : > { %15167 = vmatprep.subr.bf16.mxu1 %v18371_v27 }
 0x4cd   : > { %14489 = vmatmul.mubr.f32.vlgmr.msra.gmra.mrb[20].mxu1 %v17091_v38 }
 0x4ce   : > { %15169 = vmatpush3.bf16.msra.mxu1 %v18371_v27  ;;  %14495 = vmatprep.mubr.f32.mxu1 %v17080_v29 }
 0x4cf   : > { %15171 = vmatprep.subr.bf16.mxu1 %v18374_v63 }
 0x4d5   : > { %14496 = vmatmul.mubr.f32.vlgmr.msra.gmra.mrb[20].mxu1 %v17094_v39 }
 0x4d6   : > { %15173 = vmatpush3.bf16.msra.mxu1 %v18374_v63  ;;  %14502 = vmatprep.mubr.f32.mxu1 %v17074_v17 }
 0x4d7   : > { %15175 = vmatprep.subr.bf16.mxu1 %v18371_v27 }
 0x4dc   : > { %v14301_v55 = vpop.f32.mrb[10].mxu1 }
 0x4dd   : > { %v17557_v62 = vmul.f32 %v14301_v55, %v14301_v55  ;;  %v17560_v47 = vmul.f32 %v14301_v55, %v17419_v60  ;;  %v5592_v16 = vpop.f32.mrb[11].mxu1  ;;  %14503 = vmatmul.mubr.f32.vlgmr.msra.gmra.mrb[20].mxu1 %v17088_v37  ;;  %v17615_v60 = vmul.f32 %v17449_v48, %v17449_v48  ;;  %v18383_v55 = vld [vmem:[#allocation27_spill] sm:$0xff] }
 0x4de   : > { %v17567_v40 = vmul.f32 %v5592_v16, %v5592_v16  ;;  %v17570_v11 = vmul.f32 %v5592_v16, %v17421_v30  ;;  %15177 = vmatpush3.bf16.msra.mxu1 %v18371_v27  ;;  %14509 = vmatprep.mubr.f32.mxu1 %v17074_v17 }
 0x4df   : > { %v17576_v53 = vadd.f32 %v17557_v62, %v17555_v58  ;;  %15179 = vmatprep.subr.bf16.mxu1 %v18375_v2 }
 0x4e0   : > { %v17581_v12 = vadd.f32 %v17567_v40, %v17565_v44 }
 0x4e5   : > { %14510 = vmatmul.mubr.f32.vlgmr.msra.gmra.mrb[20].mxu1 %v17088_v37 }
 0x4e6   : > { %15181 = vmatpush3.bf16.msra.mxu1 %v18375_v2  ;;  %14516 = vmatprep.mubr.f32.mxu1 %v17084_v34 }
 0x4e7   : > { %15183 = vmatprep.subr.bf16.mxu1 %v18376_v57 }
 0x4e9   : > { %14517 = vmatmul.mubr.f32.vlgmr.msra.gmra.mrb[22].mxu1 %v17101_v42 }
 0x4ea   : > { %15185 = vmatpush3.bf16.msra.mxu1 %v18376_v57  ;;  %14523 = vmatprep.mubr.f32.mxu1 %v17074_v17  ;;  %v18386_v57 = vld [vmem:[#allocation36_spill] sm:$0xff] }
 0x4eb   : > { %15187 = vmatprep.subr.bf16.mxu1 %v18377_v54 }
 0x4f1   : > { %14524 = vmatmul.mubr.f32.vlgmr.msra.gmra.mrb[22].mxu1 %v17088_v37 }
 0x4f2   : > { %15189 = vmatpush3.bf16.msra.mxu1 %v18377_v54  ;;  %14530 = vmatprep.mubr.f32.mxu1 %v17077_v20 }
 0x4f3   : > { %15191 = vmatprep.subr.bf16.mxu1 %v18375_v2 }
 0x4f9   : > { %14531 = vmatmul.mubr.f32.vlgmr.msra.gmra.mrb[22].mxu1 %v17091_v38 }
 0x4fa   : > { %15193 = vmatpush3.bf16.msra.mxu1 %v18375_v2  ;;  %14537 = vmatprep.mubr.f32.mxu1 %v17080_v29 }
 0x4fb   : > { %15195 = vmatprep.subr.bf16.mxu1 %v18378_v10 }
 0x501   : > { %14538 = vmatmul.mubr.f32.vlgmr.msra.gmra.mrb[22].mxu1 %v17094_v39 }
 0x502   : > { %15197 = vmatpush3.bf16.msra.mxu1 %v18378_v10  ;;  %14544 = vmatprep.mubr.f32.mxu1 %v17074_v17 }
 0x503   : > { %15199 = vmatprep.subr.bf16.mxu1 %v18375_v2 }
 0x508   : > { %v14343_v35 = vpop.f32.mrb[12].mxu1 }
 0x509   : > { %v17607_v41 = vmul.f32 %v14343_v35, %v14343_v35  ;;  %v17610_v28 = vmul.f32 %v14343_v35, %v17447_v61  ;;  %v6094_v18 = vpop.f32.mrb[13].mxu1  ;;  %14545 = vmatmul.mubr.f32.vlgmr.msra.gmra.mrb[22].mxu1 %v17088_v37 }
 0x50a   : > { %v17617_v30 = vmul.f32 %v6094_v18, %v6094_v18  ;;  %v17620_v31 = vmul.f32 %v6094_v18, %v17449_v48  ;;  %15201 = vmatpush3.bf16.msra.mxu1 %v18375_v2  ;;  %14551 = vmatprep.mubr.f32.mxu1 %v17074_v17  ;;  %v18380_v48 = vld [vmem:[#allocation26_spill] sm:$0xff] }
 0x50b   : > { %v17626_v61 = vadd.f32 %v17607_v41, %v17605_v21  ;;  %15203 = vmatprep.subr.bf16.mxu1 %v18379_v4  ;;  %v18385_v2 = vld [vmem:[#allocation34_spill] sm:$0xff] }
 0x50c   : > { %v17631_v14 = vadd.f32 %v17617_v30, %v17615_v60 }
 0x511   : > { %14552 = vmatmul.mubr.f32.vlgmr.msra.gmra.mrb[22].mxu1 %v17088_v37 }
 0x512   : > { %15205 = vmatpush3.bf16.msra.mxu1 %v18379_v4  ;;  %14558 = vmatprep.mubr.f32.mxu1 %v17084_v34 }
 0x513   : > { %15207 = vmatprep.subr.bf16.mxu1 %v17231_v45 }
 0x515   : > { %14559 = vmatmul.mubr.f32.vlgmr.msra.gmra.mrb[24].mxu1 %v17101_v42 }
 0x516   : > { %15209 = vmatpush3.bf16.msra.mxu1 %v17231_v45  ;;  %14565 = vmatprep.mubr.f32.mxu1 %v17074_v17 }
 0x517   : > { %15211 = vmatprep.subr.bf16.mxu1 %v18380_v48 }
 0x51d   : > { %14566 = vmatmul.mubr.f32.vlgmr.msra.gmra.mrb[24].mxu1 %v17088_v37 }
 0x51e   : > { %15213 = vmatpush3.bf16.msra.mxu1 %v18380_v48  ;;  %14572 = vmatprep.mubr.f32.mxu1 %v17077_v20  ;;  %v18388_v48 = vld [vmem:[#allocation58_spill] sm:$0xff] }
 0x51f   : > { %15215 = vmatprep.subr.bf16.mxu1 %v18379_v4 }
 0x525   : > { %14573 = vmatmul.mubr.f32.vlgmr.msra.gmra.mrb[24].mxu1 %v17091_v38 }
 0x526   : > { %15217 = vmatpush3.bf16.msra.mxu1 %v18379_v4  ;;  %14579 = vmatprep.mubr.f32.mxu1 %v17080_v29 }
 0x527   : > { %15219 = vmatprep.subr.bf16.mxu1 %v18381_v52 }
 0x52d   : > { %14580 = vmatmul.mubr.f32.vlgmr.msra.gmra.mrb[24].mxu1 %v17094_v39 }
 0x52e   : > { %15221 = vmatpush3.bf16.msra.mxu1 %v18381_v52  ;;  %14586 = vmatprep.mubr.f32.mxu1 %v17074_v17  ;;  %v18389_v52 = vld [vmem:[#allocation39_spill] sm:$0xff] }
 0x52f   : > { %15223 = vmatprep.subr.bf16.mxu1 %v18379_v4 }
 0x534   : > { %v14385_v45 = vpop.f32.mrb[14].mxu1 }
 0x535   : > { %v17657_v36 = vmul.f32 %v14385_v45, %v14385_v45  ;;  %v17660_v3 = vmul.f32 %v14385_v45, %v17475_v32  ;;  %v6596_v27 = vpop.f32.mrb[15].mxu1  ;;  %14587 = vmatmul.mubr.f32.vlgmr.msra.gmra.mrb[24].mxu1 %v17088_v37  ;;  %v18390_v45 = vld [vmem:[#allocation44_spill] sm:$0xff] }
 0x536   : > { %v17667_v19 = vmul.f32 %v6596_v27, %v6596_v27  ;;  %v17670_v63 = vmul.f32 %v6596_v27, %v17477_v26  ;;  %15225 = vmatpush3.bf16.msra.mxu1 %v18379_v4  ;;  %14593 = vmatprep.mubr.f32.mxu1 %v17074_v17  ;;  %v18384_v26 = vld [vmem:[#allocation43_spill] sm:$0xff] }
 0x537   : > { %v17676_v32 = vadd.f32 %v17657_v36, %v17655_v22  ;;  %15227 = vmatprep.subr.bf16.mxu1 %v18383_v55  ;;  %v18387_v4 = vld [vmem:[#allocation35_spill] sm:$0xff] }
 0x538   : > { %18382 = vst [vmem:[#allocation38_spill] sm:$0xff] %v17670_v63  ;;  %v17681_v16 = vadd.f32 %v17667_v19, %v17665_v0  ;;  %v12726_v63 = vadd.f32 0.0001, %v17531_v25 }
 0x53d   : > { %14594 = vmatmul.mubr.f32.vlgmr.msra.gmra.mrb[24].mxu1 %v17088_v37 }
 0x53e   : > { %15229 = vmatpush3.bf16.msra.mxu1 %v18383_v55  ;;  %14600 = vmatprep.mubr.f32.mxu1 %v17084_v34 }
 0x53f   : > { %15231 = vmatprep.subr.bf16.mxu1 %v18384_v26 }
 0x541   : > { %14601 = vmatmul.mubr.f32.vlgmr.msra.gmra.mrb[26].mxu1 %v17101_v42 }
 0x542   : > { %15233 = vmatpush3.bf16.msra.mxu1 %v18384_v26  ;;  %14607 = vmatprep.mubr.f32.mxu1 %v17074_v17 }
 0x543   : > { %15235 = vmatprep.subr.bf16.mxu1 %v18385_v2 }
 0x549   : > { %14608 = vmatmul.mubr.f32.vlgmr.msra.gmra.mrb[26].mxu1 %v17088_v37 }
 0x54a   : > { %15237 = vmatpush3.bf16.msra.mxu1 %v18385_v2  ;;  %14614 = vmatprep.mubr.f32.mxu1 %v17077_v20  ;;  %v18396_v2 = vld [vmem:[#allocation29_spill] sm:$0xff] }
 0x54b   : > { %15239 = vmatprep.subr.bf16.mxu1 %v18383_v55 }
 0x551   : > { %14615 = vmatmul.mubr.f32.vlgmr.msra.gmra.mrb[26].mxu1 %v17091_v38 }
 0x552   : > { %15241 = vmatpush3.bf16.msra.mxu1 %v18383_v55  ;;  %14621 = vmatprep.mubr.f32.mxu1 %v17080_v29 }
 0x553   : > { %15243 = vmatprep.subr.bf16.mxu1 %v18386_v57 }
 0x559   : > { %14622 = vmatmul.mubr.f32.vlgmr.msra.gmra.mrb[26].mxu1 %v17094_v39 }
 0x55a   : > { %15245 = vmatpush3.bf16.msra.mxu1 %v18386_v57  ;;  %14628 = vmatprep.mubr.f32.mxu1 %v17074_v17  ;;  %v18391_v57 = vld [vmem:[#allocation40_spill] sm:$0xff] }
 0x55b   : > { %15247 = vmatprep.subr.bf16.mxu1 %v18383_v55 }
 0x560   : > { %v17703_v54 = vpop.f32.mrb[16].mxu1 }
 0x561   : > { %v12655_v10 = vsub.f32 %v17703_v54, %v17505_v56  ;;  %v17707_v35 = vpop.f32.mrb[17].mxu1  ;;  %14629 = vmatmul.mubr.f32.vlgmr.msra.gmra.mrb[26].mxu1 %v17088_v37  ;;  %v18399_v56 = vld [vmem:[#allocation37_spill] sm:$0xff] }
 0x562   : > { %v12654_v18 = vsub.f32 %v17707_v35, %v17515_v1  ;;  %15249 = vmatpush3.bf16.msra.mxu1 %v18383_v55  ;;  %14635 = vmatprep.mubr.f32.mxu1 %v17074_v17 }
 0x563   : > { %15251 = vmatprep.subr.bf16.mxu1 %v18387_v4 }
 0x569   : > { %14636 = vmatmul.mubr.f32.vlgmr.msra.gmra.mrb[26].mxu1 %v17088_v37 }
 0x56a   : > { %15253 = vmatpush3.bf16.msra.mxu1 %v18387_v4  ;;  %14642 = vmatprep.mubr.f32.mxu1 %v17084_v34 }
 0x56b   : > { %15255 = vmatprep.subr.bf16.mxu1 %v18388_v48 }
 0x56d   : > { %14643 = vmatmul.mubr.f32.vlgmr.msra.gmra.mrb[28].mxu1 %v17101_v42 }
 0x56e   : > { %15257 = vmatpush3.bf16.msra.mxu1 %v18388_v48  ;;  %14649 = vmatprep.mubr.f32.mxu1 %v17074_v17  ;;  %v18392_v48 = vld [vmem:[#allocation31_spill] sm:$0xff] }
 0x56f   : > { %15259 = vmatprep.subr.bf16.mxu1 %v18389_v52 }
 0x575   : > { %14650 = vmatmul.mubr.f32.vlgmr.msra.gmra.mrb[28].mxu1 %v17088_v37 }
 0x576   : > { %15261 = vmatpush3.bf16.msra.mxu1 %v18389_v52  ;;  %14656 = vmatprep.mubr.f32.mxu1 %v17077_v20  ;;  %v18393_v52 = vld [vmem:[#allocation48_spill] sm:$0xff] }
 0x577   : > { %15263 = vmatprep.subr.bf16.mxu1 %v18387_v4 }
 0x57d   : > { %14657 = vmatmul.mubr.f32.vlgmr.msra.gmra.mrb[28].mxu1 %v17091_v38 }
 0x57e   : > { %15265 = vmatpush3.bf16.msra.mxu1 %v18387_v4  ;;  %14663 = vmatprep.mubr.f32.mxu1 %v17080_v29 }
 0x57f   : > { %15267 = vmatprep.subr.bf16.mxu1 %v18390_v45 }
 0x585   : > { %14664 = vmatmul.mubr.f32.vlgmr.msra.gmra.mrb[28].mxu1 %v17094_v39 }
 0x586   : > { %15269 = vmatpush3.bf16.msra.mxu1 %v18390_v45  ;;  %14670 = vmatprep.mubr.f32.mxu1 %v17074_v17 }
 0x587   : > { %15271 = vmatprep.subr.bf16.mxu1 %v18387_v4 }
 0x58c   : > { %v17735_v27 = vpop.f32.mrb[18].mxu1 }
 0x58d   : > { %v17739_v26 = vpop.f32.mrb[19].mxu1  ;;  %14671 = vmatmul.mubr.f32.vlgmr.msra.gmra.mrb[28].mxu1 %v17088_v37 }
 0x58e   : > { %15273 = vmatpush3.bf16.msra.mxu1 %v18387_v4  ;;  %14677 = vmatprep.mubr.f32.mxu1 %v17074_v17  ;;  %v18394_v4 = vld [vmem:[#allocation61_spill] sm:$0xff]  ;;  %v18401_v54 = vsub.f32 %v17739_v26, %v17565_v44  ;;  %v12730_v44 = vadd.f32 0.0001, %v17631_v14  ;;  %v12733_v14 = vadd.f32 0.0001, %v17676_v32  ;;  %v12678_v32 = vmul.f32 2.0, %v17520_v15 }
 0x58f   : > { %15275 = vmatprep.subr.bf16.mxu1 %v18391_v57 }
 0x595   : > { %14678 = vmatmul.mubr.f32.vlgmr.msra.gmra.mrb[28].mxu1 %v17088_v37 }
 0x596   : > { %15277 = vmatpush3.bf16.msra.mxu1 %v18391_v57  ;;  %14684 = vmatprep.mubr.f32.mxu1 %v17084_v34 }
 0x597   : > { %15279 = vmatprep.subr.bf16.mxu1 %v18392_v48 }
 0x599   : > { %14685 = vmatmul.mubr.f32.vlgmr.msra.gmra.mrb[30].mxu1 %v17101_v42 }
 0x59a   : > { %15281 = vmatpush3.bf16.msra.mxu1 %v18392_v48  ;;  %14691 = vmatprep.mubr.f32.mxu1 %v17074_v17 }
 0x59b   : > { %15283 = vmatprep.subr.bf16.mxu1 %v18393_v52 }
 0x5a1   : > { %14692 = vmatmul.mubr.f32.vlgmr.msra.gmra.mrb[30].mxu1 %v17088_v37 }
 0x5a2   : > { %15285 = vmatpush3.bf16.msra.mxu1 %v18393_v52  ;;  %14698 = vmatprep.mubr.f32.mxu1 %v17077_v20 }
 0x5a3   : > { %15287 = vmatprep.subr.bf16.mxu1 %v18391_v57 }
 0x5a9   : > { %14699 = vmatmul.mubr.f32.vlgmr.msra.gmra.mrb[30].mxu1 %v17091_v38 }
 0x5aa   : > { %15289 = vmatpush3.bf16.msra.mxu1 %v18391_v57  ;;  %14705 = vmatprep.mubr.f32.mxu1 %v17080_v29 }
 0x5ab   : > { %15291 = vmatprep.subr.bf16.mxu1 %v18394_v4 }
 0x5b1   : > { %14706 = vmatmul.mubr.f32.vlgmr.msra.gmra.mrb[30].mxu1 %v17094_v39 }
 0x5b2   : > { %15293 = vmatpush3.bf16.msra.mxu1 %v18394_v4  ;;  %14712 = vmatprep.mubr.f32.mxu1 %v17074_v17  ;;  %v18395_v4 = vld [vmem:[#allocation51_spill] sm:$0xff] }
 0x5b3   : > { %15295 = vmatprep.subr.bf16.mxu1 %v18391_v57 }
 0x5b8   : > { %v17767_v45 = vpop.f32.mrb[20].mxu1 }
 0x5b9   : > { %v17771_v52 = vpop.f32.mrb[21].mxu1  ;;  %14713 = vmatmul.mubr.f32.vlgmr.msra.gmra.mrb[30].mxu1 %v17088_v37 }
 0x5ba   : > { %15297 = vmatpush3.bf16.msra.mxu1 %v18391_v57  ;;  %14719 = vmatprep.mubr.f32.mxu1 %v17074_v17  ;;  %v18397_v57 = vld [vmem:[#allocation33_spill] sm:$0xff] }
 0x5bb   : > { %15299 = vmatprep.subr.bf16.mxu1 %v18395_v4 }
 0x5c1   : > { %14720 = vmatmul.mubr.f32.vlgmr.msra.gmra.mrb[30].mxu1 %v17088_v37 }
 0x5c2   : > { %15301 = vmatpush3.bf16.msra.mxu1 %v18395_v4  ;;  %14726 = vmatprep.mubr.f32.mxu1 %v17084_v34 }
 0x5c3   : > { %15303 = vmatprep.subr.bf16.mxu1 %v17271_v13 }
 0x5c5   : > { %14727 = vmatmul.mubr.f32.vlgmr.msra.gmra.mrb[32].mxu1 %v17101_v42 }
 0x5c6   : > { %15305 = vmatpush3.bf16.msra.mxu1 %v17271_v13  ;;  %14733 = vmatprep.mubr.f32.mxu1 %v17074_v17 }
 0x5c7   : > { %15307 = vmatprep.subr.bf16.mxu1 %v18396_v2 }
 0x5cd   : > { %14734 = vmatmul.mubr.f32.vlgmr.msra.gmra.mrb[32].mxu1 %v17088_v37 }
 0x5ce   : > { %15309 = vmatpush3.bf16.msra.mxu1 %v18396_v2  ;;  %14740 = vmatprep.mubr.f32.mxu1 %v17077_v20 }
 0x5cf   : > { %15311 = vmatprep.subr.bf16.mxu1 %v18395_v4 }
 0x5d5   : > { %14741 = vmatmul.mubr.f32.vlgmr.msra.gmra.mrb[32].mxu1 %v17091_v38 }
 0x5d6   : > { %15313 = vmatpush3.bf16.msra.mxu1 %v18395_v4  ;;  %14747 = vmatprep.mubr.f32.mxu1 %v17080_v29 }
 0x5d7   : > { %15315 = vmatprep.subr.bf16.mxu1 %v18397_v57 }
 0x5dd   : > { %14748 = vmatmul.mubr.f32.vlgmr.msra.gmra.mrb[32].mxu1 %v17094_v39 }
 0x5de   : > { %15317 = vmatpush3.bf16.msra.mxu1 %v18397_v57  ;;  %14754 = vmatprep.mubr.f32.mxu1 %v17074_v17  ;;  %v18398_v57 = vld [vmem:[#allocation30_spill] sm:$0xff] }
 0x5df   : > { %15319 = vmatprep.subr.bf16.mxu1 %v18395_v4 }
 0x5e4   : > { %v17799_v13 = vpop.f32.mrb[22].mxu1 }
 0x5e5   : > { %v17803_v48 = vpop.f32.mrb[23].mxu1  ;;  %14755 = vmatmul.mubr.f32.vlgmr.msra.gmra.mrb[32].mxu1 %v17088_v37 }
 0x5e6   : > { %15321 = vmatpush3.bf16.msra.mxu1 %v18395_v4  ;;  %14761 = vmatprep.mubr.f32.mxu1 %v17074_v17 }
 0x5e7   : > { %15323 = vmatprep.subr.bf16.mxu1 %v18398_v57 }
 0x5ed   : > { %14762 = vmatmul.mubr.f32.vlgmr.msra.gmra.mrb[32].mxu1 %v17088_v37 }
 0x5ee   : > { %15325 = vmatpush3.bf16.msra.mxu1 %v18398_v57  ;;  %14768 = vmatprep.mubr.f32.mxu1 %v17084_v34 }
 0x5ef   : > { %15327 = vmatprep.subr.bf16.mxu1 %v17283_v7 }
 0x5f1   : > { %14769 = vmatmul.mubr.f32.vlgmr.msra.gmra.mrb[34].mxu1 %v17101_v42 }
 0x5f2   : > { %15329 = vmatpush3.bf16.msra.mxu1 %v17283_v7  ;;  %14775 = vmatprep.mubr.f32.mxu1 %v17074_v17 }
 0x5f3   : > { %15331 = vmatprep.subr.bf16.mxu1 %v17267_v24 }
 0x5f9   : > { %14776 = vmatmul.mubr.f32.vlgmr.msra.gmra.mrb[34].mxu1 %v17088_v37 }
 0x5fa   : > { %15333 = vmatpush3.bf16.msra.mxu1 %v17267_v24  ;;  %14782 = vmatprep.mubr.f32.mxu1 %v17077_v20 }
 0x5fb   : > { %15335 = vmatprep.subr.bf16.mxu1 %v18398_v57 }
 0x601   : > { %14783 = vmatmul.mubr.f32.vlgmr.msra.gmra.mrb[34].mxu1 %v17091_v38 }
 0x602   : > { %15337 = vmatpush3.bf16.msra.mxu1 %v18398_v57  ;;  %14789 = vmatprep.mubr.f32.mxu1 %v17080_v29 }
 0x603   : > { %15339 = vmatprep.subr.bf16.mxu1 %v17273_v23 }
 0x609   : > { %14790 = vmatmul.mubr.f32.vlgmr.msra.gmra.mrb[34].mxu1 %v17094_v39 }
 0x60a   : > { %15341 = vmatpush3.bf16.msra.mxu1 %v17273_v23  ;;  %14796 = vmatprep.mubr.f32.mxu1 %v17074_v17 }
 0x60b   : > { %15343 = vmatprep.subr.bf16.mxu1 %v18398_v57 }
 0x610   : > { %v14595_v24 = vpop.f32.mrb[24].mxu1 }
 0x611   : > { %v12663_v7 = vsub.f32 %v14595_v24, %v17507_v33  ;;  %v9106_v4 = vpop.f32.mrb[25].mxu1  ;;  %14797 = vmatmul.mubr.f32.vlgmr.msra.gmra.mrb[34].mxu1 %v17088_v37  ;;  %v12727_v33 = vadd.f32 0.0001, %v17526_v43 }
 0x612   : > { %v12662_v55 = vsub.f32 %v9106_v4, %v17517_v50  ;;  %15345 = vmatpush3.bf16.msra.mxu1 %v18398_v57  ;;  %14803 = vmatprep.mubr.f32.mxu1 %v17074_v17 }
 0x613   : > { %v12735_v23 = vadd.f32 %v12663_v7, %v12655_v10  ;;  %15347 = vmatprep.subr.bf16.mxu1 %v17269_v6 }
 0x614   : > { %v12734_v2 = vadd.f32 %v12662_v55, %v12654_v18  ;;  %v12728_v18 = vadd.f32 0.0001, %v17581_v12 }
 0x615   : > { %v12743_v24 = vadd.f32 0.0009, %v12735_v23 }
 0x616   : > { %v12742_v50 = vadd.f32 0.0009, %v12734_v2 }
 0x617   : > { %v17845_v4 = vmul.f32 %v12743_v24, %v12727_v33  ;;  %v12686_v24 = vadd.f32 0.0001, %v12678_v32 }
 0x618   : > { %v17847_v57 = vmul.f32 %v12742_v50, %v12726_v63  ;;  %v18400_v63 = vsub.f32 %v17735_v27, %v17555_v58 }
 0x619   : > { %14804 = vmatmul.mubr.f32.vlgmr.msra.gmra.mrb[34].mxu1 %v17088_v37  ;;  %15861 = vrcp.f32 %v17845_v4 }
 0x61a   : > { %15349 = vmatpush3.bf16.msra.mxu1 %v17269_v6  ;;  %14810 = vmatprep.mubr.f32.mxu1 %v17084_v34  ;;  %15863 = vrcp.f32 %v17847_v57 }
 0x61b   : > { %15351 = vmatprep.subr.bf16.mxu1 %v17289_v9 }
 0x61d   : > { %14811 = vmatmul.mubr.f32.vlgmr.msra.gmra.mrb[36].mxu1 %v17101_v42 }
 0x61e   : > { %15353 = vmatpush3.bf16.msra.mxu1 %v17289_v9  ;;  %14817 = vmatprep.mubr.f32.mxu1 %v17074_v17 }
 0x61f   : > { %15355 = vmatprep.subr.bf16.mxu1 %v18399_v56 }
 0x623   : > { %v15862_v4 = vpop.eup %15861 }
 0x624   : > { %v15864_v57 = vpop.eup %15863 }
 0x625   : > { %14818 = vmatmul.mubr.f32.vlgmr.msra.gmra.mrb[36].mxu1 %v17088_v37 }
 0x626   : > { %15357 = vmatpush3.bf16.msra.mxu1 %v18399_v56  ;;  %14824 = vmatprep.mubr.f32.mxu1 %v17077_v20 }
 0x627   : > { %15359 = vmatprep.subr.bf16.mxu1 %v17269_v6 }
 0x62d   : > { %14825 = vmatmul.mubr.f32.vlgmr.msra.gmra.mrb[36].mxu1 %v17091_v38 }
 0x62e   : > { %15361 = vmatpush3.bf16.msra.mxu1 %v17269_v6  ;;  %14831 = vmatprep.mubr.f32.mxu1 %v17080_v29 }
 0x62f   : > { %15363 = vmatprep.subr.bf16.mxu1 %v17285_v5 }
 0x635   : > { %14832 = vmatmul.mubr.f32.vlgmr.msra.gmra.mrb[36].mxu1 %v17094_v39 }
 0x636   : > { %15365 = vmatpush3.bf16.msra.mxu1 %v17285_v5  ;;  %14838 = vmatprep.mubr.f32.mxu1 %v17074_v17 }
 0x637   : > { %15367 = vmatprep.subr.bf16.mxu1 %v17269_v6 }
 0x63c   : > { %v14637_v9 = vpop.f32.mrb[26].mxu1 }
 0x63d   : > { %v12665_v1 = vsub.f32 %v14637_v9, %v17557_v62  ;;  %v9608_v43 = vpop.f32.mrb[27].mxu1  ;;  %14839 = vmatmul.mubr.f32.vlgmr.msra.gmra.mrb[36].mxu1 %v17088_v37  ;;  %v12729_v62 = vadd.f32 0.0001, %v17576_v53 }
 0x63e   : > { %v12664_v25 = vsub.f32 %v9608_v43, %v17567_v40  ;;  %15369 = vmatpush3.bf16.msra.mxu1 %v17269_v6  ;;  %14845 = vmatprep.mubr.f32.mxu1 %v17074_v17 }
 0x63f   : > { %v12737_v5 = vadd.f32 %v12665_v1, %v18400_v63  ;;  %15371 = vmatprep.subr.bf16.mxu1 %v17280_v49  ;;  %v12681_v63 = vmul.f32 2.0, %v17560_v47 }
 0x640   : > { %v12736_v10 = vadd.f32 %v12664_v25, %v18401_v54 }
 0x641   : > { %v12745_v35 = vadd.f32 0.0009, %v12737_v5 }
 0x642   : > { %v12744_v40 = vadd.f32 0.0009, %v12736_v10  ;;  %v12680_v10 = vmul.f32 2.0, %v17570_v11 }
 0x643   : > { %v17883_v55 = vmul.f32 %v12745_v35, %v12729_v62 }
 0x644   : > { %v17885_v6 = vmul.f32 %v12744_v40, %v12728_v18  ;;  %v12689_v40 = vadd.f32 0.0001, %v12681_v63 }
 0x645   : > { %14846 = vmatmul.mubr.f32.vlgmr.msra.gmra.mrb[36].mxu1 %v17088_v37  ;;  %15865 = vrcp.f32 %v17883_v55 }
 0x646   : > { %15373 = vmatpush3.bf16.msra.mxu1 %v17280_v49  ;;  %14852 = vmatprep.mubr.f32.mxu1 %v17084_v34  ;;  %15867 = vrcp.f32 %v17885_v6 }
 0x647   : > { %15375 = vmatprep.subr.bf16.mxu1 %v17297_v59 }
 0x649   : > { %14853 = vmatmul.mubr.f32.vlgmr.msra.gmra.mrb[38].mxu1 %v17101_v42 }
 0x64a   : > { %15377 = vmatpush3.bf16.msra.mxu1 %v17297_v59  ;;  %14859 = vmatprep.mubr.f32.mxu1 %v17074_v17  ;;  %v12731_v59 = vadd.f32 0.0001, %v17626_v61  ;;  %v18405_v61 = vsub.f32 %v17803_v48, %v17665_v0 }
 0x64b   : > { %15379 = vmatprep.subr.bf16.mxu1 %v17287_v51 }
 0x64f   : > { %v15866_v55 = vpop.eup %15865 }
 0x650   : > { %v15868_v6 = vpop.eup %15867 }
 0x651   : > { %14860 = vmatmul.mubr.f32.vlgmr.msra.gmra.mrb[38].mxu1 %v17088_v37 }
 0x652   : > { %15381 = vmatpush3.bf16.msra.mxu1 %v17287_v51  ;;  %14866 = vmatprep.mubr.f32.mxu1 %v17077_v20  ;;  %v18403_v51 = vsub.f32 %v17771_v52, %v17615_v60  ;;  %v18404_v60 = vsub.f32 %v17799_v13, %v17655_v22  ;;  %v12732_v52 = vadd.f32 0.0001, %v17681_v16 }
 0x653   : > { %15383 = vmatprep.subr.bf16.mxu1 %v17280_v49 }
 0x659   : > { %14867 = vmatmul.mubr.f32.vlgmr.msra.gmra.mrb[38].mxu1 %v17091_v38 }
 0x65a   : > { %15385 = vmatpush3.bf16.msra.mxu1 %v17280_v49  ;;  %14873 = vmatprep.mubr.f32.mxu1 %v17080_v29  ;;  %v18402_v29 = vsub.f32 %v17767_v45, %v17605_v21 }
 0x65b   : > { %15387 = vmatprep.subr.bf16.mxu1 %v17291_v8 }
 0x661   : > { %14874 = vmatmul.mubr.f32.vlgmr.msra.gmra.mrb[38].mxu1 %v17094_v39 }
 0x662   : > { %15389 = vmatpush3.bf16.msra.mxu1 %v17291_v8  ;;  %14880 = vmatprep.mubr.f32.mxu1 %v17074_v17 }
 0x663   : > { %15391 = vmatprep.subr.bf16.mxu1 %v17280_v49 }
 0x668   : > { %v14679_v34 = vpop.f32.mrb[28].mxu1 }
 0x669   : > { %v12667_v20 = vsub.f32 %v14679_v34, %v17607_v41  ;;  %v10110_v42 = vpop.f32.mrb[29].mxu1  ;;  %14881 = vmatmul.mubr.f32.vlgmr.msra.gmra.mrb[38].mxu1 %v17088_v37 }
 0x66a   : > { %v12666_v38 = vsub.f32 %v10110_v42, %v17617_v30  ;;  %15393 = vmatpush3.bf16.msra.mxu1 %v17280_v49  ;;  %14887 = vmatprep.mubr.f32.mxu1 %v17074_v17 }
 0x66b   : > { %v12739_v39 = vadd.f32 %v12667_v20, %v18402_v29  ;;  %v12688_v20 = vadd.f32 0.0001, %v12680_v10 }
 0x66c   : > { %v12738_v8 = vadd.f32 %v12666_v38, %v18403_v51 }
 0x66d   : > { %v12747_v58 = vadd.f32 0.0009, %v12739_v39 }
 0x66e   : > { %v12746_v53 = vadd.f32 0.0009, %v12738_v8 }
 0x66f   : > { %v12755_v12 = vmul.f32 %v12747_v58, %v12731_v59  ;;  %v12683_v59 = vmul.f32 2.0, %v17610_v28 }
 0x670   : > { %v12754_v41 = vmul.f32 %v12746_v53, %v12730_v44  ;;  %v12682_v53 = vmul.f32 2.0, %v17620_v31 }
 0x671   : > { %14888 = vmatmul.mubr.f32.vlgmr.msra.gmra.mrb[38].mxu1 %v17088_v37  ;;  %15869 = vrcp.f32 %v12755_v12 }
 0x672   : > { %15871 = vrcp.f32 %v12754_v41 }
 0x694   : > { %v14721_v49 = vpop.f32.mrb[30].mxu1 }
 0x695   : > { %v12669_v17 = vsub.f32 %v14721_v49, %v17657_v36  ;;  %v10612_v30 = vpop.f32.mrb[31].mxu1 }
 0x696   : > { %v12668_v21 = vsub.f32 %v10612_v30, %v17667_v19  ;;  %v12679_v19 = vmul.f32 2.0, %v17510_v46 }
 0x697   : > { %v12741_v27 = vadd.f32 %v12669_v17, %v18404_v60 }
 0x698   : > { %v12740_v26 = vadd.f32 %v12668_v21, %v18405_v61  ;;  %v12687_v23 = vadd.f32 0.0001, %v12679_v19  ;;  %v12691_v21 = vadd.f32 0.0001, %v12683_v59 }
 0x699   : > { %v12749_v45 = vadd.f32 0.0009, %v12741_v27  ;;  %v12690_v27 = vadd.f32 0.0001, %v12682_v53 }
 0x69a   : > { %v12748_v37 = vadd.f32 0.0009, %v12740_v26 }
 0x69b   : > { %v17931_v2 = vmul.f32 %v12749_v45, %v12733_v14  ;;  %v15870_v14 = vpop.eup %15869 }
 0x69c   : > { %v17933_v36 = vmul.f32 %v12748_v37, %v12732_v52  ;;  %v15872_v41 = vpop.eup %15871 }
 0x69d   : > { %15873 = vrcp.f32 %v17931_v2 }
 0x69e   : > { %15875 = vrcp.f32 %v17933_v36 }
 0x6a7   : > { %v15874_v2 = vpop.eup %15873 }
 0x6a8   : > { %v15876_v36 = vpop.eup %15875 }
 0x6c0   : > { %v14763_v22 = vpop.f32.mrb[32].mxu1 }
 0x6c1   : > { %v12671_v0 = vsub.f32 %v14763_v22, %v17510_v46  ;;  %v11114_v48 = vpop.f32.mrb[33].mxu1  ;;  %v12685_v22 = vmul.f32 2.0, %v17660_v3 }
 0x6c2   : > { %v12670_v13 = vsub.f32 %v11114_v48, %v17520_v15  ;;  %v18406_v48 = vld [vmem:[#allocation38_spill] sm:$0xff] }
 0x6c3   : > { %v12695_v16 = vmul.f32 2.0, %v12671_v0  ;;  %v12684_v32 = vmul.f32 2.0, %v18406_v48 }
 0x6c4   : > { %v12694_v7 = vmul.f32 2.0, %v12670_v13 }
 0x6c5   : > { %v12703_v33 = vadd.f32 0.0009, %v12695_v16 }
 0x6c6   : > { %v12702_v50 = vadd.f32 0.0009, %v12694_v7 }
 0x6c7   : > { %v12711_v56 = vmul.f32 %v12703_v33, %v12687_v23  ;;  %v12693_v23 = vadd.f32 0.0001, %v12685_v22 }
 0x6c8   : > { %v12710_v9 = vmul.f32 %v12702_v50, %v12686_v24  ;;  %v12692_v24 = vadd.f32 0.0001, %v12684_v32 }
 0x6c9   : > { %v12767_v1 = vmul.f32 %v15862_v4, %v12711_v56 }
 0x6ca   : > { %v12766_v43 = vmul.f32 %v15864_v57, %v12710_v9 }
 0x6cb   : > { %v12777_v46 = vsel %vm327_vm0, %v12767_v1, 0.0 }
 0x6cc   : > { %v12774_v25 = vsel %vm327_vm0, %v12766_v43, 0.0 }
 0x6cd   : > { %12775 = vadd.xlane.f32.xlu0 %v12774_v25 }
 0x6d1   : > { %12778 = vadd.xlane.f32.xlu0 %v12777_v46 }
 0x6ec   : > { %v14805_v15 = vpop.f32.mrb[34].mxu1 }
 0x6ed   : > { %v12673_v5 = vsub.f32 %v14805_v15, %v17560_v47  ;;  %v11616_v54 = vpop.f32.mrb[35].mxu1 }
 0x6ee   : > { %v12672_v62 = vsub.f32 %v11616_v54, %v17570_v11 }
 0x6ef   : > { %v12697_v35 = vmul.f32 2.0, %v12673_v5 }
 0x6f0   : > { %v12696_v18 = vmul.f32 2.0, %v12672_v62 }
 0x6f1   : > { %v12705_v34 = vadd.f32 0.0009, %v12697_v35 }
 0x6f2   : > { %v12704_v42 = vadd.f32 0.0009, %v12696_v18 }
 0x6f3   : > { %v12713_v38 = vmul.f32 %v12705_v34, %v12689_v40 }
 0x6f4   : > { %v12712_v29 = vmul.f32 %v12704_v42, %v12688_v20 }
 0x6f5   : > { %v12769_v39 = vmul.f32 %v15866_v55, %v12713_v38 }
 0x6f6   : > { %v12768_v51 = vmul.f32 %v15868_v6, %v12712_v29 }
 0x6f7   : > { %v12783_v47 = vsel %vm327_vm0, %v12769_v39, 0.0 }
 0x6f8   : > { %v12780_v8 = vsel %vm327_vm0, %v12768_v51, 0.0 }
 0x6f9   : > { %12781 = vadd.xlane.f32.xlu1 %v12780_v8 }
 0x6fd   : > { %12784 = vadd.xlane.f32.xlu1 %v12783_v47 }
 0x718   : > { %v14847_v11 = vpop.f32.mrb[36].mxu1 }
 0x719   : > { %v12675_v58 = vsub.f32 %v14847_v11, %v17610_v28  ;;  %v12118_v44 = vpop.f32.mrb[37].mxu1 }
 0x71a   : > { %v12674_v49 = vsub.f32 %v12118_v44, %v17620_v31 }
 0x71b   : > { %v12699_v17 = vmul.f32 2.0, %v12675_v58 }
 0x71c   : > { %v12698_v30 = vmul.f32 2.0, %v12674_v49 }
 0x71d   : > { %v12707_v60 = vadd.f32 0.0009, %v12699_v17 }
 0x71e   : > { %v12706_v61 = vadd.f32 0.0009, %v12698_v30 }
 0x71f   : > { %v12715_v26 = vmul.f32 %v12707_v60, %v12691_v21 }
 0x720   : > { %v12714_v12 = vmul.f32 %v12706_v61, %v12690_v27 }
 0x721   : > { %v12771_v45 = vmul.f32 %v15870_v14, %v12715_v26 }
 0x722   : > { %v12770_v52 = vmul.f32 %v15872_v41, %v12714_v12 }
 0x723   : > { %v12789_v37 = vsel %vm327_vm0, %v12771_v45, 0.0 }
 0x724   : > { %12790 = vadd.xlane.f32.xlu1 %v12789_v37  ;;  %v12786_v28 = vsel %vm327_vm0, %v12770_v52, 0.0 }
 0x725   : > { %12787 = vadd.xlane.f32.xlu0 %v12786_v28 }
 0x744   : > { %v14889_v31 = vpop.f32.mrb[38].mxu1 }
 0x745   : > { %v12677_v19 = vsub.f32 %v14889_v31, %v17660_v3  ;;  %v12620_v0 = vpop.f32.mrb[39].mxu1 }
 0x746   : > { %v12676_v13 = vsub.f32 %v12620_v0, %v18406_v48 }
 0x747   : > { %v12701_v16 = vmul.f32 2.0, %v12677_v19 }
 0x748   : > { %v12700_v7 = vmul.f32 2.0, %v12676_v13 }
 0x749   : > { %v12709_v33 = vadd.f32 0.0009, %v12701_v16 }
 0x74a   : > { %v12708_v50 = vadd.f32 0.0009, %v12700_v7 }
 0x74b   : > { %v12717_v56 = vmul.f32 %v12709_v33, %v12693_v23 }
 0x74c   : > { %v12716_v4 = vmul.f32 %v12708_v50, %v12692_v24 }
 0x74d   : > { %v12773_v9 = vmul.f32 %v15874_v2, %v12717_v56 }
 0x74e   : > { %v12772_v57 = vmul.f32 %v15876_v36, %v12716_v4 }
 0x74f   : > { %v12795_v1 = vsel %vm327_vm0, %v12773_v9, 0.0 }
 0x750   : > { %12796 = vadd.xlane.f32.xlu1 %v12795_v1  ;;  %v12792_v3 = vsel %vm327_vm0, %v12772_v57, 0.0 }
 0x751   : > { %12793 = vadd.xlane.f32.xlu0 %v12792_v3 }
 0x75a   : > { %v12776_v43 = vpop.xlane.xlu0 %12775 }
 0x75e   : > { %v12779_v46 = vpop.xlane.xlu0 %12778 }
 0x75f   : > { %v12798_v15 = vadd.f32 %v12779_v46, %v12776_v43 }
 0x786   : > { %v12782_v25 = vpop.xlane.xlu1 %12781 }
 0x787   : > { %v12799_v5 = vadd.f32 %v12798_v15, %v12782_v25 }
 0x78a   : > { %v12785_v63 = vpop.xlane.xlu1 %12784 }
 0x78b   : > { %v12800_v10 = vadd.f32 %v12799_v5, %v12785_v63 }
 0x7b1   : > { %v12791_v35 = vpop.xlane.xlu1 %12790 }
 0x7b2   : > { %v12788_v54 = vpop.xlane.xlu0 %12787 }
 0x7b3   : > { %v12801_v62 = vadd.f32 %v12800_v10, %v12788_v54 }
 0x7b5   : > { %v12802_v18 = vadd.f32 %v12801_v62, %v12791_v35 }
 0x7dd   : > { %v12797_v20 = vpop.xlane.xlu1 %12796 }
 0x7de   : > { %v12794_v40 = vpop.xlane.xlu0 %12793 }
 0x7df   : > { %v12803_v34 = vadd.f32 %v12802_v18, %v12794_v40 }
 0x7e1   : > { %v12804_v42 = vadd.f32 %v12803_v34, %v12797_v20 }
 0x7e3   : > { %v12805_v38 = vrot.slane %v12804_v42, 4 }
 0x7e5   : > { %v12806_v55 = vadd.f32 %v12805_v38, %v12804_v42 }
 0x7e7   : > { %v12807_v29 = vrot.slane %v12806_v55, 2 }
 0x7e9   : > { %v12808_v6 = vadd.f32 %v12807_v29, %v12806_v55 }
 0x7eb   : > { %v12809_v39 = vrot.slane %v12808_v6, 1 }
 0x7ed   : > { %v12810_v51 = vadd.f32 %v12809_v39, %v12808_v6 }
 0x7ef   : > { %12812 = vst.msk [vmem:[%s282_s10] sm:$0x1] %vm12811_vm1, %v12810_v51 }
 0x7f0 PF: > { %p18_p12 = scmp.ge.s32.totalorder %s16171_s5, 4   ;;  %s18407_s15 = smov %s16031_s16 }
 0x7f1   : > { %s18408_s16 = smov %s16035_s17  ;;  %s18409_s17 = smov %s16182_s8 }
 0x7f2   : > { %s18410_s18 = smov %s16171_s5  ;;  %20 = sbr.rel (!%p18_p12) target bundleno = 6 (0x6), region = 97 }
 0x7f9   :  { %12830 = vsyncpa [#allocation3], 1 }
 0x7fa   :  { %12832 = vsyncpa [#allocation3 + $0x1], 1 }
 0x7fb   :  { %12833 = vsyncpa [#allocation5], 1 }
 0x7fc   :  { %12835 = vsyncpa [#allocation5 + $0x1], 1 }
 0x7fd   :  { %12836 = vsyncpa [#allocation8], 1 }

</bundles_post_ra>
